<compile_context>
chip_gen: v7x
topology: tpu7x:2x2x1
jax: 0.10.0
libtpu: 0.0.40
codegen_flags: <defaults>
</compile_context>

<pallas_src>
import functools

import jax
import jax.numpy as jnp
from jax.experimental import pallas as pl
from jax.experimental.pallas import tpu as pltpu


# ---------------------------------------------------------------------------
# Fused Pallas kernel:  fc1 -> rational -> fc2 -> rational   (one token tile)
# ---------------------------------------------------------------------------
def _rational(y, coef_ref, base, den_ref):
    """Grouped rational activation on a (tm, N) tile; dtype follows y/den.

    P(y): degree-5 Horner with scalar coefficients read from SMEM (shared across
    all columns/groups).  Q(y) = 1 + |b1*y + b2*y^2 + b3*y^3 + b4*y^4| with
    per-column coefficients (den_ref, shape (4, N), groups expanded to columns).
    Divide goes to the EUP via approx reciprocal; the Newton refinement step was
    dropped per perf review (EUP approx err ~2^-12 is far inside tolerance).
    """
    dt = y.dtype
    # Scalar numerator coefficients (SMEM); cheap scalar casts to compute dtype.
    c0, c1, c2, c3, c4, c5 = (coef_ref[base + k].astype(dt) for k in range(6))
    # Denominator rows hoisted once per tile (perf review: avoid re-emitting loads).
    d0, d1, d2, d3 = (den_ref[k:k + 1, :] for k in range(4))

    p = c5
    for c in (c4, c3, c2, c1, c0):
        p = p * y + c                     # vector-scalar VPU ops, no loads

    q = d3
    for d in (d2, d1, d0):
        q = q * y + d
    q = 1.0 + jnp.abs(q * y)              # Q(y) >= 1, divide is safe

    r = pl.reciprocal(q.astype(jnp.float32), approx=True)   # EUP (frees VALU slots)
    return p * r.astype(dt)


def _group_kan_kernel(coef_ref, x_ref, w1_ref, b1_ref, den1_ref,
                      w2_ref, b2_ref, den2_ref, o_ref, *, act1_dtype):
    # fc1: bf16 MXU matmul, f32 accumulation
    y = jnp.dot(x_ref[...], w1_ref[...], preferred_element_type=jnp.float32)
    y = (y + b1_ref[...]).astype(act1_dtype)
    # act1 (drop1 = identity): bf16 on v6e/v7x (bf16 VALU/EUP), f32 on v5e
    h = _rational(y, coef_ref, 0, den1_ref)

    # fc2 on the VMEM-resident hidden activation (never written to HBM)
    y2 = jnp.dot(h.astype(jnp.bfloat16), w2_ref[...],
                 preferred_element_type=jnp.float32)
    y2 = y2 + b2_ref[...]
    # act2 (drop2 = identity) stays f32 for output accuracy
    o_ref[...] = _rational(y2, coef_ref, 6, den2_ref).astype(o_ref.dtype)


# ---------------------------------------------------------------------------
# Wrapper
# ---------------------------------------------------------------------------
def _round_up(x, m):
    return ((x + m - 1) // m) * m


def _cdiv(a, b):
    return -(-a // b)


def _default_act1_bf16():
    """bf16 elementwise math only pays off on chips with a bf16 VALU/EUP
    (v6e / Trillium and later). This is a perf switch; correct either way."""
    try:
        kind = jax.devices()[0].device_kind.lower()
    except Exception:
        return False
    return any(tag in kind for tag in ("v6", "v7", "7x", "trillium"))


def _vmem_limit_bytes(tm, cin, h, cout, act1_itemsize, out_itemsize, single_buffer):
    inv = (cin * h + h * cout) * 2                    # bf16 weights
    inv += (h + cout) * 4                             # f32 biases
    inv += 4 * h * act1_itemsize + 4 * cout * 4       # per-column den tables
    inv *= 1 if single_buffer else 2
    io = 2 * tm * (cin * 2 + cout * out_itemsize)     # double-buffered x / out tiles
    # 8 MiB headroom for intermediates / Mosaic scratch; cap below v7x physical VMEM.
    return int(min(inv + io + (8 << 20), 48 << 20))


def group_kan_fused(x2d, params, *, tm=256, out_dtype=jnp.bfloat16, act1_bf16=None):
    """x2d: (M, Cin) f32 tokens -> (M, Cout) out_dtype, fused fc1/act/fc2/act."""
    M, Cin = x2d.shape
    H = params["w1"].shape[0]
    Cout = params["w2"].shape[0]
    G = params["num_groups"]
    assert H % G == 0 and Cout % G == 0

    if act1_bf16 is None:
        act1_bf16 = _default_act1_bf16()
    act1_dt = jnp.bfloat16 if act1_bf16 else jnp.float32

    # Tile selection: biggest tile that still gives >=4 grid steps when M allows
    # (2 steps per v7x TensorCore so x fetch / output writeback overlap compute).
    tm = max(8, min(tm, _round_up(M, 8)))
    while tm > 128 and _cdiv(M, tm) < 4:
        tm //= 2
    grid_m = _cdiv(M, tm)
    # No wrapper-side jnp.pad: Pallas masks the ragged last tile's loads/stores
    # itself, and rows are independent so padded-row garbage never leaks.

    # bf16 inputs for the MXU (f32 accumulation inside the kernel).
    xb = x2d.astype(jnp.bfloat16)
    w1t = params["w1"].T.astype(jnp.bfloat16)                # (Cin, H)
    w2t = params["w2"].T.astype(jnp.bfloat16)                # (H, Cout)
    b1 = params["b1"].reshape(1, H).astype(jnp.float32)
    b2 = params["b2"].reshape(1, Cout).astype(jnp.float32)

    # Per-group denominator coeffs expanded to per-column tables (tiny).
    den1 = jnp.repeat(params["act1_den"], H // G, axis=0).T.astype(act1_dt)       # (4, H)
    den2 = jnp.repeat(params["act2_den"], Cout // G, axis=0).T.astype(jnp.float32)  # (4, Cout)
    # Shared numerator coeffs (act1: [0:6], act2: [6:12]) -> SMEM scalars.
    coef = jnp.concatenate([params["act1_num"].reshape(6),
                            params["act2_num"].reshape(6)]).astype(jnp.float32)   # (12,)

    kernel = functools.partial(_group_kan_kernel, act1_dtype=act1_dt)

    def build(single_buffer):
        def inv(shape):
            # Grid-invariant operands: single-buffer them to halve weight VMEM.
            if single_buffer:
                return pl.BlockSpec(shape, lambda i: (0, 0),
                                    pipeline_mode=pl.Buffered(1))
            return pl.BlockSpec(shape, lambda i: (0, 0))

        vmem_limit = _vmem_limit_bytes(
            tm, Cin, H, Cout,
            act1_itemsize=2 if act1_bf16 else 4,
            out_itemsize=jnp.dtype(out_dtype).itemsize,
            single_buffer=single_buffer)

        return pl.pallas_call(
            kernel,
            out_shape=jax.ShapeDtypeStruct((M, Cout), out_dtype),
            grid_spec=pltpu.PrefetchScalarGridSpec(
                num_scalar_prefetch=0,
                grid=(grid_m,),
                in_specs=[
                    pl.BlockSpec(memory_space=pltpu.MemorySpace.SMEM),  # numerator scalars
                    pl.BlockSpec((tm, Cin), lambda i: (i, 0)),          # x token tile
                    inv((Cin, H)),                                      # W1 (VMEM-resident)
                    inv((1, H)),                                        # b1
                    inv((4, H)),                                        # den1 per-column
                    inv((H, Cout)),                                     # W2 (VMEM-resident)
                    inv((1, Cout)),                                     # b2
                    inv((4, Cout)),                                     # den2 per-column
                ],
                out_specs=pl.BlockSpec((tm, Cout), lambda i: (i, 0)),
            ),
            compiler_params=pltpu.CompilerParams(
                dimension_semantics=("parallel",),
                vmem_limit_bytes=vmem_limit),
        )

    args = (coef, xb, w1t, b1, den1, w2t, b2, den2)
    try:
        return build(single_buffer=True)(*args)
    except Exception:
        # Fallback for jax versions where pl.Buffered(1) on grid-invariant inputs
        # is rejected: default double buffering (functionally identical, 2x weight
        # VMEM; only matters at production feature sizes).
        return build(single_buffer=False)(*args)


def group_kan_layer_forward(params, x, *, tm=256, out_dtype=jnp.bfloat16,
                            act1_bf16=None):
    """x: (B, L, in_features) float32 -> (B, L, out_features) out_dtype."""
    B, L, Cin = x.shape
    Cout = params["w2"].shape[0]
    y2d = group_kan_fused(x.reshape(B * L, Cin).astype(jnp.float32), params,
                          tm=tm, out_dtype=out_dtype, act1_bf16=act1_bf16)
    return y2d.reshape(B, L, Cout)


# ---------------------------------------------------------------------------
# Parameter construction (deterministic, synthetic — mirrors module __init__)
# ---------------------------------------------------------------------------
_KAT_NUM_INIT = jnp.array(
    [-0.0034586861, 0.5000000000, 0.4434729727, 0.0654884935,
     -0.0199506298, -0.0023397192], dtype=jnp.float32)          # (6,)
_KAT_DEN_INIT = jnp.array(
    [0.0243160000, 0.4593000000, 0.0000000000, 0.0871000000],
    dtype=jnp.float32)                                           # (4,)


def _linear_init(key, in_f, out_f):
    """PyTorch nn.Linear default init: U(-1/sqrt(in), 1/sqrt(in))."""
    kw, kb = jax.random.split(key)
    bound = 1.0 / jnp.sqrt(jnp.float32(in_f))
    w = jax.random.uniform(kw, (out_f, in_f), jnp.float32, -bound, bound)
    b = jax.random.uniform(kb, (out_f,), jnp.float32, -bound, bound)
    return w, b


def make_group_kan_params(key, in_features, hidden_features=None,
                          out_features=None, num_groups=8):
    hidden_features = hidden_features or in_features
    out_features = out_features or in_features
    k1, k2 = jax.random.split(key)
    w1, b1 = _linear_init(k1, in_features, hidden_features)
    w2, b2 = _linear_init(k2, hidden_features, out_features)
    act1_num = _KAT_NUM_INIT.reshape(1, 6)
    act1_den = jnp.tile(_KAT_DEN_INIT.reshape(1, 4), (num_groups, 1))
    act2_num = _KAT_NUM_INIT.reshape(1, 6)
    act2_den = jnp.tile(_KAT_DEN_INIT.reshape(1, 4), (num_groups, 1))
    return dict(w1=w1, b1=b1, w2=w2, b2=b2,
                act1_num=act1_num, act1_den=act1_den,
                act2_num=act2_num, act2_den=act2_den,
                num_groups=num_groups)


# ---------------------------------------------------------------------------
# Pure-JAX reference (mirrors the kernel's dtype path: bf16 matmul inputs,
# optional bf16 act1, f32 act2)
# ---------------------------------------------------------------------------
def _rational_ref(y, num, den, num_groups, dtype=jnp.float32):
    N = y.shape[-1]
    gs = N // num_groups
    a = num.reshape(6).astype(dtype)
    b = jnp.repeat(den, gs, axis=0).T.astype(dtype)        # (4, N)
    yd = y.astype(dtype)
    p = a[5]
    for k in (4, 3, 2, 1, 0):
        p = p * yd + a[k]
    q = b[3]
    for k in (2, 1, 0):
        q = q * yd + b[k]
    q = 1.0 + jnp.abs(q * yd)
    return p.astype(jnp.float32) / q.astype(jnp.float32)


def _bf16_round(v):
    return v.astype(jnp.bfloat16).astype(jnp.float32)


def group_kan_layer_ref(params, x, *, act1_bf16=False):
    G = params["num_groups"]
    act1_dt = jnp.bfloat16 if act1_bf16 else jnp.float32
    h = _bf16_round(x) @ _bf16_round(params["w1"]).T + params["b1"]
    h = _rational_ref(h, params["act1_num"], params["act1_den"], G, dtype=act1_dt)
    y = _bf16_round(h) @ _bf16_round(params["w2"]).T + params["b2"]
    y = _rational_ref(y, params["act2_num"], params["act2_den"], G, dtype=jnp.float32)
    return y


# ---------------------------------------------------------------------------
if __name__ == "__main__":
    key = jax.random.PRNGKey(0)
    kx, kp = jax.random.split(key)

    # Small, lane-dense demo shapes (features multiples of 128; real configs
    # should prefer multiples of 256 to fill the 2x256x256 MXU on v6e/v7x).
    # B*L = 512 -> 4 grid steps of tm=128 (>=2 per v7x TensorCore).
    B, L = 4, 128
    in_features, hidden_features, out_features = 128, 256, 128

    x = jax.random.normal(kx, (B, L, in_features), dtype=jnp.float32)
    params = make_group_kan_params(kp, in_features, hidden_features, out_features)

    act1_bf16 = _default_act1_bf16()
    out = jax.block_until_ready(
        group_kan_layer_forward(params, x, act1_bf16=act1_bf16))
    assert out.shape == (B, L, out_features)

    ref = group_kan_layer_ref(params, x, act1_bf16=act1_bf16)
    out32 = out.astype(jnp.float32)
    max_err = float(jnp.max(jnp.abs(out32 - ref)))
    # Output is bf16 by design (halves HBM writeback); tolerance sized accordingly.
    assert jnp.allclose(out32, ref, atol=5e-3, rtol=1e-2), \
        f"Pallas vs reference mismatch (max abs err {max_err})"

    print("KERNEL_OK")
</pallas_src>

<mosaic_0001>
module attributes {stable_mosaic.version = 11 : i64} {
  func.func @_group_kan_kernel(%arg0: i32, %arg1: memref<12xf32, #tpu.memory_space<smem>>, %arg2: memref<128x128xbf16, #tpu.memory_space<vmem>>, %arg3: memref<128x256xbf16, #tpu.memory_space<vmem>>, %arg4: memref<1x256xf32, #tpu.memory_space<vmem>>, %arg5: memref<4x256xf32, #tpu.memory_space<vmem>>, %arg6: memref<256x128xbf16, #tpu.memory_space<vmem>>, %arg7: memref<1x128xf32, #tpu.memory_space<vmem>>, %arg8: memref<4x128xf32, #tpu.memory_space<vmem>>, %arg9: memref<128x128xbf16, #tpu.memory_space<vmem>>) attributes {dimension_semantics = [#tpu.dimension_semantics<parallel>], iteration_bounds = array<i64: 4>, scalar_prefetch = 0 : i64, scratch_operands = 0 : i64, tpu.core_type = #tpu.core_type<tc>, window_params = [{transform_indices = @transform_0, window_bounds = array<i64: 12>}, {transform_indices = @transform_1, window_bounds = array<i64: 128, 128>}, {pipeline_mode = #tpu.pipeline_mode<synchronous>, transform_indices = @transform_2, window_bounds = array<i64: 128, 256>}, {pipeline_mode = #tpu.pipeline_mode<synchronous>, transform_indices = @transform_3, window_bounds = array<i64: 1, 256>}, {pipeline_mode = #tpu.pipeline_mode<synchronous>, transform_indices = @transform_4, window_bounds = array<i64: 4, 256>}, {pipeline_mode = #tpu.pipeline_mode<synchronous>, transform_indices = @transform_5, window_bounds = array<i64: 256, 128>}, {pipeline_mode = #tpu.pipeline_mode<synchronous>, transform_indices = @transform_6, window_bounds = array<i64: 1, 128>}, {pipeline_mode = #tpu.pipeline_mode<synchronous>, transform_indices = @transform_7, window_bounds = array<i64: 4, 128>}, {transform_indices = @transform_8, window_bounds = array<i64: 128, 128>}]} {
    %c0 = arith.constant 0 : index
    %c0_0 = arith.constant 0 : index
    %0 = vector.load %arg2[%c0, %c0_0] : memref<128x128xbf16, #tpu.memory_space<vmem>>, vector<128x128xbf16>
    %c0_1 = arith.constant 0 : index
    %c0_2 = arith.constant 0 : index
    %1 = vector.load %arg3[%c0_1, %c0_2] : memref<128x256xbf16, #tpu.memory_space<vmem>>, vector<128x256xbf16>
    %cst = arith.constant dense<0.000000e+00> : vector<128x256xf32>
    %2 = tpu.matmul %0, %1, %cst {dimension_numbers = #tpu.dot_dimension_numbers<[1], [0], [0], [1], [0, 0, 1, 1], [], []>} : vector<128x128xbf16>, vector<128x256xbf16>, vector<128x256xf32> -> vector<128x256xf32>
    %c0_3 = arith.constant 0 : index
    %c0_4 = arith.constant 0 : index
    %3 = vector.load %arg4[%c0_3, %c0_4] : memref<1x256xf32, #tpu.memory_space<vmem>>, vector<1x256xf32>
    %4 = vector.broadcast %3 : vector<1x256xf32> to vector<128x256xf32>
    %5 = arith.addf %2, %4 : vector<128x256xf32>
    %c0_5 = arith.constant 0 : index
    %6 = memref.load %arg1[%c0_5] : memref<12xf32, #tpu.memory_space<smem>>
    %c1 = arith.constant 1 : index
    %7 = memref.load %arg1[%c1] : memref<12xf32, #tpu.memory_space<smem>>
    %c2 = arith.constant 2 : index
    %8 = memref.load %arg1[%c2] : memref<12xf32, #tpu.memory_space<smem>>
    %c3 = arith.constant 3 : index
    %9 = memref.load %arg1[%c3] : memref<12xf32, #tpu.memory_space<smem>>
    %c4 = arith.constant 4 : index
    %10 = memref.load %arg1[%c4] : memref<12xf32, #tpu.memory_space<smem>>
    %c5 = arith.constant 5 : index
    %11 = memref.load %arg1[%c5] : memref<12xf32, #tpu.memory_space<smem>>
    %c0_6 = arith.constant 0 : index
    %c0_7 = arith.constant 0 : index
    %12 = vector.load %arg5[%c0_6, %c0_7] : memref<4x256xf32, #tpu.memory_space<vmem>>, vector<1x256xf32>
    %c1_8 = arith.constant 1 : index
    %c0_9 = arith.constant 0 : index
    %13 = vector.load %arg5[%c1_8, %c0_9] : memref<4x256xf32, #tpu.memory_space<vmem>>, vector<1x256xf32>
    %c2_10 = arith.constant 2 : index
    %c0_11 = arith.constant 0 : index
    %14 = vector.load %arg5[%c2_10, %c0_11] : memref<4x256xf32, #tpu.memory_space<vmem>>, vector<1x256xf32>
    %c3_12 = arith.constant 3 : index
    %c0_13 = arith.constant 0 : index
    %15 = vector.load %arg5[%c3_12, %c0_13] : memref<4x256xf32, #tpu.memory_space<vmem>>, vector<1x256xf32>
    %16 = vector.broadcast %11 : f32 to vector<128x256xf32>
    %17 = arith.mulf %16, %5 : vector<128x256xf32>
    %18 = vector.broadcast %10 : f32 to vector<128x256xf32>
    %19 = arith.addf %17, %18 : vector<128x256xf32>
    %20 = arith.mulf %19, %5 : vector<128x256xf32>
    %21 = vector.broadcast %9 : f32 to vector<128x256xf32>
    %22 = arith.addf %20, %21 : vector<128x256xf32>
    %23 = arith.mulf %22, %5 : vector<128x256xf32>
    %24 = vector.broadcast %8 : f32 to vector<128x256xf32>
    %25 = arith.addf %23, %24 : vector<128x256xf32>
    %26 = arith.mulf %25, %5 : vector<128x256xf32>
    %27 = vector.broadcast %7 : f32 to vector<128x256xf32>
    %28 = arith.addf %26, %27 : vector<128x256xf32>
    %29 = arith.mulf %28, %5 : vector<128x256xf32>
    %30 = vector.broadcast %6 : f32 to vector<128x256xf32>
    %31 = arith.addf %29, %30 : vector<128x256xf32>
    %32 = vector.broadcast %15 : vector<1x256xf32> to vector<128x256xf32>
    %33 = arith.mulf %32, %5 : vector<128x256xf32>
    %34 = vector.broadcast %14 : vector<1x256xf32> to vector<128x256xf32>
    %35 = arith.addf %33, %34 : vector<128x256xf32>
    %36 = arith.mulf %35, %5 : vector<128x256xf32>
    %37 = vector.broadcast %13 : vector<1x256xf32> to vector<128x256xf32>
    %38 = arith.addf %36, %37 : vector<128x256xf32>
    %39 = arith.mulf %38, %5 : vector<128x256xf32>
    %40 = vector.broadcast %12 : vector<1x256xf32> to vector<128x256xf32>
    %41 = arith.addf %39, %40 : vector<128x256xf32>
    %42 = arith.mulf %41, %5 : vector<128x256xf32>
    %43 = math.absf %42 : vector<128x256xf32>
    %cst_14 = arith.constant 1.000000e+00 : f32
    %44 = vector.broadcast %cst_14 : f32 to vector<128x256xf32>
    %45 = arith.addf %44, %43 : vector<128x256xf32>
    %46 = tpu.reciprocal %45 {approx = true} : vector<128x256xf32> -> vector<128x256xf32>
    %47 = arith.mulf %31, %46 : vector<128x256xf32>
    %48 = arith.truncf %47 : vector<128x256xf32> to vector<128x256xbf16>
    %c0_15 = arith.constant 0 : index
    %c0_16 = arith.constant 0 : index
    %49 = vector.load %arg6[%c0_15, %c0_16] : memref<256x128xbf16, #tpu.memory_space<vmem>>, vector<256x128xbf16>
    %cst_17 = arith.constant dense<0.000000e+00> : vector<128x128xf32>
    %50 = tpu.matmul %48, %49, %cst_17 {dimension_numbers = #tpu.dot_dimension_numbers<[1], [0], [0], [1], [0, 0, 1, 1], [], []>} : vector<128x256xbf16>, vector<256x128xbf16>, vector<128x128xf32> -> vector<128x128xf32>
    %c0_18 = arith.constant 0 : index
    %c0_19 = arith.constant 0 : index
    %51 = vector.load %arg7[%c0_18, %c0_19] : memref<1x128xf32, #tpu.memory_space<vmem>>, vector<1x128xf32>
    %52 = vector.broadcast %51 : vector<1x128xf32> to vector<128x128xf32>
    %53 = arith.addf %50, %52 : vector<128x128xf32>
    %c6 = arith.constant 6 : index
    %54 = memref.load %arg1[%c6] : memref<12xf32, #tpu.memory_space<smem>>
    %c7 = arith.constant 7 : index
    %55 = memref.load %arg1[%c7] : memref<12xf32, #tpu.memory_space<smem>>
    %c8 = arith.constant 8 : index
    %56 = memref.load %arg1[%c8] : memref<12xf32, #tpu.memory_space<smem>>
    %c9 = arith.constant 9 : index
    %57 = memref.load %arg1[%c9] : memref<12xf32, #tpu.memory_space<smem>>
    %c10 = arith.constant 10 : index
    %58 = memref.load %arg1[%c10] : memref<12xf32, #tpu.memory_space<smem>>
    %c11 = arith.constant 11 : index
    %59 = memref.load %arg1[%c11] : memref<12xf32, #tpu.memory_space<smem>>
    %c0_20 = arith.constant 0 : index
    %c0_21 = arith.constant 0 : index
    %60 = vector.load %arg8[%c0_20, %c0_21] : memref<4x128xf32, #tpu.memory_space<vmem>>, vector<1x128xf32>
    %c1_22 = arith.constant 1 : index
    %c0_23 = arith.constant 0 : index
    %61 = vector.load %arg8[%c1_22, %c0_23] : memref<4x128xf32, #tpu.memory_space<vmem>>, vector<1x128xf32>
    %c2_24 = arith.constant 2 : index
    %c0_25 = arith.constant 0 : index
    %62 = vector.load %arg8[%c2_24, %c0_25] : memref<4x128xf32, #tpu.memory_space<vmem>>, vector<1x128xf32>
    %c3_26 = arith.constant 3 : index
    %c0_27 = arith.constant 0 : index
    %63 = vector.load %arg8[%c3_26, %c0_27] : memref<4x128xf32, #tpu.memory_space<vmem>>, vector<1x128xf32>
    %64 = vector.broadcast %59 : f32 to vector<128x128xf32>
    %65 = arith.mulf %64, %53 : vector<128x128xf32>
    %66 = vector.broadcast %58 : f32 to vector<128x128xf32>
    %67 = arith.addf %65, %66 : vector<128x128xf32>
    %68 = arith.mulf %67, %53 : vector<128x128xf32>
    %69 = vector.broadcast %57 : f32 to vector<128x128xf32>
    %70 = arith.addf %68, %69 : vector<128x128xf32>
    %71 = arith.mulf %70, %53 : vector<128x128xf32>
    %72 = vector.broadcast %56 : f32 to vector<128x128xf32>
    %73 = arith.addf %71, %72 : vector<128x128xf32>
    %74 = arith.mulf %73, %53 : vector<128x128xf32>
    %75 = vector.broadcast %55 : f32 to vector<128x128xf32>
    %76 = arith.addf %74, %75 : vector<128x128xf32>
    %77 = arith.mulf %76, %53 : vector<128x128xf32>
    %78 = vector.broadcast %54 : f32 to vector<128x128xf32>
    %79 = arith.addf %77, %78 : vector<128x128xf32>
    %80 = vector.broadcast %63 : vector<1x128xf32> to vector<128x128xf32>
    %81 = arith.mulf %80, %53 : vector<128x128xf32>
    %82 = vector.broadcast %62 : vector<1x128xf32> to vector<128x128xf32>
    %83 = arith.addf %81, %82 : vector<128x128xf32>
    %84 = arith.mulf %83, %53 : vector<128x128xf32>
    %85 = vector.broadcast %61 : vector<1x128xf32> to vector<128x128xf32>
    %86 = arith.addf %84, %85 : vector<128x128xf32>
    %87 = arith.mulf %86, %53 : vector<128x128xf32>
    %88 = vector.broadcast %60 : vector<1x128xf32> to vector<128x128xf32>
    %89 = arith.addf %87, %88 : vector<128x128xf32>
    %90 = arith.mulf %89, %53 : vector<128x128xf32>
    %91 = math.absf %90 : vector<128x128xf32>
    %cst_28 = arith.constant 1.000000e+00 : f32
    %92 = vector.broadcast %cst_28 : f32 to vector<128x128xf32>
    %93 = arith.addf %92, %91 : vector<128x128xf32>
    %94 = tpu.reciprocal %93 {approx = true} : vector<128x128xf32> -> vector<128x128xf32>
    %95 = arith.mulf %79, %94 : vector<128x128xf32>
    %96 = arith.truncf %95 : vector<128x128xf32> to vector<128x128xbf16>
    %c0_29 = arith.constant 0 : index
    %c0_30 = arith.constant 0 : index
    %97 = vector.load %arg9[%c0_29, %c0_30] : memref<128x128xbf16, #tpu.memory_space<vmem>>, vector<128x128xbf16>
    tpu.vector_store %arg9[%c0_29, %c0_30], %96 {strides = array<i32>} : memref<128x128xbf16, #tpu.memory_space<vmem>>, vector<128x128xbf16>,
    return
  }
  func.func @transform_0(%arg0: i32) -> i32 {
    %c0_i32 = arith.constant 0 : i32
    %c0_i32_0 = arith.constant 0 : i32
    return %c0_i32 : i32
  }
  func.func @transform_1(%arg0: i32) -> (i32, i32) {
    %c0_i32 = arith.constant 0 : i32
    %c0_i32_0 = arith.constant 0 : i32
    return %arg0, %c0_i32 : i32, i32
  }
  func.func @transform_2(%arg0: i32) -> (i32, i32) {
    %c0_i32 = arith.constant 0 : i32
    %c0_i32_0 = arith.constant 0 : i32
    %c0_i32_1 = arith.constant 0 : i32
    return %c0_i32, %c0_i32_0 : i32, i32
  }
  func.func @transform_3(%arg0: i32) -> (i32, i32) {
    %c0_i32 = arith.constant 0 : i32
    %c0_i32_0 = arith.constant 0 : i32
    %c0_i32_1 = arith.constant 0 : i32
    return %c0_i32, %c0_i32_0 : i32, i32
  }
  func.func @transform_4(%arg0: i32) -> (i32, i32) {
    %c0_i32 = arith.constant 0 : i32
    %c0_i32_0 = arith.constant 0 : i32
    %c0_i32_1 = arith.constant 0 : i32
    return %c0_i32, %c0_i32_0 : i32, i32
  }
  func.func @transform_5(%arg0: i32) -> (i32, i32) {
    %c0_i32 = arith.constant 0 : i32
    %c0_i32_0 = arith.constant 0 : i32
    %c0_i32_1 = arith.constant 0 : i32
    return %c0_i32, %c0_i32_0 : i32, i32
  }
  func.func @transform_6(%arg0: i32) -> (i32, i32) {
    %c0_i32 = arith.constant 0 : i32
    %c0_i32_0 = arith.constant 0 : i32
    %c0_i32_1 = arith.constant 0 : i32
    return %c0_i32, %c0_i32_0 : i32, i32
  }
  func.func @transform_7(%arg0: i32) -> (i32, i32) {
    %c0_i32 = arith.constant 0 : i32
    %c0_i32_0 = arith.constant 0 : i32
    %c0_i32_1 = arith.constant 0 : i32
    return %c0_i32, %c0_i32_0 : i32, i32
  }
  func.func @transform_8(%arg0: i32) -> (i32, i32) {
    %c0_i32 = arith.constant 0 : i32
    %c0_i32_0 = arith.constant 0 : i32
    return %arg0, %c0_i32 : i32, i32
  }
}

module attributes {stable_mosaic.version = 11 : i64} {
  func.func @_group_kan_kernel(%arg0: i32, %arg1: memref<12xf32, #tpu.memory_space<smem>>, %arg2: memref<128x128xbf16, #tpu.memory_space<vmem>>, %arg3: memref<128x256xbf16, #tpu.memory_space<vmem>>, %arg4: memref<1x256xf32, #tpu.memory_space<vmem>>, %arg5: memref<4x256xf32, #tpu.memory_space<vmem>>, %arg6: memref<256x128xbf16, #tpu.memory_space<vmem>>, %arg7: memref<1x128xf32, #tpu.memory_space<vmem>>, %arg8: memref<4x128xf32, #tpu.memory_space<vmem>>, %arg9: memref<128x128xbf16, #tpu.memory_space<vmem>>) attributes {dimension_semantics = [#tpu.dimension_semantics<parallel>], iteration_bounds = array<i64: 4>, scalar_prefetch = 0 : i64, scratch_operands = 0 : i64, tpu.core_type = #tpu.core_type<tc>, window_params = [{transform_indices = @transform_0, window_bounds = array<i64: 12>}, {transform_indices = @transform_1, window_bounds = array<i64: 128, 128>}, {pipeline_mode = #tpu.pipeline_mode<synchronous>, transform_indices = @transform_2, window_bounds = array<i64: 128, 256>}, {pipeline_mode = #tpu.pipeline_mode<synchronous>, transform_indices = @transform_3, window_bounds = array<i64: 1, 256>}, {pipeline_mode = #tpu.pipeline_mode<synchronous>, transform_indices = @transform_4, window_bounds = array<i64: 4, 256>}, {pipeline_mode = #tpu.pipeline_mode<synchronous>, transform_indices = @transform_5, window_bounds = array<i64: 256, 128>}, {pipeline_mode = #tpu.pipeline_mode<synchronous>, transform_indices = @transform_6, window_bounds = array<i64: 1, 128>}, {pipeline_mode = #tpu.pipeline_mode<synchronous>, transform_indices = @transform_7, window_bounds = array<i64: 4, 128>}, {transform_indices = @transform_8, window_bounds = array<i64: 128, 128>}]} {
    %c0 = arith.constant 0 : index
    %c0_0 = arith.constant 0 : index
    %0 = vector.load %arg2[%c0, %c0_0] : memref<128x128xbf16, #tpu.memory_space<vmem>>, vector<128x128xbf16>
    %c0_1 = arith.constant 0 : index
    %c0_2 = arith.constant 0 : index
    %1 = vector.load %arg3[%c0_1, %c0_2] : memref<128x256xbf16, #tpu.memory_space<vmem>>, vector<128x256xbf16>
    %cst = arith.constant dense<0.000000e+00> : vector<128x256xf32>
    %2 = tpu.matmul %0, %1, %cst {dimension_numbers = #tpu.dot_dimension_numbers<[1], [0], [0], [1], [0, 0, 1, 1], [], []>} : vector<128x128xbf16>, vector<128x256xbf16>, vector<128x256xf32> -> vector<128x256xf32>
    %c0_3 = arith.constant 0 : index
    %c0_4 = arith.constant 0 : index
    %3 = vector.load %arg4[%c0_3, %c0_4] : memref<1x256xf32, #tpu.memory_space<vmem>>, vector<1x256xf32>
    %4 = vector.broadcast %3 : vector<1x256xf32> to vector<128x256xf32>
    %5 = arith.addf %2, %4 : vector<128x256xf32>
    %c0_5 = arith.constant 0 : index
    %6 = memref.load %arg1[%c0_5] : memref<12xf32, #tpu.memory_space<smem>>
    %c1 = arith.constant 1 : index
    %7 = memref.load %arg1[%c1] : memref<12xf32, #tpu.memory_space<smem>>
    %c2 = arith.constant 2 : index
    %8 = memref.load %arg1[%c2] : memref<12xf32, #tpu.memory_space<smem>>
    %c3 = arith.constant 3 : index
    %9 = memref.load %arg1[%c3] : memref<12xf32, #tpu.memory_space<smem>>
    %c4 = arith.constant 4 : index
    %10 = memref.load %arg1[%c4] : memref<12xf32, #tpu.memory_space<smem>>
    %c5 = arith.constant 5 : index
    %11 = memref.load %arg1[%c5] : memref<12xf32, #tpu.memory_space<smem>>
    %c0_6 = arith.constant 0 : index
    %c0_7 = arith.constant 0 : index
    %12 = vector.load %arg5[%c0_6, %c0_7] : memref<4x256xf32, #tpu.memory_space<vmem>>, vector<1x256xf32>
    %c1_8 = arith.constant 1 : index
    %c0_9 = arith.constant 0 : index
    %13 = vector.load %arg5[%c1_8, %c0_9] : memref<4x256xf32, #tpu.memory_space<vmem>>, vector<1x256xf32>
    %c2_10 = arith.constant 2 : index
    %c0_11 = arith.constant 0 : index
    %14 = vector.load %arg5[%c2_10, %c0_11] : memref<4x256xf32, #tpu.memory_space<vmem>>, vector<1x256xf32>
    %c3_12 = arith.constant 3 : index
    %c0_13 = arith.constant 0 : index
    %15 = vector.load %arg5[%c3_12, %c0_13] : memref<4x256xf32, #tpu.memory_space<vmem>>, vector<1x256xf32>
    %16 = vector.broadcast %11 : f32 to vector<128x256xf32>
    %17 = arith.mulf %16, %5 : vector<128x256xf32>
    %18 = vector.broadcast %10 : f32 to vector<128x256xf32>
    %19 = arith.addf %17, %18 : vector<128x256xf32>
    %20 = arith.mulf %19, %5 : vector<128x256xf32>
    %21 = vector.broadcast %9 : f32 to vector<128x256xf32>
    %22 = arith.addf %20, %21 : vector<128x256xf32>
    %23 = arith.mulf %22, %5 : vector<128x256xf32>
    %24 = vector.broadcast %8 : f32 to vector<128x256xf32>
    %25 = arith.addf %23, %24 : vector<128x256xf32>
    %26 = arith.mulf %25, %5 : vector<128x256xf32>
    %27 = vector.broadcast %7 : f32 to vector<128x256xf32>
    %28 = arith.addf %26, %27 : vector<128x256xf32>
    %29 = arith.mulf %28, %5 : vector<128x256xf32>
    %30 = vector.broadcast %6 : f32 to vector<128x256xf32>
    %31 = arith.addf %29, %30 : vector<128x256xf32>
    %32 = vector.broadcast %15 : vector<1x256xf32> to vector<128x256xf32>
    %33 = arith.mulf %32, %5 : vector<128x256xf32>
    %34 = vector.broadcast %14 : vector<1x256xf32> to vector<128x256xf32>
    %35 = arith.addf %33, %34 : vector<128x256xf32>
    %36 = arith.mulf %35, %5 : vector<128x256xf32>
    %37 = vector.broadcast %13 : vector<1x256xf32> to vector<128x256xf32>
    %38 = arith.addf %36, %37 : vector<128x256xf32>
    %39 = arith.mulf %38, %5 : vector<128x256xf32>
    %40 = vector.broadcast %12 : vector<1x256xf32> to vector<128x256xf32>
    %41 = arith.addf %39, %40 : vector<128x256xf32>
    %42 = arith.mulf %41, %5 : vector<128x256xf32>
    %43 = math.absf %42 : vector<128x256xf32>
    %cst_14 = arith.constant 1.000000e+00 : f32
    %44 = vector.broadcast %cst_14 : f32 to vector<128x256xf32>
    %45 = arith.addf %44, %43 : vector<128x256xf32>
    %46 = tpu.reciprocal %45 {approx = true} : vector<128x256xf32> -> vector<128x256xf32>
    %47 = arith.mulf %31, %46 : vector<128x256xf32>
    %48 = arith.truncf %47 : vector<128x256xf32> to vector<128x256xbf16>
    %c0_15 = arith.constant 0 : index
    %c0_16 = arith.constant 0 : index
    %49 = vector.load %arg6[%c0_15, %c0_16] : memref<256x128xbf16, #tpu.memory_space<vmem>>, vector<256x128xbf16>
    %cst_17 = arith.constant dense<0.000000e+00> : vector<128x128xf32>
    %50 = tpu.matmul %48, %49, %cst_17 {dimension_numbers = #tpu.dot_dimension_numbers<[1], [0], [0], [1], [0, 0, 1, 1], [], []>} : vector<128x256xbf16>, vector<256x128xbf16>, vector<128x128xf32> -> vector<128x128xf32>
    %c0_18 = arith.constant 0 : index
    %c0_19 = arith.constant 0 : index
    %51 = vector.load %arg7[%c0_18, %c0_19] : memref<1x128xf32, #tpu.memory_space<vmem>>, vector<1x128xf32>
    %52 = vector.broadcast %51 : vector<1x128xf32> to vector<128x128xf32>
    %53 = arith.addf %50, %52 : vector<128x128xf32>
    %c6 = arith.constant 6 : index
    %54 = memref.load %arg1[%c6] : memref<12xf32, #tpu.memory_space<smem>>
    %c7 = arith.constant 7 : index
    %55 = memref.load %arg1[%c7] : memref<12xf32, #tpu.memory_space<smem>>
    %c8 = arith.constant 8 : index
    %56 = memref.load %arg1[%c8] : memref<12xf32, #tpu.memory_space<smem>>
    %c9 = arith.constant 9 : index
    %57 = memref.load %arg1[%c9] : memref<12xf32, #tpu.memory_space<smem>>
    %c10 = arith.constant 10 : index
    %58 = memref.load %arg1[%c10] : memref<12xf32, #tpu.memory_space<smem>>
    %c11 = arith.constant 11 : index
    %59 = memref.load %arg1[%c11] : memref<12xf32, #tpu.memory_space<smem>>
    %c0_20 = arith.constant 0 : index
    %c0_21 = arith.constant 0 : index
    %60 = vector.load %arg8[%c0_20, %c0_21] : memref<4x128xf32, #tpu.memory_space<vmem>>, vector<1x128xf32>
    %c1_22 = arith.constant 1 : index
    %c0_23 = arith.constant 0 : index
    %61 = vector.load %arg8[%c1_22, %c0_23] : memref<4x128xf32, #tpu.memory_space<vmem>>, vector<1x128xf32>
    %c2_24 = arith.constant 2 : index
    %c0_25 = arith.constant 0 : index
    %62 = vector.load %arg8[%c2_24, %c0_25] : memref<4x128xf32, #tpu.memory_space<vmem>>, vector<1x128xf32>
    %c3_26 = arith.constant 3 : index
    %c0_27 = arith.constant 0 : index
    %63 = vector.load %arg8[%c3_26, %c0_27] : memref<4x128xf32, #tpu.memory_space<vmem>>, vector<1x128xf32>
    %64 = vector.broadcast %59 : f32 to vector<128x128xf32>
    %65 = arith.mulf %64, %53 : vector<128x128xf32>
    %66 = vector.broadcast %58 : f32 to vector<128x128xf32>
    %67 = arith.addf %65, %66 : vector<128x128xf32>
    %68 = arith.mulf %67, %53 : vector<128x128xf32>
    %69 = vector.broadcast %57 : f32 to vector<128x128xf32>
    %70 = arith.addf %68, %69 : vector<128x128xf32>
    %71 = arith.mulf %70, %53 : vector<128x128xf32>
    %72 = vector.broadcast %56 : f32 to vector<128x128xf32>
    %73 = arith.addf %71, %72 : vector<128x128xf32>
    %74 = arith.mulf %73, %53 : vector<128x128xf32>
    %75 = vector.broadcast %55 : f32 to vector<128x128xf32>
    %76 = arith.addf %74, %75 : vector<128x128xf32>
    %77 = arith.mulf %76, %53 : vector<128x128xf32>
    %78 = vector.broadcast %54 : f32 to vector<128x128xf32>
    %79 = arith.addf %77, %78 : vector<128x128xf32>
    %80 = vector.broadcast %63 : vector<1x128xf32> to vector<128x128xf32>
    %81 = arith.mulf %80, %53 : vector<128x128xf32>
    %82 = vector.broadcast %62 : vector<1x128xf32> to vector<128x128xf32>
    %83 = arith.addf %81, %82 : vector<128x128xf32>
    %84 = arith.mulf %83, %53 : vector<128x128xf32>
    %85 = vector.broadcast %61 : vector<1x128xf32> to vector<128x128xf32>
    %86 = arith.addf %84, %85 : vector<128x128xf32>
    %87 = arith.mulf %86, %53 : vector<128x128xf32>
    %88 = vector.broadcast %60 : vector<1x128xf32> to vector<128x128xf32>
    %89 = arith.addf %87, %88 : vector<128x128xf32>
    %90 = arith.mulf %89, %53 : vector<128x128xf32>
    %91 = math.absf %90 : vector<128x128xf32>
    %cst_28 = arith.constant 1.000000e+00 : f32
    %92 = vector.broadcast %cst_28 : f32 to vector<128x128xf32>
    %93 = arith.addf %92, %91 : vector<128x128xf32>
    %94 = tpu.reciprocal %93 {approx = true} : vector<128x128xf32> -> vector<128x128xf32>
    %95 = arith.mulf %79, %94 : vector<128x128xf32>
    %96 = arith.truncf %95 : vector<128x128xf32> to vector<128x128xbf16>
    %c0_29 = arith.constant 0 : index
    %c0_30 = arith.constant 0 : index
    %97 = vector.load %arg9[%c0_29, %c0_30] : memref<128x128xbf16, #tpu.memory_space<vmem>>, vector<128x128xbf16>
    tpu.vector_store %arg9[%c0_29, %c0_30], %96 {strides = array<i32>} : memref<128x128xbf16, #tpu.memory_space<vmem>>, vector<128x128xbf16>,
    return
  }
  func.func @transform_0(%arg0: i32) -> i32 {
    %c0_i32 = arith.constant 0 : i32
    %c0_i32_0 = arith.constant 0 : i32
    return %c0_i32 : i32
  }
  func.func @transform_1(%arg0: i32) -> (i32, i32) {
    %c0_i32 = arith.constant 0 : i32
    %c0_i32_0 = arith.constant 0 : i32
    return %arg0, %c0_i32 : i32, i32
  }
  func.func @transform_2(%arg0: i32) -> (i32, i32) {
    %c0_i32 = arith.constant 0 : i32
    %c0_i32_0 = arith.constant 0 : i32
    %c0_i32_1 = arith.constant 0 : i32
    return %c0_i32, %c0_i32_0 : i32, i32
  }
  func.func @transform_3(%arg0: i32) -> (i32, i32) {
    %c0_i32 = arith.constant 0 : i32
    %c0_i32_0 = arith.constant 0 : i32
    %c0_i32_1 = arith.constant 0 : i32
    return %c0_i32, %c0_i32_0 : i32, i32
  }
  func.func @transform_4(%arg0: i32) -> (i32, i32) {
    %c0_i32 = arith.constant 0 : i32
    %c0_i32_0 = arith.constant 0 : i32
    %c0_i32_1 = arith.constant 0 : i32
    return %c0_i32, %c0_i32_0 : i32, i32
  }
  func.func @transform_5(%arg0: i32) -> (i32, i32) {
    %c0_i32 = arith.constant 0 : i32
    %c0_i32_0 = arith.constant 0 : i32
    %c0_i32_1 = arith.constant 0 : i32
    return %c0_i32, %c0_i32_0 : i32, i32
  }
  func.func @transform_6(%arg0: i32) -> (i32, i32) {
    %c0_i32 = arith.constant 0 : i32
    %c0_i32_0 = arith.constant 0 : i32
    %c0_i32_1 = arith.constant 0 : i32
    return %c0_i32, %c0_i32_0 : i32, i32
  }
  func.func @transform_7(%arg0: i32) -> (i32, i32) {
    %c0_i32 = arith.constant 0 : i32
    %c0_i32_0 = arith.constant 0 : i32
    %c0_i32_1 = arith.constant 0 : i32
    return %c0_i32, %c0_i32_0 : i32, i32
  }
  func.func @transform_8(%arg0: i32) -> (i32, i32) {
    %c0_i32 = arith.constant 0 : i32
    %c0_i32_0 = arith.constant 0 : i32
    return %arg0, %c0_i32 : i32, i32
  }
}

</mosaic_0001>

<bundles_post_ra>
// kernel: tpu_custom_call.1
= control target key start
LH: loop header
LB: loop body
LE: loop exit
PB: predicated region body
PF: predicated region fallthrough
CT: control target
= control target key end

     0   :  { %13 = vsyncpa [#allocation5], 0  ;;  %s4246_s0 = inlined_call_operand.hbm [shape: f32[12], index: 0, kind: input, shape index: {}]   ;;  %s4247_s1 = inlined_call_operand.hbm [shape: bf16[512,128], index: 1, kind: input, shape index: {}]   ;;  %s4248_s2 = inlined_call_operand.hbm [shape: bf16[128,256], index: 2, kind: input, shape index: {}]   ;;  %s4249_s3 = inlined_call_operand.vmem [shape: f32[1,256], index: 3, kind: input, shape index: {}]   ;;  %s4250_s4 = inlined_call_operand.vmem [shape: f32[4,256], index: 4, kind: input, shape index: {}]   ;;  %s4251_s5 = inlined_call_operand.hbm [shape: bf16[256,128], index: 5, kind: input, shape index: {}]   ;;  %s4252_s6 = inlined_call_operand.vmem [shape: f32[1,128], index: 6, kind: input, shape index: {}]   ;;  %s4253_s7 = inlined_call_operand.vmem [shape: f32[4,128], index: 7, kind: input, shape index: {}]   ;;  %s4254_s8 = inlined_call_operand.hbm [shape: bf16[512,128], index: 8, kind: output, shape index: {}]  }
   0x1   :  { %14 = vsyncpa [#allocation3], 0 }
   0x2   :  { %16 = vsyncpa [#allocation3 + $0x1], 0 }
   0x3   :  { %17 = vsyncpa [#allocation8], 0 }
   0x4   :  { %18 = vsyncpa [#allocation4], 0 }
   0x5   :  { %20 = vsyncpa [#allocation4 + $0x1], 0  ;;  %s2886_s27 = smov 0   ;;  %s2888_s28 = smov 0  }
   0x6   :  { %s2890_s29 = smov 0   ;;  %s2892_s30 = smov 0  }
   0x7 LB: > { %4260 = sst [smem:[#allocation15_spill]] %s2815_s27  ;;  %s2907_s9 = sadd.s32 4294967295, %s2827_s30   ;;  %s2827_s30 = sphi %s2892_s30, %s4282_s30   ;;  %s2823_s29 = sphi %s2890_s29, %s4281_s29   ;;  %s2819_s28 = sphi %s2888_s28, %s4280_s28   ;;  %s2815_s27 = sphi %s2886_s27, %s4279_s27  }
   0x8   : > { %s2202_s10 = sadd.s32 4294967294, %s2827_s30   ;;  %p67_p0 = scmp.ne.s32.totalorder %s2819_s28, %s2815_s27 }
   0x9   : > { %p4255_p1 = scmp.eq.s32.totalorder %s2907_s9, 0  ;;  %p223_p3 = scmp.eq.s32.totalorder %s2202_s10, 3 }
   0xa   : > { %p2203_p5 = scmp.ge.s32.totalorder %s2827_s30, 1  ;;  %p230_p7 = scmp.lt.s32.totalorder %s2827_s30, 5 }
   0xb   : > { %p2916_p4 = por %p4255_p1, %p67_p0  ;;  %p2921_p6 = por %p223_p3, %p67_p0 }
   0xc   : > { %p2926_p8 = pnand %p2203_p5, %p230_p7  ;;  %s2829_s14 = smov [#allocation7]  }
   0xd   : > { %s4261_s11 = scalar_select %p2916_p4, 1, 0 }
   0xe   : > { %s4262_s12 = scalar_select %p2921_p6, 1, 0 }
   0xf   : > { %s4264_s13 = scalar_select %p2926_p8, 1, 0 }
  0x10   : > { %4263 = sst [smem:[#allocation16_spill]] %s4262_s12  ;;  %s251_s15 = sshll.u32 %s2829_s14, 4  ;;  %s252_s15 = int_to_ptr.vmem [resolvable:$true] %s251_s15 }
  0x11   : > { %p2442_p9 = pneg %p2926_p8  ;;  %s2830_s17 = smov [#allocation9]  }
  0x12   : > { %s270_s18 = sshll.u32 %s2830_s17, 4  ;;  %s2654_s21 = scalar_lea.hbm %s4248_s2, 2048  ;;  %s2938_s18 = int_to_ptr.vmem [resolvable:$true] %s270_s18 }
  0x13   : > { %p2934_p10 = pnand %p2442_p9, %p4255_p1  ;;  %p2655_p11 = scmp.ne.s32.totalorder %s4248_s2, %s2654_s21 }
  0x14   : > { %p2661_p3 = scmp.lt.u32.totalorder %s2654_s21, %s4248_s2 }
  0x15   : > { %p2948_p12 = pneg %p2934_p10 }
  0x17   : > { %p2657_p13 = pnand %p2948_p12, %p2655_p11 }
  0x19   : > { %p2658_p0 = pneg %p2657_p13 }
  0x1b   : > { %p2663_p5 = pnand %p2661_p3, %p2658_p0 }
  0x1d   : > { %2666 = shalt.err (!%p2663_p5)
}
  0x1e   : > { %s2667_s10 = scalar_lea.vmem %s252_s15, 2048  ;;  %p2675_p2 = scmp.lt.s32.totalorder %s252_s15, %s252_s15 }
  0x1f   : > { %p2668_p7 = scmp.ne.s32.totalorder %s252_s15, %s2667_s10  ;;  %p2676_p6 = scmp.lt.s32.totalorder %s2667_s10, %s2667_s10 }
  0x21   : > { %p2670_p9 = pnand %p2668_p7, %p2948_p12  ;;  %p2677_p4 = por %p2676_p6, %p2675_p2 }
  0x23   : > { %p2671_p1 = pneg %p2670_p9 }
  0x25   : > { %p2678_p8 = pnand %p2677_p4, %p2671_p1 }
  0x27   : > { %2681 = shalt.err (!%p2678_p8)
}
  0x28   : > { %s2831_s14 = smov 128   ;;  %s2832_s17 = smov 8  }
  0x29   : > { %2448 = dma.hbm_to_vmem [thread:$0]  (!%p2934_p10), %s4248_s2, 2048, %s252_s15, [#allocation8], %s2831_s14, %s2831_s14, %s2832_s17  }
  0x2a   : > { %s2682_s23 = scalar_lea.hbm %s4246_s0, 16 }
  0x2b   : > { %p2683_p11 = scmp.ne.s32.totalorder %s4246_s0, %s2682_s23  ;;  %p2689_p4 = scmp.lt.u32.totalorder %s2682_s23, %s4246_s0 }
  0x2d   : > { %p2685_p1 = pnand %p2683_p11, %p2948_p12 }
  0x2f   : > { %p2686_p2 = pneg %p2685_p1 }
  0x31   : > { %p2691_p6 = pnand %p2689_p4, %p2686_p2 }
  0x33   : > { %2694 = shalt.err (!%p2691_p6)
}
  0x34   : > { %s2833_s27 = smov [#allocation2]   ;;  %s2695_s20 = scalar_lea.hbm %s4251_s5, 2048 }
  0x35   : > { %2445 = dma.hbm_to_smem (!%p2934_p10), %s4246_s0, 16, %s2833_s27, [#allocation5]  }
  0x36   : > { %p2696_p8 = scmp.ne.s32.totalorder %s4251_s5, %s2695_s20  ;;  %p2702_p3 = scmp.lt.u32.totalorder %s2695_s20, %s4251_s5 }
  0x38   : > { %p2698_p13 = pnand %p2696_p8, %p2948_p12 }
  0x3a   : > { %p2699_p0 = pneg %p2698_p13 }
  0x3c   : > { %p2704_p5 = pnand %p2702_p3, %p2699_p0 }
  0x3e   : > { %2707 = shalt.err (!%p2704_p5)
}
  0x3f   : > { %s2708_s27 = scalar_lea.vmem %s2938_s18, 2048  ;;  %p2716_p1 = scmp.lt.s32.totalorder %s2938_s18, %s2938_s18 }
  0x40   : > { %p2709_p7 = scmp.ne.s32.totalorder %s2938_s18, %s2708_s27  ;;  %p2717_p2 = scmp.lt.s32.totalorder %s2708_s27, %s2708_s27 }
  0x42   : > { %p2711_p9 = pnand %p2709_p7, %p2948_p12  ;;  %p2718_p4 = por %p2717_p2, %p2716_p1 }
  0x44   : > { %p2712_p11 = pneg %p2711_p9 }
  0x46   : > { %p2719_p6 = pnand %p2718_p4, %p2712_p11 }
  0x48   : > { %2722 = shalt.err (!%p2719_p6)
}
  0x49   : > { %s2834_s25 = smov 64   ;;  %s2835_s24 = smov 4  }
  0x4a   : > { %2451 = dma.hbm_to_vmem [thread:$0]  (!%p2934_p10), %s4251_s5, 2048, %s2938_s18, [#allocation8], %s2834_s25, %s2834_s25, %s2835_s24  }
  0x4b   : > { %s3007_s15 = sadd.s32 1, %s2827_s30   ;;  %s54_s17 = sadd.s32 1, %s2823_s29 }
  0x4c   : > { %s51_s14 = ssub.s32 %s2827_s30, %s3007_s15  ;;  %p61_p8 = scmp.ne.s32.totalorder %s2823_s29, %s2819_s28 }
  0x4d   : > { %p52_p12 = scmp.eq.s32.totalorder %s51_s14, 0  ;;  %p62_p13 = scmp.eq.s32.totalorder %s2827_s30, 0 }
  0x4e   : > { %p2463_p0 = scmp.lt.s32.totalorder %s2827_s30, 4  ;;  %p4267_p5 = scmp.eq.s32.totalorder %s2907_s9, 3 }
  0x4f   : > { %s3017_s19 = scalar_select %p52_p12, %s2823_s29, %s54_s17  }
  0x50   : > { %p63_p3 = por %p62_p13, %p61_p8  ;;  %p3021_p7 = por %p4267_p5, %p61_p8 }
  0x51   : > { %s290_s20 = sand.u32 1, %s2823_s29   ;;  %s2297_s21 = sshll.u32 %s2827_s30, 10 }
  0x52   : > { %s2208_s18 = sshll.u32 %s290_s20, 6  ;;  %s3030_s23 = scalar_lea.hbm %s4247_s1, %s2297_s21 }
  0x53   : > { %s294_s27 = scalar_lea.vmem [#allocation6], %s2208_s18  ;;  %p3032_p10 = pnand %p2463_p0, %p63_p3 }
  0x54   : > { %s301_s26 = sshll.u32 %s294_s27, 4  ;;  %s3038_s14 = scalar_lea.sflag [#allocation3], %s290_s20  ;;  %s3036_s26 = int_to_ptr.vmem [resolvable:$true] %s301_s26 }
  0x55   : > { %s2723_s17 = scalar_lea.hbm %s3030_s23, 1024  ;;  %p2725_p11 = pneg %p3032_p10 }
  0x56   : > { %p2724_p9 = scmp.ne.s32.totalorder %s3030_s23, %s2723_s17  ;;  %s2728_s22 = scalar_lea.hbm %s4247_s1, 4096 }
  0x57   : > { %p2729_p4 = scmp.lt.u32.totalorder %s3030_s23, %s4247_s1  ;;  %p2730_p6 = scmp.lt.u32.totalorder %s2728_s22, %s2723_s17 }
  0x58   : > { %p2726_p1 = pnand %p2725_p11, %p2724_p9  ;;  %p2732_p8 = scmp.lt.u32.totalorder %s2723_s17, %s3030_s23 }
  0x59   : > { %p2731_p12 = por %p2730_p6, %p2729_p4 }
  0x5a   : > { %p2727_p2 = pneg %p2726_p1 }
  0x5b   : > { %p2733_p13 = por %p2732_p8, %p2731_p12 }
  0x5d   : > { %p2734_p0 = pnand %p2733_p13, %p2727_p2 }
  0x5f   : > { %2737 = shalt.err (!%p2734_p0)
}
  0x60   : > { %s2738_s20 = scalar_lea.vmem %s3036_s26, 1024  ;;  %s2836_s21 = smov [#allocation6]  }
  0x61   : > { %p2739_p3 = scmp.ne.s32.totalorder %s3036_s26, %s2738_s20  ;;  %s2743_s18 = sshll.u32 %s2836_s21, 4  ;;  %s2744_s18 = int_to_ptr.vmem [resolvable:$false] %s2743_s18 }
  0x62   : > { %s2745_s12 = scalar_lea.vmem %s2744_s18, 2048  ;;  %p2746_p1 = scmp.lt.s32.totalorder %s3036_s26, %s2744_s18 }
  0x63   : > { %p2741_p5 = pnand %p2739_p3, %p2725_p11  ;;  %p2747_p4 = scmp.lt.s32.totalorder %s2745_s12, %s2738_s20 }
  0x65   : > { %p2742_p9 = pneg %p2741_p5  ;;  %p2748_p6 = por %p2747_p4, %p2746_p1 }
  0x67   : > { %p2749_p12 = pnand %p2748_p6, %p2742_p9 }
  0x69   : > { %2752 = shalt.err (!%p2749_p12)
}
  0x6a   : > { %2455 = dma.hbm_to_vmem [thread:$0]  (!%p3032_p10), %s3030_s23, 1024, %s3036_s26, %s3038_s14, %s2834_s25, %s2834_s25, %s2835_s24  }
  0x6b   : > { %p4270_p11 = scmp.ne.s32.totalorder %s4264_s13, 0 }
  0x6c   : > { %p4271_p2 = scmp.eq.s32.totalorder (!%p4270_p11), %s2907_s9, 0 }
  0x6d   : > { %313 = sbr.rel (%p4270_p11) target bundleno = 838 (0x346), region = 52 }
  0x74   : > { %2798 = dma.done.wait (%p4271_p2), [#allocation5], 16   ;;  %p4272_p8 = pmov %p4271_p2 }
  0x75   : > { %s3076_s17 = sand.u32 1, %s2819_s28   ;;  %p4273_p10 = scmp.ne.s32.totalorder %s4261_s11, 0 }
  0x76   : > { %2800 = vsyncadd (%p4272_p8), [#allocation5], 4294967280  ;;  %s2213_s10 = sshll.u32 %s3076_s17, 6  ;;  %s320_s22 = scalar_lea.sflag [#allocation3], %s3076_s17 }
  0x77   : > { %s3082_s25 = scalar_lea.vmem [#allocation6], %s2213_s10 }
  0x78   : > { %2802 = dma.done.wait (%p4273_p10), %s320_s22, 1024  }
  0x79   : > { %2804 = vsyncadd (%p4273_p10), %s320_s22, 4294966272  ;;  %p4274_p13 = pmov %p4271_p2 }
  0x7a   : > { %p4275_p0 = pmov %p4271_p2 }
  0x7b   : > { %2806 = dma.done.wait (%p4274_p13), [#allocation8], 4096  }
  0x7c   : > { %2808 = vsyncadd (%p4275_p0), [#allocation8], 4294963200 }
  0x7d   : > { %336 = sfence }
  0x7e   : > { %v2510_v0 = vld [vmem:[#allocation7 + $0x4] ss:$8 sps:$4 sm:$0xff]   ;;  %v2512_v1 = vld [vmem:[#allocation7] ss:$8 sps:$4 sm:$0xff]   ;;  %v2837_v2 = vmov 0   ;;  %v2536_v19 = vld [vmem:[%s3082_s25 + $0x10] sm:$0xff]   ;;  %v402_v41 = vlaneseq }
  0x7f   : > { %572 = vmatprep.mubr.bf16.mxu0 %v2837_v2  ;;  %540 = vmatprep.subr.bf16.mxu0 %v2510_v0  ;;  %v2513_v3 = vld [vmem:[#allocation7 + $0x14] ss:$8 sps:$4 sm:$0xff]   ;;  %v2515_v4 = vld [vmem:[#allocation7 + $0x10] ss:$8 sps:$4 sm:$0xff]   ;;  %v2516_v5 = vld [vmem:[#allocation7 + $0x24] ss:$8 sps:$4 sm:$0xff]  }
  0x80   : > { %541 = vmatpush1.bf16.msra.mxu0 %v2512_v1  ;;  %v2518_v6 = vld [vmem:[#allocation7 + $0x20] ss:$8 sps:$4 sm:$0xff]   ;;  %v2519_v7 = vld [vmem:[#allocation7 + $0x34] ss:$8 sps:$4 sm:$0xff]   ;;  %v2521_v8 = vld [vmem:[#allocation7 + $0x30] ss:$8 sps:$4 sm:$0xff]  }
  0x81   : > { %542 = vmatprep.subr.bf16.mxu0 %v2513_v3  ;;  %v2522_v9 = vld [vmem:[#allocation7 + $0x44] ss:$8 sps:$4 sm:$0xff]   ;;  %v2524_v10 = vld [vmem:[#allocation7 + $0x40] ss:$8 sps:$4 sm:$0xff]   ;;  %v2525_v11 = vld [vmem:[#allocation7 + $0x54] ss:$8 sps:$4 sm:$0xff]  }
  0x82   : > { %v2527_v12 = vld [vmem:[#allocation7 + $0x50] ss:$8 sps:$4 sm:$0xff]   ;;  %v2528_v13 = vld [vmem:[#allocation7 + $0x64] ss:$8 sps:$4 sm:$0xff]   ;;  %v2530_v14 = vld [vmem:[#allocation7 + $0x60] ss:$8 sps:$4 sm:$0xff]  }
  0x83   : > { %v2531_v15 = vld [vmem:[#allocation7 + $0x74] ss:$8 sps:$4 sm:$0xff]   ;;  %v2533_v16 = vld [vmem:[#allocation7 + $0x70] ss:$8 sps:$4 sm:$0xff]   ;;  %v2534_v17 = vld [vmem:[%s3082_s25] sm:$0xff]   ;;  %v403_v42 = vshrl.u32 %v402_v41, 7 }
  0x84   : > { %543 = vmatpush1.bf16.msra.mxu0 %v2515_v4  ;;  %v2535_v18 = vld [vmem:[%s3082_s25 + $0x8] sm:$0xff]   ;;  %v2537_v20 = vld [vmem:[%s3082_s25 + $0x18] sm:$0xff]   ;;  %v2538_v21 = vld [vmem:[%s3082_s25 + $0x20] sm:$0xff]   ;;  %s2245_s11 = sld [smem:[#allocation2 + $0x5]]  ;;  %s2244_s23 = sld [smem:[#allocation2 + $0x4]] }
  0x85   : > { %544 = vmatprep.subr.bf16.mxu0 %v2516_v5  ;;  %v2539_v22 = vld [vmem:[%s3082_s25 + $0x28] sm:$0xff]   ;;  %v2540_v23 = vld [vmem:[%s3082_s25 + $0x30] sm:$0xff]   ;;  %v2541_v24 = vld [vmem:[%s3082_s25 + $0x38] sm:$0xff]   ;;  %v3100_v43 = vsub.s32 0, %v403_v42  ;;  %v408_v45 = vsub.s32 1, %v403_v42  ;;  %s2243_s27 = sld [smem:[#allocation2 + $0x3]] }
  0x86   : > { %v2542_v25 = vld [vmem:[#allocation9 + $0x40] sm:$0xff]   ;;  %v2544_v27 = vld [vmem:[#allocation9 + $0x48] sm:$0xff]   ;;  %v2546_v29 = vld [vmem:[#allocation9 + $0x50] sm:$0xff]   ;;  %s3132_s22 = sld [smem:[#allocation2 + $0x2]]  ;;  %s3177_s25 = sld [smem:[#allocation2 + $0x1]] }
  0x87   : > { %v2543_v26 = vld [vmem:[#allocation9] sm:$0xff]   ;;  %2362 = vmatprep.subr.bf16.mxu1 %v2542_v25  ;;  %v2545_v28 = vld [vmem:[#allocation9 + $0x8] sm:$0xff]   ;;  %v2547_v30 = vld [vmem:[#allocation9 + $0x10] sm:$0xff]   ;;  %s3192_s24 = sld [smem:[#allocation2]]  ;;  %s2270_s26 = sld [smem:[#allocation2 + $0xa]] }
  0x88   : > { %545 = vmatpush1.bf16.msra.mxu0 %v2518_v6  ;;  %2363 = vmatpush3.bf16.msra.mxu1 %v2543_v26  ;;  %v2548_v31 = vld [vmem:[#allocation9 + $0x58] sm:$0xff]   ;;  %v2550_v33 = vld [vmem:[#allocation9 + $0x60] sm:$0xff]   ;;  %v2552_v35 = vld [vmem:[#allocation9 + $0x68] sm:$0xff]   ;;  %s2269_s20 = sld [smem:[#allocation2 + $0x9]]  ;;  %s2266_s14 = sld [smem:[#allocation2 + $0x6]] }
  0x89   : > { %546 = vmatprep.subr.bf16.mxu0 %v2519_v7  ;;  %2364 = vmatprep.subr.bf16.mxu1 %v2544_v27  ;;  %v2549_v32 = vld [vmem:[#allocation9 + $0x18] sm:$0xff]   ;;  %v2551_v34 = vld [vmem:[#allocation9 + $0x20] sm:$0xff]   ;;  %v2553_v36 = vld [vmem:[#allocation9 + $0x28] sm:$0xff]  }
  0x8a   : > { %v2554_v37 = vld [vmem:[#allocation9 + $0x70] sm:$0xff]   ;;  %v2556_v39 = vld [vmem:[#allocation9 + $0x78] sm:$0xff]   ;;  %v400_v44 = vld [vmem:[%s4249_s3] sm:$0x3]  ;;  %v3124_v54 = vstv %s2245_s11  ;;  %v3137_v60 = vstv %s2244_s23  ;;  %s2271_s23 = sld [smem:[#allocation2 + $0xb]] }
  0x8b   : > { %v2555_v38 = vld [vmem:[#allocation9 + $0x30] sm:$0xff]   ;;  %v2557_v40 = vld [vmem:[#allocation9 + $0x38] sm:$0xff]   ;;  %v2248_v46 = vld [vmem:[%s4250_s4 + $0x3] ss:$4 sm:$0x3]  ;;  %v3109_v47 = vrot.slane %v400_v44, %v3100_v43  ;;  %v3114_v49 = vrot.slane %v400_v44, %v408_v45  ;;  %v3156_v5 = vstv %s2243_s27  ;;  %s3973_s27 = scalar_lea.vmem [#allocation10], %s2213_s10 }
  0x8c   : > { %547 = vmatpush1.bf16.msra.mxu0 %v2521_v8  ;;  %2365 = vmatpush3.bf16.msra.mxu1 %v2545_v28  ;;  %v2247_v48 = vld [vmem:[%s4250_s4 + $0x2] ss:$4 sm:$0x3]  ;;  %v3117_v50 = vrot.slane %v2248_v46, %v3100_v43  ;;  %v3119_v52 = vrot.slane %v2248_v46, %v408_v45  ;;  %v2246_v53 = vld [vmem:[%s4250_s4 + $0x1] ss:$4 sm:$0x3]  ;;  %v3187_v26 = vstv %s3132_s22 }
  0x8d   : > { %548 = vmatprep.subr.bf16.mxu0 %v2522_v9  ;;  %2366 = vmatprep.subr.bf16.mxu1 %v2546_v29  ;;  %v3130_v56 = vrot.slane %v2247_v48, %v3100_v43  ;;  %v3139_v61 = vrot.slane %v2247_v48, %v408_v45  ;;  %v3145_v0 = vrot.slane %v2246_v53, %v3100_v43  ;;  %s2314_s10 = sshll.u32 %s2907_s9, 10  ;;  %s2085_s22 = scalar_lea.sflag [#allocation4], %s3076_s17 }
  0x8e   : > { %s4200_s12 = scalar_lea.hbm %s4254_s8, %s2314_s10  ;;  %s2838_s9 = smov [#allocation10]  }
  0x8f   : > { %s2757_s11 = sshll.u32 %s2838_s9, 4  ;;  %s2758_s11 = int_to_ptr.vmem [resolvable:$false] %s2757_s11 }
  0x90   : > { %549 = vmatpush1.bf16.msra.mxu0 %v2524_v10  ;;  %2367 = vmatpush3.bf16.msra.mxu1 %v2547_v30  ;;  %s2759_s13 = scalar_lea.vmem %s2758_s11, 2048 }
  0x91   : > { %550 = vmatprep.subr.bf16.mxu0 %v2525_v11  ;;  %2368 = vmatprep.subr.bf16.mxu1 %v2548_v31 }
  0x94   : > { %551 = vmatpush1.bf16.msra.mxu0 %v2527_v12  ;;  %2369 = vmatpush3.bf16.msra.mxu1 %v2549_v32 }
  0x95   : > { %552 = vmatprep.subr.bf16.mxu0 %v2528_v13  ;;  %2370 = vmatprep.subr.bf16.mxu1 %v2550_v33 }
  0x98   : > { %553 = vmatpush1.bf16.msra.mxu0 %v2530_v14  ;;  %2371 = vmatpush3.bf16.msra.mxu1 %v2551_v34 }
  0x99   : > { %554 = vmatprep.subr.bf16.mxu0 %v2531_v15  ;;  %2372 = vmatprep.subr.bf16.mxu1 %v2552_v35  ;;  %v3172_v15 = vrot.slane %v2246_v53, %v408_v45 }
  0x9c   : > { %555 = vmatpush1.bf16.msra.mxu0 %v2533_v16  ;;  %2373 = vmatpush3.bf16.msra.mxu1 %v2553_v36 }
  0x9d   : > { %2374 = vmatprep.subr.bf16.mxu1 %v2554_v37 }
  0x9f   : > { %573 = vmatmul.mubr.bf16.vlgmr.msra.gmra.mrb[0].mxu0 %v2534_v17 }
  0xa0   : > { %582 = vmatprep.mubr.bf16.mxu0 %v2837_v2  ;;  %2375 = vmatpush3.bf16.msra.mxu1 %v2555_v38 }
  0xa1   : > { %2376 = vmatprep.subr.bf16.mxu1 %v2556_v39 }
  0xa4   : > { %2377 = vmatpush3.bf16.msra.mxu1 %v2557_v40 }
  0xa7   : > { %583 = vmatmul.mubr.bf16.gmra.mrb[4].mxu0 %v2535_v18 }
  0xa8   : > { %592 = vmatprep.mubr.bf16.mxu0 %v2837_v2 }
  0xaf   : > { %593 = vmatmul.mubr.bf16.gmra.mrb[8].mxu0 %v2536_v19 }
  0xb0   : > { %602 = vmatprep.mubr.bf16.mxu0 %v2837_v2 }
  0xb7   : > { %603 = vmatmul.mubr.bf16.gmra.mrb[12].mxu0 %v2537_v20  ;;  %v659_v20 = vld [vmem:[%s4250_s4] ss:$4 sm:$0x3] }
  0xb8   : > { %612 = vmatprep.mubr.bf16.mxu0 %v2837_v2  ;;  %v3199_v37 = vrot.slane %v659_v20, %v408_v45 }
  0xbf   : > { %613 = vmatmul.mubr.bf16.gmra.mrb[16].mxu0 %v2538_v21 }
  0xc0   : > { %622 = vmatprep.mubr.bf16.mxu0 %v2837_v2 }
  0xc7   : > { %623 = vmatmul.mubr.bf16.gmra.mrb[20].mxu0 %v2539_v22 }
  0xc8   : > { %632 = vmatprep.mubr.bf16.mxu0 %v2837_v2 }
  0xcf   : > { %633 = vmatmul.mubr.bf16.gmra.mrb[24].mxu0 %v2540_v23 }
  0xd0   : > { %642 = vmatprep.mubr.bf16.mxu0 %v2837_v2 }
  0xd7   : > { %643 = vmatmul.mubr.bf16.gmra.mrb[28].mxu0 %v2541_v24 }
 0x172   : > { %v574_v51 = vpop.f32.mrb[0].mxu0 }
 0x173   : > { %v3127_v55 = vadd.f32 %v574_v51, %v3109_v47  ;;  %v576_v57 = vpop.f32.mrb[1].mxu0 }
 0x174   : > { %v3135_v58 = vadd.f32 %v576_v57, %v3114_v49  ;;  %v578_v59 = vpop.f32.mrb[2].mxu0 }
 0x175   : > { %v3142_v62 = vadd.f32 %v578_v59, %v3109_v47  ;;  %v580_v63 = vpop.f32.mrb[3].mxu0  ;;  %v667_v1 = vmul.f32 %v3124_v54, %v3127_v55  ;;  %v1003_v2 = vmul.f32 %v3117_v50, %v3127_v55 }
 0x176   : > { %v3152_v3 = vadd.f32 %v580_v63, %v3114_v49  ;;  %v668_v4 = vmul.f32 %v3124_v54, %v3135_v58  ;;  %v1004_v6 = vmul.f32 %v3119_v52, %v3135_v58 }
 0x177   : > { %v669_v7 = vmul.f32 %v3124_v54, %v3142_v62  ;;  %v700_v8 = vadd.f32 %v3137_v60, %v667_v1  ;;  %v1005_v9 = vmul.f32 %v3117_v50, %v3142_v62  ;;  %v1046_v10 = vadd.f32 %v3130_v56, %v1003_v2 }
 0x178   : > { %v670_v11 = vmul.f32 %v3124_v54, %v3152_v3  ;;  %v701_v12 = vadd.f32 %v3137_v60, %v668_v4  ;;  %v1006_v13 = vmul.f32 %v3119_v52, %v3152_v3  ;;  %v1047_v14 = vadd.f32 %v3139_v61, %v1004_v6 }
 0x179   : > { %v702_v16 = vadd.f32 %v3137_v60, %v669_v7  ;;  %v732_v17 = vmul.f32 %v700_v8, %v3127_v55  ;;  %v1048_v18 = vadd.f32 %v3130_v56, %v1005_v9  ;;  %v1078_v29 = vmul.f32 %v1046_v10, %v3127_v55 }
 0x17a   : > { %v584_v19 = vpop.f32.mrb[4].mxu0  ;;  %v703_v21 = vadd.f32 %v3137_v60, %v670_v11  ;;  %v733_v22 = vmul.f32 %v701_v12, %v3135_v58  ;;  %v1049_v23 = vadd.f32 %v3139_v61, %v1006_v13  ;;  %v1079_v24 = vmul.f32 %v1047_v14, %v3135_v58 }
 0x17b   : > { %v586_v25 = vpop.f32.mrb[5].mxu0  ;;  %v734_v27 = vmul.f32 %v702_v16, %v3142_v62  ;;  %v765_v28 = vadd.f32 %v3156_v5, %v732_v17  ;;  %v1080_v34 = vmul.f32 %v1048_v18, %v3142_v62  ;;  %v1121_v45 = vadd.f32 %v3145_v0, %v1078_v29 }
 0x17c   : > { %v588_v30 = vpop.f32.mrb[6].mxu0  ;;  %v735_v31 = vmul.f32 %v703_v21, %v3152_v3  ;;  %v766_v32 = vadd.f32 %v3156_v5, %v733_v22  ;;  %v1081_v33 = vmul.f32 %v1049_v23, %v3152_v3  ;;  %v1122_v36 = vadd.f32 %v3172_v15, %v1079_v24 }
 0x17d   : > { %v590_v35 = vpop.f32.mrb[7].mxu0  ;;  %v767_v38 = vadd.f32 %v3156_v5, %v734_v27  ;;  %v797_v39 = vmul.f32 %v765_v28, %v3127_v55  ;;  %v1123_v59 = vadd.f32 %v3145_v0, %v1080_v34  ;;  %v3217_v4 = vstv %s3177_s25  ;;  %s2268_s25 = sld [smem:[#allocation2 + $0x8]] }
 0x17e   : > { %v768_v40 = vadd.f32 %v3156_v5, %v735_v31  ;;  %v798_v41 = vmul.f32 %v766_v32, %v3135_v58  ;;  %v1124_v42 = vadd.f32 %v3172_v15, %v1081_v33  ;;  %v1154_v44 = vmul.f32 %v1122_v36, %v3135_v58 }
 0x17f   : > { %v799_v46 = vmul.f32 %v767_v38, %v3142_v62  ;;  %v830_v48 = vadd.f32 %v3187_v26, %v797_v39  ;;  %v3220_v6 = vrot.slane %v659_v20, %v3100_v43  ;;  %v1153_v12 = vmul.f32 %v1121_v45, %v3127_v55 }
 0x180   : > { %v800_v51 = vmul.f32 %v768_v40, %v3152_v3  ;;  %v831_v53 = vadd.f32 %v3187_v26, %v798_v41  ;;  %v1156_v57 = vmul.f32 %v1124_v42, %v3152_v3  ;;  %v1197_v63 = vadd.f32 %v3199_v37, %v1154_v44 }
 0x181   : > { %v832_v10 = vadd.f32 %v3187_v26, %v799_v46  ;;  %v862_v11 = vmul.f32 %v830_v48, %v3127_v55  ;;  %v3229_v16 = vstv %s3192_s24  ;;  %v1155_v43 = vmul.f32 %v1123_v59, %v3142_v62 }
 0x182   : > { %v594_v1 = vpop.f32.mrb[8].mxu0  ;;  %v833_v2 = vadd.f32 %v3187_v26, %v800_v51  ;;  %v1199_v7 = vadd.f32 %v3199_v37, %v1156_v57  ;;  %v1229_v9 = vmul.f32 %v1197_v63, %v3135_v58  ;;  %v863_v14 = vmul.f32 %v831_v53, %v3135_v58 }
 0x183   : > { %v596_v8 = vpop.f32.mrb[9].mxu0  ;;  %v3234_v18 = vadd.f32 %v584_v19, %v3109_v47  ;;  %v3237_v20 = vadd.f32 %v586_v25, %v3114_v49  ;;  %v3240_v21 = vadd.f32 %v588_v30, %v3109_v47  ;;  %v3245_v24 = vadd.f32 %v590_v35, %v3114_v49 }
 0x184   : > { %v598_v13 = vpop.f32.mrb[10].mxu0  ;;  %v1231_v17 = vmul.f32 %v1199_v7, %v3152_v3  ;;  %v1261_v23 = vand.u32 2147483647, %v1229_v9  ;;  %v3248_v27 = vadd.f32 %v594_v1, %v3109_v47  ;;  %v865_v28 = vmul.f32 %v833_v2, %v3152_v3 }
 0x185   : > { %v3242_v22 = vpop.f32.mrb[11].mxu0  ;;  %v864_v31 = vmul.f32 %v832_v10, %v3142_v62  ;;  %v895_v25 = vadd.f32 %v3217_v4, %v862_v11  ;;  %v1196_v30 = vadd.f32 %v3220_v6, %v1153_v12  ;;  %v3255_v32 = vadd.f32 %v596_v8, %v3114_v49 }
 0x186   : > { %v1263_v29 = vand.u32 2147483647, %v1231_v17  ;;  %v1293_v19 = vadd.f32 1.0, %v1261_v23  ;;  %v896_v33 = vadd.f32 %v3217_v4, %v863_v14  ;;  %v1198_v35 = vadd.f32 %v3220_v6, %v1155_v43 }
 0x187   : > { %v3260_v36 = vadd.f32 %v598_v13, %v3109_v47  ;;  %v1228_v38 = vmul.f32 %v1196_v30, %v3127_v55  ;;  %v672_v39 = vmul.f32 %v3124_v54, %v3237_v20  ;;  %v898_v41 = vadd.f32 %v3217_v4, %v865_v28 }
 0x188   : > { %v1295_v34 = vadd.f32 1.0, %v1263_v29  ;;  %2558 = vrcp.f32 %v1293_v19  ;;  %v1230_v42 = vmul.f32 %v1198_v35, %v3142_v62  ;;  %v674_v44 = vmul.f32 %v3124_v54, %v3245_v24 }
 0x189   : > { %v897_v48 = vadd.f32 %v3217_v4, %v864_v31  ;;  %v1260_v45 = vand.u32 2147483647, %v1228_v38  ;;  %v705_v51 = vadd.f32 %v3137_v60, %v672_v39  ;;  %v1008_v53 = vmul.f32 %v3119_v52, %v3237_v20 }
 0x18a   : > { %v3265_v40 = vpop.f32.mrb[12].mxu0  ;;  %2560 = vrcp.f32 %v1295_v34  ;;  %v927_v59 = vmul.f32 %v895_v25, %v3127_v55  ;;  %v1262_v63 = vand.u32 2147483647, %v1230_v42  ;;  %v707_v1 = vadd.f32 %v3137_v60, %v674_v44 }
 0x18b   : > { %v606_v46 = vpop.f32.mrb[13].mxu0  ;;  %v1010_v2 = vmul.f32 %v3119_v52, %v3245_v24  ;;  %v928_v8 = vmul.f32 %v896_v33, %v3135_v58  ;;  %v1292_v9 = vadd.f32 1.0, %v1260_v45  ;;  %v737_v10 = vmul.f32 %v705_v51, %v3237_v20 }
 0x18c   : > { %v608_v57 = vpop.f32.mrb[14].mxu0  ;;  %v1051_v11 = vadd.f32 %v3139_v61, %v1008_v53  ;;  %v930_v12 = vmul.f32 %v898_v41, %v3152_v3  ;;  %v1294_v13 = vadd.f32 1.0, %v1262_v63  ;;  %v739_v14 = vmul.f32 %v707_v1, %v3245_v24 }
 0x18d   : > { %v610_v7 = vpop.f32.mrb[15].mxu0  ;;  %v1053_v55 = vadd.f32 %v3139_v61, %v1010_v2  ;;  %2562 = vrcp.f32 %v1292_v9  ;;  %v770_v17 = vadd.f32 %v3156_v5, %v737_v10  ;;  %v671_v58 = vmul.f32 %v3124_v54, %v3234_v18 }
 0x18e   : > { %v1083_v43 = vmul.f32 %v1051_v11, %v3237_v20  ;;  %2564 = vrcp.f32 %v1294_v13  ;;  %v772_v23 = vadd.f32 %v3156_v5, %v739_v14  ;;  %v673_v3 = vmul.f32 %v3124_v54, %v3240_v21 }
 0x18f   : > { %v1085_v28 = vmul.f32 %v1053_v55, %v3245_v24  ;;  %v929_v29 = vmul.f32 %v897_v48, %v3142_v62  ;;  %v802_v19 = vmul.f32 %v770_v17, %v3237_v20  ;;  %v704_v25 = vadd.f32 %v3137_v60, %v671_v58 }
 0x190   : > { %v1126_v31 = vadd.f32 %v3172_v15, %v1083_v43  ;;  %v961_v33 = vadd.f32 %v3229_v16, %v928_v8  ;;  %v804_v34 = vmul.f32 %v772_v23, %v3245_v24  ;;  %v706_v38 = vadd.f32 %v3137_v60, %v673_v3 }
 0x191   : > { %v1128_v35 = vadd.f32 %v3172_v15, %v1085_v28  ;;  %v963_v42 = vadd.f32 %v3229_v16, %v930_v12  ;;  %v835_v62 = vadd.f32 %v3187_v26, %v802_v19  ;;  %v736_v48 = vmul.f32 %v704_v25, %v3234_v18 }
 0x192   : > { %v614_v30 = vpop.f32.mrb[16].mxu0  ;;  %v2559_v39 = vpop.eup %2558  ;;  %v1158_v44 = vmul.f32 %v1126_v31, %v3237_v20  ;;  %v3307_v51 = vadd.f32 %v3242_v22, %v3114_v49  ;;  %v960_v63 = vadd.f32 %v3229_v16, %v927_v59  ;;  %v837_v1 = vadd.f32 %v3187_v26, %v804_v34 }
 0x193   : > { %v616_v41 = vpop.f32.mrb[17].mxu0  ;;  %v1160_v2 = vmul.f32 %v1128_v35, %v3245_v24  ;;  %v1357_v9 = vmul.f32 %v2559_v39, %v961_v33  ;;  %v867_v11 = vmul.f32 %v835_v62, %v3237_v20  ;;  %v962_v13 = vadd.f32 %v3229_v16, %v929_v29 }
 0x194   : > { %v2561_v45 = vpop.eup %2560  ;;  %v618_v53 = vpop.f32.mrb[18].mxu0  ;;  %v1201_v12 = vadd.f32 %v3199_v37, %v1158_v44  ;;  %v738_v22 = vmul.f32 %v706_v38, %v3240_v21  ;;  %v1007_v59 = vmul.f32 %v3117_v50, %v3234_v18  ;;  %v769_v43 = vadd.f32 %v3156_v5, %v736_v48 }
 0x195   : > { %v620_v8 = vpop.f32.mrb[19].mxu0  ;;  %v1359_v10 = vmul.f32 %v2561_v45, %v963_v42  ;;  %v1203_v14 = vadd.f32 %v3199_v37, %v1160_v2  ;;  %v1009_v58 = vmul.f32 %v3117_v50, %v3240_v21  ;;  %v3325_v23 = vadd.f32 %v3265_v40, %v3109_v47 }
 0x196   : > { %v1233_v17 = vmul.f32 %v1201_v12, %v3237_v20  ;;  %v3328_v28 = vadd.f32 %v606_v46, %v3114_v49  ;;  %v869_v3 = vmul.f32 %v837_v1, %v3245_v24  ;;  %v3333_v31 = vadd.f32 %v608_v57, %v3109_v47 }
 0x197   : > { %v1389_v55 = vpack.c.bf16 %v1359_v10, %v1357_v9  ;;  %v1235_v29 = vmul.f32 %v1203_v14, %v3245_v24  ;;  %v2563_v19 = vpop.eup %2562  ;;  %v3336_v25 = vadd.f32 %v610_v7, %v3114_v49  ;;  %v900_v33 = vadd.f32 %v3217_v4, %v867_v11 }
 0x198   : > { %v1265_v34 = vand.u32 2147483647, %v1233_v17  ;;  %v2565_v40 = vpop.eup %2564  ;;  %v771_v46 = vadd.f32 %v3156_v5, %v738_v22  ;;  %v801_v39 = vmul.f32 %v769_v43, %v3234_v18  ;;  %v1050_v42 = vadd.f32 %v3130_v56, %v1007_v59 }
 0x199   : > { %1571 = vmatprep.mubr.bf16.mxu1 %v1389_v55  ;;  %v1267_v38 = vand.u32 2147483647, %v1235_v29  ;;  %v1356_v62 = vmul.f32 %v2563_v19, %v960_v63  ;;  %v1358_v44 = vmul.f32 %v2565_v40, %v962_v13  ;;  %v1052_v7 = vadd.f32 %v3130_v56, %v1009_v58 }
 0x19a   : > { %v624_v35 = vpop.f32.mrb[20].mxu0  ;;  %v1297_v48 = vadd.f32 1.0, %v1265_v34  ;;  %v3344_v45 = vadd.f32 %v614_v30, %v3109_v47  ;;  %v3347_v1 = vadd.f32 %v616_v41, %v3114_v49  ;;  %v902_v9 = vadd.f32 %v3217_v4, %v869_v3 }
 0x19b   : > { %v626_v57 = vpop.f32.mrb[21].mxu0  ;;  %v1299_v10 = vadd.f32 1.0, %v1267_v38  ;;  %v3351_v11 = vadd.f32 %v618_v53, %v3109_v47  ;;  %v3354_v63 = vadd.f32 %v620_v8, %v3114_v49  ;;  %v1388_v12 = vpack.c.bf16 %v1358_v44, %v1356_v62 }
 0x19c   : > { %v628_v2 = vpop.f32.mrb[22].mxu0  ;;  %2566 = vrcp.f32 %v1297_v48  ;;  %v932_v14 = vmul.f32 %v900_v33, %v3237_v20  ;;  %v803_v30 = vmul.f32 %v771_v46, %v3240_v21  ;;  %v1082_v41 = vmul.f32 %v1050_v42, %v3234_v18 }
 0x19d   : > { %v630_v13 = vpop.f32.mrb[23].mxu0  ;;  %2568 = vrcp.f32 %v1299_v10  ;;  %1572 = vmatmul.mubr.bf16.vlgmr.msra.gmra.mrb[0].mxu1 %v1388_v12  ;;  %v834_v22 = vadd.f32 %v3187_v26, %v801_v39  ;;  %v1084_v59 = vmul.f32 %v1052_v7, %v3240_v21  ;;  %v676_v53 = vmul.f32 %v3124_v54, %v3255_v32 }
 0x19e   : > { %v678_v8 = vmul.f32 %v3124_v54, %v3307_v51  ;;  %v934_v55 = vmul.f32 %v902_v9, %v3245_v24  ;;  %v1125_v20 = vadd.f32 %v3145_v0, %v1082_v41  ;;  %v1012_v17 = vmul.f32 %v3119_v52, %v3255_v32 }
 0x19f   : > { %v1014_v43 = vmul.f32 %v3119_v52, %v3307_v51  ;;  %v3372_v58 = vadd.f32 %v624_v35, %v3109_v47  ;;  %v1127_v3 = vadd.f32 %v3145_v0, %v1084_v59  ;;  %v709_v29 = vadd.f32 %v3137_v60, %v676_v53 }
 0x1a0   : > { %v711_v19 = vadd.f32 %v3137_v60, %v678_v8  ;;  %v965_v33 = vadd.f32 %v3229_v16, %v932_v14  ;;  %v836_v34 = vadd.f32 %v3187_v26, %v803_v30  ;;  %v1157_v40 = vmul.f32 %v1125_v20, %v3234_v18 }
 0x1a1   : > { %v1055_v38 = vadd.f32 %v3139_v61, %v1012_v17  ;;  %v866_v46 = vmul.f32 %v834_v22, %v3234_v18  ;;  %v1159_v35 = vmul.f32 %v1127_v3, %v3240_v21  ;;  %v741_v42 = vmul.f32 %v709_v29, %v3255_v32 }
 0x1a2   : > { %v634_v24 = vpop.f32.mrb[24].mxu0  ;;  %v1057_v62 = vadd.f32 %v3139_v61, %v1014_v43  ;;  %v3388_v44 = vadd.f32 %v626_v57, %v3114_v49  ;;  %v967_v48 = vadd.f32 %v3229_v16, %v934_v55  ;;  %v1200_v7 = vadd.f32 %v3220_v6, %v1157_v40 }
 0x1a3   : > { %v3383_v39 = vpop.f32.mrb[25].mxu0  ;;  %v743_v10 = vmul.f32 %v711_v19, %v3307_v51  ;;  %v3396_v12 = vadd.f32 %v628_v2, %v3109_v47  ;;  %v3399_v14 = vadd.f32 %v630_v13, %v3114_v49  ;;  %v1202_v30 = vadd.f32 %v3220_v6, %v1159_v35 }
 0x1a4   : > { %v3392_v9 = vpop.f32.mrb[26].mxu0  ;;  %v774_v57 = vadd.f32 %v3156_v5, %v741_v42  ;;  %v868_v22 = vmul.f32 %v836_v34, %v3240_v21  ;;  %v1232_v59 = vmul.f32 %v1200_v7, %v3234_v18  ;;  %v1087_v8 = vmul.f32 %v1055_v38, %v3255_v32 }
 0x1a5   : > { %v3402_v41 = vpop.f32.mrb[27].mxu0  ;;  %v776_v53 = vadd.f32 %v3156_v5, %v743_v10  ;;  %v899_v2 = vadd.f32 %v3217_v4, %v866_v46  ;;  %v1234_v13 = vmul.f32 %v1202_v30, %v3240_v21  ;;  %v1089_v17 = vmul.f32 %v1057_v62, %v3307_v51 }
 0x1a6   : > { %v2567_v55 = vpop.eup %2566  ;;  %v806_v20 = vmul.f32 %v774_v57, %v3255_v32  ;;  %v1264_v29 = vand.u32 2147483647, %v1232_v59  ;;  %v1130_v19 = vadd.f32 %v3172_v15, %v1087_v8  ;;  %v675_v34 = vmul.f32 %v3124_v54, %v3248_v27 }
 0x1a7   : > { %v2569_v43 = vpop.eup %2568  ;;  %v1361_v3 = vmul.f32 %v2567_v55, %v965_v33  ;;  %v1266_v35 = vand.u32 2147483647, %v1234_v13  ;;  %v808_v38 = vmul.f32 %v776_v53, %v3307_v51  ;;  %v1132_v46 = vadd.f32 %v3172_v15, %v1089_v17 }
 0x1a8   : > { %v1363_v40 = vmul.f32 %v2569_v43, %v967_v48  ;;  %v901_v42 = vadd.f32 %v3217_v4, %v868_v22  ;;  %v1296_v7 = vadd.f32 1.0, %v1264_v29  ;;  %v1162_v10 = vmul.f32 %v1130_v19, %v3255_v32 }
 0x1a9   : > { %v677_v33 = vmul.f32 %v3124_v54, %v3260_v36  ;;  %v1298_v57 = vadd.f32 1.0, %v1266_v35  ;;  %v839_v59 = vadd.f32 %v3187_v26, %v806_v20  ;;  %v1164_v48 = vmul.f32 %v1132_v46, %v3307_v51 }
 0x1aa   : > { %v3420_v62 = vpop.f32.mrb[28].mxu0  ;;  %v1391_v30 = vpack.c.bf16 %v1363_v40, %v1361_v3  ;;  %v3429_v53 = vadd.f32 %v634_v24, %v3109_v47  ;;  %v931_v22 = vmul.f32 %v899_v2, %v3234_v18  ;;  %2570 = vrcp.f32 %v1296_v7 }
 0x1ab   : > { %v3426_v8 = vpop.f32.mrb[29].mxu0  ;;  %v1205_v55 = vadd.f32 %v3199_v37, %v1162_v10  ;;  %2572 = vrcp.f32 %v1298_v57  ;;  %v841_v17 = vadd.f32 %v3187_v26, %v808_v38  ;;  %v1207_v20 = vadd.f32 %v3199_v37, %v1164_v48 }
 0x1ac   : > { %v3433_v13 = vpop.f32.mrb[30].mxu0  ;;  %1579 = vmatprep.mubr.bf16.mxu1 %v1391_v30  ;;  %v708_v43 = vadd.f32 %v3137_v60, %v675_v34  ;;  %v933_v24 = vmul.f32 %v901_v42, %v3240_v21  ;;  %v710_v18 = vadd.f32 %v3137_v60, %v677_v33  ;;  %v1011_v2 = vmul.f32 %v3117_v50, %v3248_v27 }
 0x1ad   : > { %v3438_v3 = vpop.f32.mrb[31].mxu0  ;;  %v1237_v29 = vmul.f32 %v1205_v55, %v3255_v32  ;;  %v871_v19 = vmul.f32 %v839_v59, %v3255_v32  ;;  %v1239_v40 = vmul.f32 %v1207_v20, %v3307_v51  ;;  %v1013_v34 = vmul.f32 %v3117_v50, %v3260_v36 }
 0x1ae   : > { %v740_v35 = vmul.f32 %v708_v43, %v3248_v27  ;;  %v964_v38 = vadd.f32 %v3229_v16, %v931_v22  ;;  %v742_v21 = vmul.f32 %v710_v18, %v3260_v36  ;;  %v1054_v42 = vadd.f32 %v3130_v56, %v1011_v2 }
 0x1af   : > { %v1269_v46 = vand.u32 2147483647, %v1237_v29  ;;  %v873_v7 = vmul.f32 %v841_v17, %v3307_v51  ;;  %v1271_v10 = vand.u32 2147483647, %v1239_v40  ;;  %v1056_v30 = vadd.f32 %v3130_v56, %v1013_v34 }
 0x1b0   : > { %v773_v33 = vadd.f32 %v3156_v5, %v740_v35  ;;  %v3458_v57 = vadd.f32 %v3383_v39, %v3114_v49  ;;  %v775_v48 = vadd.f32 %v3156_v5, %v742_v21  ;;  %v1086_v22 = vmul.f32 %v1054_v42, %v3248_v27 }
 0x1b1   : > { %v1301_v59 = vadd.f32 1.0, %v1269_v46  ;;  %v904_v55 = vadd.f32 %v3217_v4, %v871_v19  ;;  %v1303_v20 = vadd.f32 1.0, %v1271_v10  ;;  %v1088_v17 = vmul.f32 %v1056_v30, %v3260_v36 }
 0x1b2   : > { %v805_v43 = vmul.f32 %v773_v33, %v3248_v27  ;;  %v966_v29 = vadd.f32 %v3229_v16, %v933_v24  ;;  %v807_v18 = vmul.f32 %v775_v48, %v3260_v36  ;;  %v1129_v39 = vadd.f32 %v3145_v0, %v1086_v22 }
 0x1b3   : > { %2574 = vrcp.f32 %v1301_v59  ;;  %v3470_v2 = vadd.f32 %v3392_v9, %v3109_v47  ;;  %v906_v40 = vadd.f32 %v3217_v4, %v873_v7  ;;  %v1131_v19 = vadd.f32 %v3145_v0, %v1088_v17 }
 0x1b4   : > { %2576 = vrcp.f32 %v1303_v20  ;;  %v2571_v35 = vpop.eup %2570  ;;  %v838_v34 = vadd.f32 %v3187_v26, %v805_v43  ;;  %v1161_v46 = vmul.f32 %v1129_v39, %v3248_v27  ;;  %v680_v24 = vmul.f32 %v3124_v54, %v3328_v28 }
 0x1b5   : > { %v682_v21 = vmul.f32 %v3124_v54, %v3336_v25  ;;  %v2573_v42 = vpop.eup %2572  ;;  %v936_v9 = vmul.f32 %v904_v55, %v3255_v32  ;;  %v840_v10 = vadd.f32 %v3187_v26, %v807_v18  ;;  %v1163_v7 = vmul.f32 %v1131_v19, %v3260_v36 }
 0x1b6   : > { %v1016_v33 = vmul.f32 %v3119_v52, %v3328_v28  ;;  %v1360_v30 = vmul.f32 %v2571_v35, %v964_v38  ;;  %v1362_v59 = vmul.f32 %v2573_v42, %v966_v29  ;;  %v1204_v48 = vadd.f32 %v3220_v6, %v1161_v46 }
 0x1b7   : > { %v713_v22 = vadd.f32 %v3137_v60, %v680_v24  ;;  %v938_v20 = vmul.f32 %v906_v40, %v3307_v51  ;;  %v1206_v43 = vadd.f32 %v3220_v6, %v1163_v7  ;;  %v715_v17 = vadd.f32 %v3137_v60, %v682_v21 }
 0x1b8   : > { %v1018_v32 = vmul.f32 %v3119_v52, %v3336_v25  ;;  %v1390_v55 = vpack.c.bf16 %v1362_v59, %v1360_v30  ;;  %v870_v18 = vmul.f32 %v838_v34, %v3248_v27  ;;  %v1236_v39 = vmul.f32 %v1204_v48, %v3248_v27 }
 0x1b9   : > { %v745_v38 = vmul.f32 %v713_v22, %v3328_v28  ;;  %v872_v29 = vmul.f32 %v840_v10, %v3260_v36  ;;  %v1238_v19 = vmul.f32 %v1206_v43, %v3260_v36  ;;  %v747_v51 = vmul.f32 %v715_v17, %v3336_v25 }
 0x1ba   : > { %v1059_v40 = vadd.f32 %v3139_v61, %v1016_v33  ;;  %1580 = vmatmul.mubr.bf16.gmra.mrb[4].mxu1 %v1390_v55  ;;  %v969_v35 = vadd.f32 %v3229_v16, %v936_v9  ;;  %v1268_v46 = vand.u32 2147483647, %v1236_v39  ;;  %v1061_v34 = vadd.f32 %v3139_v61, %v1018_v32 }
 0x1bb   : > { %v778_v24 = vadd.f32 %v3156_v5, %v745_v38  ;;  %v971_v21 = vadd.f32 %v3229_v16, %v938_v20  ;;  %v1270_v42 = vand.u32 2147483647, %v1238_v19  ;;  %v780_v7 = vadd.f32 %v3156_v5, %v747_v51 }
 0x1bc   : > { %v1091_v10 = vmul.f32 %v1059_v40, %v3328_v28  ;;  %v903_v59 = vadd.f32 %v3217_v4, %v870_v18  ;;  %v1300_v48 = vadd.f32 1.0, %v1268_v46  ;;  %v1093_v9 = vmul.f32 %v1061_v34, %v3336_v25 }
 0x1bd   : > { %v2575_v30 = vpop.eup %2574  ;;  %v810_v33 = vmul.f32 %v778_v24, %v3328_v28  ;;  %v905_v43 = vadd.f32 %v3217_v4, %v872_v29  ;;  %v1302_v17 = vadd.f32 1.0, %v1270_v42  ;;  %v812_v32 = vmul.f32 %v780_v7, %v3336_v25 }
 0x1be   : > { %v2577_v22 = vpop.eup %2576  ;;  %v1134_v20 = vadd.f32 %v3172_v15, %v1091_v10  ;;  %v1365_v55 = vmul.f32 %v2575_v30, %v969_v35  ;;  %2578 = vrcp.f32 %v1300_v48  ;;  %v1136_v38 = vadd.f32 %v3172_v15, %v1093_v9 }
 0x1bf   : > { %v1367_v39 = vmul.f32 %v2577_v22, %v971_v21  ;;  %2580 = vrcp.f32 %v1302_v17  ;;  %v843_v18 = vadd.f32 %v3187_v26, %v810_v33  ;;  %v679_v51 = vmul.f32 %v3124_v54, %v3325_v23 }
 0x1c0   : > { %v1166_v19 = vmul.f32 %v1134_v20, %v3328_v28  ;;  %v935_v29 = vmul.f32 %v903_v59, %v3248_v27  ;;  %v1168_v46 = vmul.f32 %v1136_v38, %v3336_v25  ;;  %v681_v35 = vmul.f32 %v3124_v54, %v3333_v31 }
 0x1c1   : > { %v1393_v40 = vpack.c.bf16 %v1367_v39, %v1365_v55  ;;  %v845_v24 = vadd.f32 %v3187_v26, %v812_v32  ;;  %v712_v21 = vadd.f32 %v3137_v60, %v679_v51  ;;  %v1015_v42 = vmul.f32 %v3117_v50, %v3325_v23 }
 0x1c2   : > { %v1209_v34 = vadd.f32 %v3199_v37, %v1166_v19  ;;  %v937_v7 = vmul.f32 %v905_v43, %v3260_v36  ;;  %v1211_v10 = vadd.f32 %v3199_v37, %v1168_v46  ;;  %v714_v27 = vadd.f32 %v3137_v60, %v681_v35 }
 0x1c3   : > { %1587 = vmatprep.mubr.bf16.mxu1 %v1393_v40  ;;  %v1017_v30 = vmul.f32 %v3117_v50, %v3333_v31  ;;  %v875_v59 = vmul.f32 %v843_v18, %v3328_v28  ;;  %v744_v33 = vmul.f32 %v712_v21, %v3325_v23  ;;  %v1058_v9 = vadd.f32 %v3130_v56, %v1015_v42 }
 0x1c4   : > { %v1241_v48 = vmul.f32 %v1209_v34, %v3328_v28  ;;  %v968_v22 = vadd.f32 %v3229_v16, %v935_v29  ;;  %v1243_v17 = vmul.f32 %v1211_v10, %v3336_v25  ;;  %v746_v36 = vmul.f32 %v714_v27, %v3333_v31 }
 0x1c5   : > { %v1060_v43 = vadd.f32 %v3130_v56, %v1017_v30  ;;  %v877_v32 = vmul.f32 %v845_v24, %v3336_v25  ;;  %v777_v55 = vadd.f32 %v3156_v5, %v744_v33  ;;  %v1090_v39 = vmul.f32 %v1058_v9, %v3325_v23 }
 0x1c6   : > { %v1273_v20 = vand.u32 2147483647, %v1241_v48  ;;  %v970_v38 = vadd.f32 %v3229_v16, %v937_v7  ;;  %v1275_v18 = vand.u32 2147483647, %v1243_v17  ;;  %v779_v19 = vadd.f32 %v3156_v5, %v746_v36 }
 0x1c7   : > { %v1092_v51 = vmul.f32 %v1060_v43, %v3333_v31  ;;  %v908_v40 = vadd.f32 %v3217_v4, %v875_v59  ;;  %v809_v46 = vmul.f32 %v777_v55, %v3325_v23  ;;  %v1133_v35 = vadd.f32 %v3145_v0, %v1090_v39 }
 0x1c8   : > { %v1305_v29 = vadd.f32 1.0, %v1273_v20  ;;  %v2579_v24 = vpop.eup %2578  ;;  %v1307_v34 = vadd.f32 1.0, %v1275_v18  ;;  %v811_v21 = vmul.f32 %v779_v19, %v3333_v31  ;;  %v684_v7 = vmul.f32 %v3124_v54, %v3347_v1 }
 0x1c9   : > { %v1135_v42 = vadd.f32 %v3145_v0, %v1092_v51  ;;  %v2581_v10 = vpop.eup %2580  ;;  %v1364_v27 = vmul.f32 %v2579_v24, %v968_v22  ;;  %v910_v30 = vadd.f32 %v3217_v4, %v877_v32  ;;  %v1165_v59 = vmul.f32 %v1133_v35, %v3325_v23 }
 0x1ca   : > { %2582 = vrcp.f32 %v1305_v29  ;;  %v1366_v48 = vmul.f32 %v2581_v10, %v970_v38  ;;  %v842_v33 = vadd.f32 %v3187_v26, %v809_v46  ;;  %v940_v17 = vmul.f32 %v908_v40, %v3328_v28 }
 0x1cb   : > { %2584 = vrcp.f32 %v1307_v34  ;;  %v1167_v9 = vmul.f32 %v1135_v42, %v3333_v31  ;;  %v1208_v36 = vadd.f32 %v3220_v6, %v1165_v59  ;;  %v686_v43 = vmul.f32 %v3124_v54, %v3354_v63 }
 0x1cc   : > { %v717_v22 = vadd.f32 %v3137_v60, %v684_v7  ;;  %v1392_v20 = vpack.c.bf16 %v1366_v48, %v1364_v27  ;;  %v844_v32 = vadd.f32 %v3187_v26, %v811_v21  ;;  %v1020_v39 = vmul.f32 %v3119_v52, %v3347_v1 }
 0x1cd   : > { %v1210_v55 = vadd.f32 %v3220_v6, %v1167_v9  ;;  %v942_v38 = vmul.f32 %v910_v30, %v3336_v25  ;;  %v1240_v18 = vmul.f32 %v1208_v36, %v3325_v23  ;;  %v719_v28 = vadd.f32 %v3137_v60, %v686_v43 }
 0x1ce   : > { %v749_v19 = vmul.f32 %v717_v22, %v3347_v1  ;;  %1588 = vmatmul.mubr.bf16.gmra.mrb[8].mxu1 %v1392_v20  ;;  %v874_v51 = vmul.f32 %v842_v33, %v3325_v23  ;;  %v1022_v29 = vmul.f32 %v3119_v52, %v3354_v63  ;;  %v1063_v46 = vadd.f32 %v3139_v61, %v1020_v39 }
 0x1cf   : > { %v1242_v40 = vmul.f32 %v1210_v55, %v3333_v31  ;;  %v973_v35 = vadd.f32 %v3229_v16, %v940_v17  ;;  %v1272_v24 = vand.u32 2147483647, %v1240_v18  ;;  %v751_v25 = vmul.f32 %v719_v28, %v3354_v63 }
 0x1d0   : > { %v782_v34 = vadd.f32 %v3156_v5, %v749_v19  ;;  %v876_v21 = vmul.f32 %v844_v32, %v3333_v31  ;;  %v1065_v7 = vadd.f32 %v3139_v61, %v1022_v29  ;;  %v1095_v10 = vmul.f32 %v1063_v46, %v3347_v1 }
 0x1d1   : > { %v1274_v42 = vand.u32 2147483647, %v1242_v40  ;;  %v975_v27 = vadd.f32 %v3229_v16, %v942_v38  ;;  %v1304_v30 = vadd.f32 1.0, %v1272_v24  ;;  %v784_v59 = vadd.f32 %v3156_v5, %v751_v25 }
 0x1d2   : > { %v814_v48 = vmul.f32 %v782_v34, %v3347_v1  ;;  %v907_v33 = vadd.f32 %v3217_v4, %v874_v51  ;;  %v1097_v17 = vmul.f32 %v1065_v7, %v3354_v63  ;;  %v1138_v36 = vadd.f32 %v3172_v15, %v1095_v10 }
 0x1d3   : > { %v1306_v9 = vadd.f32 1.0, %v1274_v42  ;;  %2586 = vrcp.f32 %v1304_v30  ;;  %v816_v22 = vmul.f32 %v784_v59, %v3354_v63  ;;  %v683_v32 = vmul.f32 %v3124_v54, %v3344_v45 }
 0x1d4   : > { %v2583_v43 = vpop.eup %2582  ;;  %v847_v20 = vadd.f32 %v3187_v26, %v814_v48  ;;  %v909_v39 = vadd.f32 %v3217_v4, %v876_v21  ;;  %v1140_v38 = vadd.f32 %v3172_v15, %v1097_v17  ;;  %v1170_v18 = vmul.f32 %v1138_v36, %v3347_v1 }
 0x1d5   : > { %v2585_v55 = vpop.eup %2584  ;;  %2588 = vrcp.f32 %v1306_v9  ;;  %v1369_v28 = vmul.f32 %v2583_v43, %v973_v35  ;;  %v849_v51 = vadd.f32 %v3187_v26, %v816_v22  ;;  %v685_v40 = vmul.f32 %v3124_v54, %v3351_v11 }
 0x1d6   : > { %v1371_v19 = vmul.f32 %v2585_v55, %v975_v27  ;;  %v1172_v29 = vmul.f32 %v1140_v38, %v3354_v63  ;;  %v1213_v46 = vadd.f32 %v3199_v37, %v1170_v18  ;;  %v716_v24 = vadd.f32 %v3137_v60, %v683_v32 }
 0x1d7   : > { %v1019_v25 = vmul.f32 %v3117_v50, %v3344_v45  ;;  %v939_v21 = vmul.f32 %v907_v33, %v3325_v23  ;;  %v879_v35 = vmul.f32 %v847_v20, %v3347_v1  ;;  %v718_v42 = vadd.f32 %v3137_v60, %v685_v40 }
 0x1d8   : > { %v1395_v34 = vpack.c.bf16 %v1371_v19, %v1369_v28  ;;  %v1215_v7 = vadd.f32 %v3199_v37, %v1172_v29  ;;  %v1245_v10 = vmul.f32 %v1213_v46, %v3347_v1  ;;  %v748_v27 = vmul.f32 %v716_v24, %v3344_v45 }
 0x1d9   : > { %v1021_v30 = vmul.f32 %v3117_v50, %v3351_v11  ;;  %v941_v59 = vmul.f32 %v909_v39, %v3333_v31  ;;  %v881_v48 = vmul.f32 %v849_v51, %v3354_v63  ;;  %v750_v23 = vmul.f32 %v718_v42, %v3351_v11 }
 0x1da   : > { %1595 = vmatprep.mubr.bf16.mxu1 %v1395_v34  ;;  %v1062_v33 = vadd.f32 %v3130_v56, %v1019_v25  ;;  %v1247_v9 = vmul.f32 %v1215_v7, %v3354_v63  ;;  %v1277_v17 = vand.u32 2147483647, %v1245_v10  ;;  %v781_v36 = vadd.f32 %v3156_v5, %v748_v27 }
 0x1db   : > { %v1064_v43 = vadd.f32 %v3130_v56, %v1021_v30  ;;  %v3617_v22 = vadd.f32 %v3402_v41, %v3114_v49  ;;  %v972_v20 = vadd.f32 %v3229_v16, %v939_v21  ;;  %v783_v31 = vadd.f32 %v3156_v5, %v750_v23 }
 0x1dc   : > { %v1094_v32 = vmul.f32 %v1062_v33, %v3344_v45  ;;  %v912_v55 = vadd.f32 %v3217_v4, %v879_v35  ;;  %v1279_v39 = vand.u32 2147483647, %v1247_v9  ;;  %v1309_v38 = vadd.f32 1.0, %v1277_v17 }
 0x1dd   : > { %v1096_v18 = vmul.f32 %v1064_v43, %v3351_v11  ;;  %v2587_v28 = vpop.eup %2586  ;;  %v974_v19 = vadd.f32 %v3229_v16, %v941_v59  ;;  %v813_v51 = vmul.f32 %v781_v36, %v3344_v45  ;;  %v688_v40 = vmul.f32 %v3124_v54, %v3388_v44 }
 0x1de   : > { %v1137_v41 = vadd.f32 %v3145_v0, %v1094_v32  ;;  %v914_v46 = vadd.f32 %v3217_v4, %v881_v48  ;;  %v1311_v24 = vadd.f32 1.0, %v1279_v39  ;;  %2590 = vrcp.f32 %v1309_v38 }
 0x1df   : > { %v2589_v29 = vpop.eup %2588  ;;  %v815_v25 = vmul.f32 %v783_v31, %v3351_v11  ;;  %v1368_v34 = vmul.f32 %v2587_v28, %v972_v20  ;;  %v1139_v35 = vadd.f32 %v3145_v0, %v1096_v18  ;;  %v944_v7 = vmul.f32 %v912_v55, %v3347_v1 }
 0x1e0   : > { %v1370_v21 = vmul.f32 %v2589_v29, %v974_v19  ;;  %v1169_v42 = vmul.f32 %v1137_v41, %v3344_v45  ;;  %2592 = vrcp.f32 %v1311_v24  ;;  %v690_v10 = vmul.f32 %v3124_v54, %v3399_v14 }
 0x1e1   : > { %v721_v27 = vadd.f32 %v3137_v60, %v688_v40  ;;  %v846_v59 = vadd.f32 %v3187_v26, %v813_v51  ;;  %v1171_v48 = vmul.f32 %v1139_v35, %v3351_v11  ;;  %v848_v33 = vadd.f32 %v3187_v26, %v815_v25 }
 0x1e2   : > { %v1394_v30 = vpack.c.bf16 %v1370_v21, %v1368_v34  ;;  %v1212_v23 = vadd.f32 %v3220_v6, %v1169_v42  ;;  %v723_v9 = vadd.f32 %v3137_v60, %v690_v10  ;;  %v1024_v1 = vmul.f32 %v3119_v52, %v3388_v44 }
 0x1e3   : > { %v753_v17 = vmul.f32 %v721_v27, %v3388_v44  ;;  %v946_v36 = vmul.f32 %v914_v46, %v3354_v63  ;;  %v1214_v43 = vadd.f32 %v3220_v6, %v1171_v48  ;;  %v1026_v31 = vmul.f32 %v3119_v52, %v3399_v14 }
 0x1e4   : > { %1596 = vmatmul.mubr.bf16.gmra.mrb[12].mxu1 %v1394_v30  ;;  %v1244_v20 = vmul.f32 %v1212_v23, %v3344_v45  ;;  %v977_v32 = vadd.f32 %v3229_v16, %v944_v7  ;;  %v755_v55 = vmul.f32 %v723_v9, %v3399_v14  ;;  %v1067_v38 = vadd.f32 %v3139_v61, %v1024_v1 }
 0x1e5   : > { %v786_v39 = vadd.f32 %v3156_v5, %v753_v17  ;;  %v878_v18 = vmul.f32 %v846_v59, %v3344_v45  ;;  %v1246_v28 = vmul.f32 %v1214_v43, %v3351_v11  ;;  %v1069_v19 = vadd.f32 %v3139_v61, %v1026_v31 }
 0x1e6   : > { %v1276_v63 = vand.u32 2147483647, %v1244_v20  ;;  %v880_v51 = vmul.f32 %v848_v33, %v3351_v11  ;;  %v788_v41 = vadd.f32 %v3156_v5, %v755_v55  ;;  %v1099_v29 = vmul.f32 %v1067_v38, %v3388_v44 }
 0x1e7   : > { %v818_v40 = vmul.f32 %v786_v39, %v3388_v44  ;;  %v979_v46 = vadd.f32 %v3229_v16, %v946_v36  ;;  %v1278_v24 = vand.u32 2147483647, %v1246_v28  ;;  %v1101_v34 = vmul.f32 %v1069_v19, %v3399_v14 }
 0x1e8   : > { %v1308_v25 = vadd.f32 1.0, %v1276_v63  ;;  %v2591_v21 = vpop.eup %2590  ;;  %v820_v35 = vmul.f32 %v788_v41, %v3399_v14  ;;  %v1142_v7 = vadd.f32 %v3172_v15, %v1099_v29  ;;  %v687_v10 = vmul.f32 %v3124_v54, %v3372_v58 }
 0x1e9   : > { %v851_v42 = vadd.f32 %v3187_v26, %v818_v40  ;;  %v911_v27 = vadd.f32 %v3217_v4, %v878_v18  ;;  %v1310_v30 = vadd.f32 1.0, %v1278_v24  ;;  %v1144_v59 = vadd.f32 %v3172_v15, %v1101_v34 }
 0x1ea   : > { %2594 = vrcp.f32 %v1308_v25  ;;  %v2593_v48 = vpop.eup %2592  ;;  %v1373_v23 = vmul.f32 %v2591_v21, %v977_v32  ;;  %v913_v33 = vadd.f32 %v3217_v4, %v880_v51  ;;  %v1174_v9 = vmul.f32 %v1142_v7, %v3388_v44 }
 0x1eb   : > { %v689_v17 = vmul.f32 %v3124_v54, %v3396_v12  ;;  %v1375_v1 = vmul.f32 %v2593_v48, %v979_v46  ;;  %2596 = vrcp.f32 %v1310_v30  ;;  %v1176_v36 = vmul.f32 %v1144_v59, %v3399_v14 }
 0x1ec   : > { %v720_v43 = vadd.f32 %v3137_v60, %v687_v10  ;;  %v853_v20 = vadd.f32 %v3187_v26, %v820_v35  ;;  %v883_v31 = vmul.f32 %v851_v42, %v3388_v44  ;;  %v1217_v55 = vadd.f32 %v3199_v37, %v1174_v9 }
 0x1ed   : > { %v722_v32 = vadd.f32 %v3137_v60, %v689_v17  ;;  %v1397_v39 = vpack.c.bf16 %v1375_v1, %v1373_v23  ;;  %v1219_v38 = vadd.f32 %v3199_v37, %v1176_v36  ;;  %v1023_v28 = vmul.f32 %v3117_v50, %v3372_v58 }
 0x1ee   : > { %v752_v18 = vmul.f32 %v720_v43, %v3372_v58  ;;  %v943_v63 = vmul.f32 %v911_v27, %v3344_v45  ;;  %v945_v19 = vmul.f32 %v913_v33, %v3351_v11  ;;  %v1249_v51 = vmul.f32 %v1217_v55, %v3388_v44 }
 0x1ef   : > { %v754_v41 = vmul.f32 %v722_v32, %v3396_v12  ;;  %1603 = vmatprep.mubr.bf16.mxu1 %v1397_v39  ;;  %v1251_v40 = vmul.f32 %v1219_v38, %v3399_v14  ;;  %v1025_v46 = vmul.f32 %v3117_v50, %v3396_v12  ;;  %v1066_v24 = vadd.f32 %v3130_v56, %v1023_v28 }
 0x1f0   : > { %v785_v29 = vadd.f32 %v3156_v5, %v752_v18  ;;  %v885_v25 = vmul.f32 %v853_v20, %v3399_v14  ;;  %v916_v45 = vadd.f32 %v3217_v4, %v883_v31  ;;  %v1281_v34 = vand.u32 2147483647, %v1249_v51 }
 0x1f1   : > { %v787_v11 = vadd.f32 %v3156_v5, %v754_v41  ;;  %v1283_v21 = vand.u32 2147483647, %v1251_v40  ;;  %v1068_v42 = vadd.f32 %v3130_v56, %v1025_v46  ;;  %v1098_v7 = vmul.f32 %v1066_v24, %v3372_v58 }
 0x1f2   : > { %v817_v35 = vmul.f32 %v785_v29, %v3372_v58  ;;  %v976_v10 = vadd.f32 %v3229_v16, %v943_v63  ;;  %v978_v27 = vadd.f32 %v3229_v16, %v945_v19  ;;  %v1313_v30 = vadd.f32 1.0, %v1281_v34 }
 0x1f3   : > { %v692_v59 = vmul.f32 %v3124_v54, %v3458_v57  ;;  %v1315_v23 = vadd.f32 1.0, %v1283_v21  ;;  %v819_v33 = vmul.f32 %v787_v11, %v3396_v12  ;;  %v1100_v9 = vmul.f32 %v1068_v42, %v3396_v12 }
 0x1f4   : > { %v2595_v48 = vpop.eup %2594  ;;  %v1141_v17 = vadd.f32 %v3145_v0, %v1098_v7  ;;  %v918_v1 = vadd.f32 %v3217_v4, %v885_v25  ;;  %v948_v36 = vmul.f32 %v916_v45, %v3388_v44  ;;  %2598 = vrcp.f32 %v1313_v30 }
 0x1f5   : > { %v694_v43 = vmul.f32 %v3124_v54, %v3617_v22  ;;  %v2597_v20 = vpop.eup %2596  ;;  %2600 = vrcp.f32 %v1315_v23  ;;  %v850_v31 = vadd.f32 %v3187_v26, %v817_v35  ;;  %v1143_v55 = vadd.f32 %v3145_v0, %v1100_v9 }
 0x1f6   : > { %v1173_v32 = vmul.f32 %v1141_v17, %v3372_v58  ;;  %v1372_v39 = vmul.f32 %v2595_v48, %v976_v10  ;;  %v1374_v38 = vmul.f32 %v2597_v20, %v978_v27  ;;  %v725_v18 = vadd.f32 %v3137_v60, %v692_v59 }
 0x1f7   : > { %v727_v28 = vadd.f32 %v3137_v60, %v694_v43  ;;  %v852_v44 = vadd.f32 %v3187_v26, %v819_v33  ;;  %v1175_v63 = vmul.f32 %v1143_v55, %v3396_v12  ;;  %v1028_v51 = vmul.f32 %v3119_v52, %v3458_v57 }
 0x1f8   : > { %v1216_v19 = vadd.f32 %v3220_v6, %v1173_v32  ;;  %v1396_v41 = vpack.c.bf16 %v1374_v38, %v1372_v39  ;;  %v950_v40 = vmul.f32 %v918_v1, %v3399_v14  ;;  %v757_v29 = vmul.f32 %v725_v18, %v3458_v57 }
 0x1f9   : > { %v759_v46 = vmul.f32 %v727_v28, %v3617_v22  ;;  %v3725_v24 = vadd.f32 %v3426_v8, %v3114_v49  ;;  %v1218_v25 = vadd.f32 %v3220_v6, %v1175_v63  ;;  %v1030_v34 = vmul.f32 %v3119_v52, %v3617_v22 }
 0x1fa   : > { %v1248_v45 = vmul.f32 %v1216_v19, %v3372_v58  ;;  %1604 = vmatmul.mubr.bf16.gmra.mrb[16].mxu1 %v1396_v41  ;;  %v882_v11 = vmul.f32 %v850_v31, %v3372_v58  ;;  %v790_v14 = vadd.f32 %v3156_v5, %v757_v29  ;;  %v1071_v35 = vadd.f32 %v3139_v61, %v1028_v51 }
 0x1fb   : > { %v792_v21 = vadd.f32 %v3156_v5, %v759_v46  ;;  %v884_v42 = vmul.f32 %v852_v44, %v3396_v12  ;;  %v1250_v8 = vmul.f32 %v1218_v25, %v3396_v12  ;;  %v1073_v10 = vadd.f32 %v3139_v61, %v1030_v34 }
 0x1fc   : > { %v1280_v7 = vand.u32 2147483647, %v1248_v45  ;;  %v981_v27 = vadd.f32 %v3229_v16, %v948_v36  ;;  %v983_v30 = vadd.f32 %v3229_v16, %v950_v40  ;;  %v822_v59 = vmul.f32 %v790_v14, %v3458_v57 }
 0x1fd   : > { %v1103_v48 = vmul.f32 %v1071_v35, %v3458_v57  ;;  %v1282_v23 = vand.u32 2147483647, %v1250_v8  ;;  %v1105_v9 = vmul.f32 %v1073_v10, %v3617_v22  ;;  %v691_v17 = vmul.f32 %v3124_v54, %v3429_v53 }
 0x1fe   : > { %v1312_v33 = vadd.f32 1.0, %v1280_v7  ;;  %v2599_v1 = vpop.eup %2598  ;;  %v915_v43 = vadd.f32 %v3217_v4, %v882_v11  ;;  %v824_v20 = vmul.f32 %v792_v21, %v3617_v22  ;;  %v693_v31 = vmul.f32 %v3124_v54, %v3470_v2 }
 0x1ff   : > { %v1146_v36 = vadd.f32 %v3172_v15, %v1103_v48  ;;  %v2601_v55 = vpop.eup %2600  ;;  %v917_v32 = vadd.f32 %v3217_v4, %v884_v42  ;;  %v1314_v39 = vadd.f32 1.0, %v1282_v23  ;;  %v1148_v38 = vadd.f32 %v3172_v15, %v1105_v9 }
 0x200   : > { %2602 = vrcp.f32 %v1312_v33  ;;  %v1377_v18 = vmul.f32 %v2599_v1, %v981_v27  ;;  %v1379_v28 = vmul.f32 %v2601_v55, %v983_v30  ;;  %v855_v44 = vadd.f32 %v3187_v26, %v822_v59 }
 0x201   : > { %v1178_v63 = vmul.f32 %v1146_v36, %v3458_v57  ;;  %2604 = vrcp.f32 %v1314_v39  ;;  %v1180_v19 = vmul.f32 %v1148_v38, %v3617_v22  ;;  %v724_v51 = vadd.f32 %v3137_v60, %v691_v17 }
 0x202   : > { %v726_v41 = vadd.f32 %v3137_v60, %v693_v31  ;;  %v1399_v40 = vpack.c.bf16 %v1379_v28, %v1377_v18  ;;  %v947_v29 = vmul.f32 %v915_v43, %v3372_v58  ;;  %v857_v46 = vadd.f32 %v3187_v26, %v824_v20 }
 0x203   : > { %v1221_v25 = vadd.f32 %v3199_v37, %v1178_v63  ;;  %v1223_v45 = vadd.f32 %v3199_v37, %v1180_v19  ;;  %v756_v34 = vmul.f32 %v724_v51, %v3429_v53  ;;  %v1027_v14 = vmul.f32 %v3117_v50, %v3429_v53 }
 0x204   : > { %v758_v11 = vmul.f32 %v726_v41, %v3470_v2  ;;  %v3767_v21 = vadd.f32 %v3438_v3, %v3114_v49  ;;  %1611 = vmatprep.mubr.bf16.mxu1 %v1399_v40  ;;  %v887_v58 = vmul.f32 %v855_v44, %v3458_v57  ;;  %v1029_v42 = vmul.f32 %v3117_v50, %v3470_v2 }
 0x205   : > { %v1253_v35 = vmul.f32 %v1221_v25, %v3458_v57  ;;  %v1255_v8 = vmul.f32 %v1223_v45, %v3617_v22  ;;  %v789_v7 = vadd.f32 %v3156_v5, %v756_v34  ;;  %v1070_v27 = vadd.f32 %v3130_v56, %v1027_v14 }
 0x206   : > { %v791_v10 = vadd.f32 %v3156_v5, %v758_v11  ;;  %v949_v30 = vmul.f32 %v917_v32, %v3396_v12  ;;  %v980_v49 = vadd.f32 %v3229_v16, %v947_v29  ;;  %v1072_v59 = vadd.f32 %v3130_v56, %v1029_v42 }
 0x207   : > { %v1285_v3 = vand.u32 2147483647, %v1253_v35  ;;  %v889_v48 = vmul.f32 %v857_v46, %v3617_v22  ;;  %v1287_v23 = vand.u32 2147483647, %v1255_v8  ;;  %v821_v33 = vmul.f32 %v789_v7, %v3429_v53 }
 0x208   : > { %v1102_v9 = vmul.f32 %v1070_v27, %v3429_v53  ;;  %v1104_v1 = vmul.f32 %v1072_v59, %v3470_v2  ;;  %v696_v43 = vmul.f32 %v3124_v54, %v3725_v24  ;;  %v698_v12 = vmul.f32 %v3124_v54, %v3767_v21 }
 0x209   : > { %v1317_v17 = vadd.f32 1.0, %v1285_v3  ;;  %v920_v36 = vadd.f32 %v3217_v4, %v887_v58  ;;  %v1319_v31 = vadd.f32 1.0, %v1287_v23  ;;  %v823_v55 = vmul.f32 %v791_v10, %v3470_v2 }
 0x20a   : > { %v2603_v20 = vpop.eup %2602  ;;  %v1145_v32 = vadd.f32 %v3145_v0, %v1102_v9  ;;  %v982_v39 = vadd.f32 %v3229_v16, %v949_v30  ;;  %v1147_v38 = vadd.f32 %v3145_v0, %v1104_v1  ;;  %v729_v18 = vadd.f32 %v3137_v60, %v696_v43 }
 0x20b   : > { %2606 = vrcp.f32 %v1317_v17  ;;  %v2605_v28 = vpop.eup %2604  ;;  %v922_v44 = vadd.f32 %v3217_v4, %v889_v48  ;;  %v854_v63 = vadd.f32 %v3187_v26, %v821_v33  ;;  %v1376_v51 = vmul.f32 %v2603_v20, %v980_v49 }
 0x20c   : > { %2608 = vrcp.f32 %v1319_v31  ;;  %v1177_v19 = vmul.f32 %v1145_v32, %v3429_v53  ;;  %v1378_v41 = vmul.f32 %v2605_v28, %v982_v39  ;;  %v1179_v40 = vmul.f32 %v1147_v38, %v3470_v2 }
 0x20d   : > { %v731_v29 = vadd.f32 %v3137_v60, %v698_v12  ;;  %v952_v46 = vmul.f32 %v920_v36, %v3458_v57  ;;  %v856_v25 = vadd.f32 %v3187_v26, %v823_v55  ;;  %v1032_v34 = vmul.f32 %v3119_v52, %v3725_v24 }
 0x20e   : > { %v1220_v45 = vadd.f32 %v3220_v6, %v1177_v19  ;;  %v1398_v11 = vpack.c.bf16 %v1378_v41, %v1376_v51  ;;  %v1222_v14 = vadd.f32 %v3220_v6, %v1179_v40  ;;  %v761_v58 = vmul.f32 %v729_v18, %v3725_v24 }
 0x20f   : > { %v763_v35 = vmul.f32 %v731_v29, %v3767_v21  ;;  %v3809_v42 = vadd.f32 %v3420_v62, %v3109_v47  ;;  %v3813_v57 = vadd.f32 %v3433_v13, %v3109_v47  ;;  %v1034_v7 = vmul.f32 %v3119_v52, %v3767_v21 }
 0x210   : > { %v1252_v8 = vmul.f32 %v1220_v45, %v3429_v53  ;;  %1612 = vmatmul.mubr.bf16.gmra.mrb[20].mxu1 %v1398_v11  ;;  %v954_v10 = vmul.f32 %v922_v44, %v3617_v22  ;;  %v886_v27 = vmul.f32 %v854_v63, %v3429_v53  ;;  %v1254_v30 = vmul.f32 %v1222_v14, %v3470_v2 }
 0x211   : > { %v1075_v49 = vadd.f32 %v3139_v61, %v1032_v34  ;;  %v985_v62 = vadd.f32 %v3229_v16, %v952_v46  ;;  %v888_v3 = vmul.f32 %v856_v25, %v3470_v2  ;;  %v1077_v13 = vadd.f32 %v3139_v61, %v1034_v7 }
 0x212   : > { %v1284_v47 = vand.u32 2147483647, %v1252_v8  ;;  %v1286_v59 = vand.u32 2147483647, %v1254_v30  ;;  %v794_v48 = vadd.f32 %v3156_v5, %v761_v58  ;;  %v796_v52 = vadd.f32 %v3156_v5, %v763_v35 }
 0x213   : > { %v1107_v22 = vmul.f32 %v1075_v49, %v3725_v24  ;;  %v1109_v33 = vmul.f32 %v1077_v13, %v3767_v21  ;;  %v695_v9 = vmul.f32 %v3124_v54, %v3809_v42  ;;  %v697_v17 = vmul.f32 %v3124_v54, %v3813_v57 }
 0x214   : > { %v1316_v23 = vadd.f32 1.0, %v1284_v47  ;;  %v987_v43 = vadd.f32 %v3229_v16, %v954_v10  ;;  %v919_v61 = vadd.f32 %v3217_v4, %v886_v27  ;;  %v1318_v12 = vadd.f32 1.0, %v1286_v59 }
 0x215   : > { %v2607_v1 = vpop.eup %2606  ;;  %v1150_v20 = vadd.f32 %v3172_v15, %v1107_v22  ;;  %v921_v31 = vadd.f32 %v3217_v4, %v888_v3  ;;  %v1152_v55 = vadd.f32 %v3172_v15, %v1109_v33  ;;  %v728_v32 = vadd.f32 %v3137_v60, %v695_v9 }
 0x216   : > { %v2609_v36 = vpop.eup %2608  ;;  %2610 = vrcp.f32 %v1316_v23  ;;  %v1381_v39 = vmul.f32 %v2607_v1, %v985_v62  ;;  %v826_v54 = vmul.f32 %v794_v48, %v3725_v24  ;;  %v828_v18 = vmul.f32 %v796_v52, %v3767_v21 }
 0x217   : > { %v1383_v38 = vmul.f32 %v2609_v36, %v987_v43  ;;  %2612 = vrcp.f32 %v1318_v12  ;;  %v1182_v28 = vmul.f32 %v1150_v20, %v3725_v24  ;;  %v1184_v44 = vmul.f32 %v1152_v55, %v3767_v21 }
 0x218   : > { %v730_v63 = vadd.f32 %v3137_v60, %v697_v17  ;;  %v760_v51 = vmul.f32 %v728_v32, %v3809_v42  ;;  %v1031_v15 = vmul.f32 %v3117_v50, %v3809_v42  ;;  %v951_v46 = vmul.f32 %v919_v61, %v3429_v53 }
 0x219   : > { %v1401_v19 = vpack.c.bf16 %v1383_v38, %v1381_v39  ;;  %v1225_v41 = vadd.f32 %v3199_v37, %v1182_v28  ;;  %v1227_v40 = vadd.f32 %v3199_v37, %v1184_v44  ;;  %v953_v25 = vmul.f32 %v921_v31, %v3470_v2 }
 0x21a   : > { %v762_v29 = vmul.f32 %v730_v63, %v3813_v57  ;;  %v1033_v60 = vmul.f32 %v3117_v50, %v3813_v57  ;;  %v1074_v45 = vadd.f32 %v3130_v56, %v1031_v15  ;;  %v859_v34 = vadd.f32 %v3187_v26, %v826_v54 }
 0x21b   : > { %1619 = vmatprep.mubr.bf16.mxu1 %v1401_v19  ;;  %v861_v11 = vadd.f32 %v3187_v26, %v828_v18  ;;  %v1257_v14 = vmul.f32 %v1225_v41, %v3725_v24  ;;  %v1259_v37 = vmul.f32 %v1227_v40, %v3767_v21  ;;  %v793_v58 = vadd.f32 %v3156_v5, %v760_v51 }
 0x21c   : > { %v1076_v35 = vadd.f32 %v3130_v56, %v1033_v60  ;;  %v1106_v53 = vmul.f32 %v1074_v45, %v3809_v42  ;;  %v795_v50 = vadd.f32 %v3156_v5, %v762_v29  ;;  %v984_v7 = vadd.f32 %v3229_v16, %v951_v46 }
 0x21d   : > { %v1289_v2 = vand.u32 2147483647, %v1257_v14  ;;  %v1291_v8 = vand.u32 2147483647, %v1259_v37  ;;  %v986_v10 = vadd.f32 %v3229_v16, %v953_v25  ;;  %v891_v62 = vmul.f32 %v859_v34, %v3725_v24 }
 0x21e   : > { %v1108_v27 = vmul.f32 %v1076_v35, %v3813_v57  ;;  %v1149_v30 = vadd.f32 %v3145_v0, %v1106_v53  ;;  %v893_v3 = vmul.f32 %v861_v11, %v3767_v21  ;;  %v825_v59 = vmul.f32 %v793_v58, %v3809_v42 }
 0x21f   : > { %v1321_v56 = vadd.f32 1.0, %v1289_v2  ;;  %v1323_v47 = vadd.f32 1.0, %v1291_v8  ;;  %v827_v23 = vmul.f32 %v795_v50, %v3813_v57  ;;  %v924_v1 = vadd.f32 %v3217_v4, %v891_v62  ;;  %v3910_v8 = vld [vmem:[%s4253_s7 + $0x2] ss:$0 sm:$0xff] }
 0x220   : > { %v2611_v49 = vpop.eup %2610  ;;  %v1151_v5 = vadd.f32 %v3145_v0, %v1108_v27  ;;  %v1181_v48 = vmul.f32 %v1149_v30, %v3809_v42  ;;  %v926_v43 = vadd.f32 %v3217_v4, %v893_v3  ;;  %v858_v12 = vadd.f32 %v3187_v26, %v825_v59 }
 0x221   : > { %v2613_v13 = vpop.eup %2612  ;;  %v1380_v52 = vmul.f32 %v2611_v49, %v984_v7  ;;  %2614 = vrcp.f32 %v1321_v56  ;;  %v860_v20 = vadd.f32 %v3187_v26, %v827_v23  ;;  %v956_v55 = vmul.f32 %v924_v1, %v3725_v24  ;;  %v3924_v56 = vld [vmem:[%s4253_s7 + $0x1] ss:$0 sm:$0xff] }
 0x222   : > { %v1382_v22 = vmul.f32 %v2613_v13, %v986_v10  ;;  %2616 = vrcp.f32 %v1323_v47  ;;  %v1183_v33 = vmul.f32 %v1151_v5, %v3813_v57  ;;  %v1224_v9 = vadd.f32 %v3220_v6, %v1181_v48 }
 0x223   : > { %v958_v32 = vmul.f32 %v926_v43, %v3767_v21  ;;  %v890_v54 = vmul.f32 %v858_v12, %v3809_v42  ;;  %v989_v44 = vadd.f32 %v3229_v16, %v956_v55  ;;  %v3904_v58 = vstv %s2271_s23 }
 0x224   : > { %v1400_v17 = vpack.c.bf16 %v1382_v22, %v1380_v52  ;;  %v1226_v61 = vadd.f32 %v3220_v6, %v1183_v33  ;;  %v1256_v0 = vmul.f32 %v1224_v9, %v3809_v42  ;;  %v892_v6 = vmul.f32 %v860_v20, %v3813_v57  ;;  %v3935_v9 = vld [vmem:[%s4253_s7] ss:$0 sm:$0xff] }
 0x225   : > { %v991_v26 = vadd.f32 %v3229_v16, %v958_v32  ;;  %v923_v24 = vadd.f32 %v3217_v4, %v890_v54  ;;  %v3912_v50 = vstv %s2270_s26  ;;  %v3926_v47 = vstv %s2269_s20  ;;  %s2267_s26 = sld [smem:[#allocation2 + $0x7]]  ;;  %s2098_s20 = sshll.u32 %s3973_s27, 4  ;;  %s4202_s20 = int_to_ptr.vmem [resolvable:$true] %s2098_s20 }
 0x226   : > { %1620 = vmatmul.mubr.bf16.gmra.mrb[24].mxu1 %v1400_v17  ;;  %v1258_v36 = vmul.f32 %v1226_v61, %v3813_v57  ;;  %v1288_v31 = vand.u32 2147483647, %v1256_v0  ;;  %v925_v21 = vadd.f32 %v3217_v4, %v892_v6  ;;  %v3897_v4 = vld [vmem:[%s4252_s6] ss:$0 sm:$0xff]  ;;  %p2760_p1 = scmp.lt.s32.totalorder %s4202_s20, %s2758_s11 }
 0x227   : > { %v955_v41 = vmul.f32 %v923_v24, %v3809_v42 }
 0x228   : > { %v1290_v39 = vand.u32 2147483647, %v1258_v36  ;;  %v1320_v38 = vadd.f32 1.0, %v1288_v31  ;;  %v957_v40 = vmul.f32 %v925_v21, %v3813_v57  ;;  %v3940_v36 = vstv %s2268_s25  ;;  %s2753_s25 = scalar_lea.vmem %s4202_s20, 1024 }
 0x229   : > { %v988_v46 = vadd.f32 %v3229_v16, %v955_v41  ;;  %p2754_p3 = scmp.ne.s32.totalorder %s4202_s20, %s2753_s25  ;;  %p2761_p4 = scmp.lt.s32.totalorder %s2759_s13, %s2753_s25 }
 0x22a   : > { %v1322_v18 = vadd.f32 1.0, %v1290_v39  ;;  %2618 = vrcp.f32 %v1320_v38  ;;  %v990_v25 = vadd.f32 %v3229_v16, %v957_v40  ;;  %v3902_v16 = vld [vmem:[%s4253_s7 + $0x3] ss:$0 sm:$0xff] }
 0x22b   : > { %v2615_v28 = vpop.eup %2614  ;;  %p2755_p5 = pnand %p2754_p3, %p3021_p7  ;;  %p2762_p6 = por %p2761_p4, %p2760_p1 }
 0x22c   : > { %v2617_v63 = vpop.eup %2616  ;;  %2620 = vrcp.f32 %v1322_v18  ;;  %v1385_v19 = vmul.f32 %v2615_v28, %v989_v44 }
 0x22d   : > { %v1387_v51 = vmul.f32 %v2617_v63, %v991_v26  ;;  %v3945_v63 = vstv %s2267_s26  ;;  %p2756_p9 = pneg %p2755_p5 }
 0x22f   : > { %v1403_v15 = vpack.c.bf16 %v1387_v51, %v1385_v19  ;;  %p2763_p12 = pnand %p2762_p6, %p2756_p9 }
 0x231   : > { %1627 = vmatprep.mubr.bf16.mxu1 %v1403_v15 }
 0x234   : > { %v2619_v29 = vpop.eup %2618 }
 0x235   : > { %v1384_v45 = vmul.f32 %v2619_v29, %v988_v46 }
 0x236   : > { %v2621_v60 = vpop.eup %2620 }
 0x237   : > { %v1386_v34 = vmul.f32 %v2621_v60, %v990_v25  ;;  %v3949_v25 = vstv %s2266_s14 }
 0x239   : > { %v1402_v11 = vpack.c.bf16 %v1386_v34, %v1384_v45 }
 0x23b   : > { %1628 = vmatmul.mubr.bf16.gmra.mrb[28].mxu1 %v1402_v11 }
 0x270   : > { %v2378_v14 = vpop.f32.mrb[0].mxu1 }
 0x271   : > { %v2379_v42 = vpop.f32.mrb[1].mxu1 }
 0x272   : > { %v2380_v57 = vadd.f32 %v2379_v42, %v2378_v14  ;;  %v2381_v37 = vpop.f32.mrb[2].mxu1 }
 0x273   : > { %v2382_v35 = vpop.f32.mrb[3].mxu1 }
 0x274   : > { %v1574_v53 = vadd.f32 %v2380_v57, %v3897_v4  ;;  %v2383_v2 = vadd.f32 %v2382_v35, %v2381_v37 }
 0x276   : > { %v1647_v7 = vmul.f32 %v3904_v58, %v1574_v53  ;;  %v1816_v10 = vmul.f32 %v3902_v16, %v1574_v53  ;;  %v1577_v27 = vadd.f32 %v2383_v2, %v3897_v4 }
 0x278   : > { %v1664_v30 = vadd.f32 %v3912_v50, %v1647_v7  ;;  %v1836_v49 = vadd.f32 %v3910_v8, %v1816_v10  ;;  %v1648_v62 = vmul.f32 %v3904_v58, %v1577_v27  ;;  %v1817_v3 = vmul.f32 %v3902_v16, %v1577_v27 }
 0x27a   : > { %v1680_v13 = vmul.f32 %v1664_v30, %v1574_v53  ;;  %v1852_v59 = vmul.f32 %v1836_v49, %v1574_v53  ;;  %v1665_v5 = vadd.f32 %v3912_v50, %v1648_v62  ;;  %v1837_v48 = vadd.f32 %v3910_v8, %v1817_v3 }
 0x27c   : > { %v1697_v52 = vadd.f32 %v3926_v47, %v1680_v13  ;;  %v1872_v22 = vadd.f32 %v3924_v56, %v1852_v59  ;;  %v1681_v23 = vmul.f32 %v1665_v5, %v1577_v27  ;;  %v1853_v33 = vmul.f32 %v1837_v48, %v1577_v27 }
 0x27e   : > { %v1888_v17 = vmul.f32 %v1872_v22, %v1574_v53  ;;  %v1698_v1 = vadd.f32 %v3926_v47, %v1681_v23  ;;  %v1873_v43 = vadd.f32 %v3924_v56, %v1853_v33  ;;  %v1713_v61 = vmul.f32 %v1697_v52, %v1574_v53 }
 0x280   : > { %v1908_v0 = vadd.f32 %v3935_v9, %v1888_v17  ;;  %v1714_v12 = vmul.f32 %v1698_v1, %v1577_v27  ;;  %v1889_v20 = vmul.f32 %v1873_v43, %v1577_v27  ;;  %v1730_v32 = vadd.f32 %v3940_v36, %v1713_v61 }
 0x282   : > { %v1924_v31 = vmul.f32 %v1908_v0, %v1574_v53  ;;  %v1909_v55 = vadd.f32 %v3935_v9, %v1889_v20  ;;  %v1731_v38 = vadd.f32 %v3940_v36, %v1714_v12  ;;  %v1746_v28 = vmul.f32 %v1730_v32, %v1574_v53 }
 0x284   : > { %v1940_v39 = vand.u32 2147483647, %v1924_v31  ;;  %v1925_v54 = vmul.f32 %v1909_v55, %v1577_v27  ;;  %v1747_v44 = vmul.f32 %v1731_v38, %v1577_v27  ;;  %v1763_v19 = vadd.f32 %v3945_v63, %v1746_v28 }
 0x286   : > { %v1956_v6 = vadd.f32 1.0, %v1940_v39  ;;  %v1941_v18 = vand.u32 2147483647, %v1925_v54  ;;  %v1764_v51 = vadd.f32 %v3945_v63, %v1747_v44  ;;  %v1779_v40 = vmul.f32 %v1763_v19, %v1574_v53 }
 0x288   : > { %v1957_v26 = vadd.f32 1.0, %v1941_v18  ;;  %2622 = vrcp.f32 %v1956_v6  ;;  %v1780_v29 = vmul.f32 %v1764_v51, %v1577_v27  ;;  %v1796_v37 = vadd.f32 %v3949_v25, %v1779_v40 }
 0x28a   : > { %2624 = vrcp.f32 %v1957_v26  ;;  %v1797_v35 = vadd.f32 %v3949_v25, %v1780_v29 }
 0x28d   : > { %v2384_v24 = vpop.f32.mrb[4].mxu1 }
 0x28e   : > { %v2385_v21 = vpop.f32.mrb[5].mxu1 }
 0x28f   : > { %v2386_v15 = vadd.f32 %v2385_v21, %v2384_v24  ;;  %v2387_v41 = vpop.f32.mrb[6].mxu1 }
 0x290   : > { %v2388_v46 = vpop.f32.mrb[7].mxu1 }
 0x291   : > { %v3952_v60 = vadd.f32 %v2386_v15, %v3897_v4  ;;  %v2389_v45 = vadd.f32 %v2388_v46, %v2387_v41 }
 0x292   : > { %v2623_v34 = vpop.eup %2622 }
 0x293   : > { %v1649_v11 = vmul.f32 %v3904_v58, %v3952_v60  ;;  %v1818_v14 = vmul.f32 %v3902_v16, %v3952_v60  ;;  %v1585_v42 = vadd.f32 %v2389_v45, %v3897_v4  ;;  %v1988_v27 = vmul.f32 %v2623_v34, %v1796_v37 }
 0x294   : > { %v2625_v57 = vpop.eup %2624 }
 0x295   : > { %v1666_v53 = vadd.f32 %v3912_v50, %v1649_v11  ;;  %v1838_v2 = vadd.f32 %v3910_v8, %v1818_v14  ;;  %v1650_v7 = vmul.f32 %v3904_v58, %v1585_v42  ;;  %v1819_v10 = vmul.f32 %v3902_v16, %v1585_v42 }
 0x296   : > { %v1989_v30 = vmul.f32 %v2625_v57, %v1797_v35 }
 0x297   : > { %v1682_v49 = vmul.f32 %v1666_v53, %v3952_v60  ;;  %v1854_v62 = vmul.f32 %v1838_v2, %v3952_v60  ;;  %v1667_v3 = vadd.f32 %v3912_v50, %v1650_v7  ;;  %v1839_v13 = vadd.f32 %v3910_v8, %v1819_v10 }
 0x298   : > { %v2318_v59 = vpack.c.bf16 %v1989_v30, %v1988_v27 }
 0x299   : > { %v1699_v5 = vadd.f32 %v3926_v47, %v1682_v49  ;;  %v1874_v48 = vadd.f32 %v3924_v56, %v1854_v62  ;;  %v1683_v52 = vmul.f32 %v1667_v3, %v1585_v42  ;;  %v1855_v22 = vmul.f32 %v1839_v13, %v1585_v42 }
 0x29a   : > { %2319 = vst [vmem:[%s3973_s27] sm:$0xff] %v2318_v59  }
 0x29b   : > { %v1890_v23 = vmul.f32 %v1874_v48, %v3952_v60  ;;  %v1700_v33 = vadd.f32 %v3926_v47, %v1683_v52  ;;  %v1875_v17 = vadd.f32 %v3924_v56, %v1855_v22  ;;  %v1715_v1 = vmul.f32 %v1699_v5, %v3952_v60 }
 0x29d   : > { %v1910_v43 = vadd.f32 %v3935_v9, %v1890_v23  ;;  %v1716_v61 = vmul.f32 %v1700_v33, %v1585_v42  ;;  %v1891_v0 = vmul.f32 %v1875_v17, %v1585_v42  ;;  %v1732_v31 = vadd.f32 %v3940_v36, %v1715_v1 }
 0x29f   : > { %v1926_v12 = vmul.f32 %v1910_v43, %v3952_v60  ;;  %v1911_v20 = vadd.f32 %v3935_v9, %v1891_v0  ;;  %v1733_v32 = vadd.f32 %v3940_v36, %v1716_v61  ;;  %v1748_v19 = vmul.f32 %v1732_v31, %v3952_v60 }
 0x2a1   : > { %v1942_v55 = vand.u32 2147483647, %v1926_v12  ;;  %v1927_v39 = vmul.f32 %v1911_v20, %v1585_v42  ;;  %v2390_v38 = vpop.f32.mrb[8].mxu1  ;;  %v1749_v51 = vmul.f32 %v1733_v32, %v1585_v42  ;;  %v1765_v46 = vadd.f32 %v3945_v63, %v1748_v19 }
 0x2a2   : > { %v2391_v54 = vpop.f32.mrb[9].mxu1 }
 0x2a3   : > { %v1958_v6 = vadd.f32 1.0, %v1942_v55  ;;  %v1943_v18 = vand.u32 2147483647, %v1927_v39  ;;  %v2393_v28 = vpop.f32.mrb[10].mxu1  ;;  %v2392_v44 = vadd.f32 %v2391_v54, %v2390_v38  ;;  %v1766_v45 = vadd.f32 %v3945_v63, %v1749_v51 }
 0x2a4   : > { %v2394_v26 = vpop.f32.mrb[11].mxu1  ;;  %v1781_v7 = vmul.f32 %v1765_v46, %v3952_v60 }
 0x2a5   : > { %v1959_v24 = vadd.f32 1.0, %v1943_v18  ;;  %2626 = vrcp.f32 %v1958_v6  ;;  %v3987_v21 = vadd.f32 %v2392_v44, %v3897_v4  ;;  %v2395_v15 = vadd.f32 %v2394_v26, %v2393_v28 }
 0x2a6   : > { %v1782_v10 = vmul.f32 %v1766_v45, %v1585_v42  ;;  %v1798_v52 = vadd.f32 %v3949_v25, %v1781_v7 }
 0x2a7   : > { %2628 = vrcp.f32 %v1959_v24  ;;  %v1651_v41 = vmul.f32 %v3904_v58, %v3987_v21  ;;  %v1820_v40 = vmul.f32 %v3902_v16, %v3987_v21  ;;  %v3994_v29 = vadd.f32 %v2395_v15, %v3897_v4 }
 0x2a8   : > { %v1799_v60 = vadd.f32 %v3949_v25, %v1782_v10 }
 0x2a9   : > { %v1668_v34 = vadd.f32 %v3912_v50, %v1651_v41  ;;  %v1840_v11 = vadd.f32 %v3910_v8, %v1820_v40  ;;  %v1652_v14 = vmul.f32 %v3904_v58, %v3994_v29  ;;  %v1821_v57 = vmul.f32 %v3902_v16, %v3994_v29 }
 0x2ab   : > { %v1684_v37 = vmul.f32 %v1668_v34, %v3987_v21  ;;  %v1856_v35 = vmul.f32 %v1840_v11, %v3987_v21  ;;  %v1669_v53 = vadd.f32 %v3912_v50, %v1652_v14  ;;  %v1841_v2 = vadd.f32 %v3910_v8, %v1821_v57 }
 0x2ad   : > { %v1701_v27 = vadd.f32 %v3926_v47, %v1684_v37  ;;  %v1876_v30 = vadd.f32 %v3924_v56, %v1856_v35  ;;  %v1685_v49 = vmul.f32 %v1669_v53, %v3994_v29  ;;  %v1857_v62 = vmul.f32 %v1841_v2, %v3994_v29 }
 0x2af   : > { %v2627_v3 = vpop.eup %2626  ;;  %v1892_v13 = vmul.f32 %v1876_v30, %v3987_v21  ;;  %v1702_v59 = vadd.f32 %v3926_v47, %v1685_v49  ;;  %v1877_v5 = vadd.f32 %v3924_v56, %v1857_v62  ;;  %v1717_v42 = vmul.f32 %v1701_v27, %v3987_v21 }
 0x2b0   : > { %v1990_v17 = vmul.f32 %v2627_v3, %v1798_v52 }
 0x2b1   : > { %v2629_v48 = vpop.eup %2628  ;;  %v1912_v22 = vadd.f32 %v3935_v9, %v1892_v13  ;;  %v1718_v23 = vmul.f32 %v1702_v59, %v3994_v29  ;;  %v1893_v33 = vmul.f32 %v1877_v5, %v3994_v29  ;;  %v1734_v12 = vadd.f32 %v3940_v36, %v1717_v42 }
 0x2b2   : > { %v1991_v1 = vmul.f32 %v2629_v48, %v1799_v60 }
 0x2b3   : > { %v1928_v43 = vmul.f32 %v1912_v22, %v3987_v21  ;;  %v1913_v61 = vadd.f32 %v3935_v9, %v1893_v33  ;;  %v1735_v31 = vadd.f32 %v3940_v36, %v1718_v23  ;;  %v1750_v44 = vmul.f32 %v1734_v12, %v3987_v21 }
 0x2b4   : > { %v2323_v0 = vpack.c.bf16 %v1991_v1, %v1990_v17 }
 0x2b5   : > { %v1944_v20 = vand.u32 2147483647, %v1928_v43  ;;  %v1929_v55 = vmul.f32 %v1913_v61, %v3994_v29  ;;  %v1751_v26 = vmul.f32 %v1735_v31, %v3994_v29  ;;  %v1767_v46 = vadd.f32 %v3945_v63, %v1750_v44 }
 0x2b6   : > { %2355 = vst [vmem:[%s3973_s27 + $0x8] sm:$0xff] %v2323_v0  }
 0x2b7   : > { %v2396_v32 = vpop.f32.mrb[12].mxu1  ;;  %v1960_v38 = vadd.f32 1.0, %v1944_v20  ;;  %v1945_v54 = vand.u32 2147483647, %v1929_v55  ;;  %v1768_v45 = vadd.f32 %v3945_v63, %v1751_v26  ;;  %v1783_v7 = vmul.f32 %v1767_v46, %v3987_v21 }
 0x2b8   : > { %v2397_v39 = vpop.f32.mrb[13].mxu1 }
 0x2b9   : > { %v2399_v6 = vpop.f32.mrb[14].mxu1  ;;  %v2398_v18 = vadd.f32 %v2397_v39, %v2396_v32  ;;  %v1961_v19 = vadd.f32 1.0, %v1945_v54  ;;  %2630 = vrcp.f32 %v1960_v38  ;;  %v1784_v10 = vmul.f32 %v1768_v45, %v3994_v29 }
 0x2ba   : > { %v2400_v28 = vpop.f32.mrb[15].mxu1  ;;  %v1800_v52 = vadd.f32 %v3949_v25, %v1783_v7 }
 0x2bb   : > { %v4031_v51 = vadd.f32 %v2398_v18, %v3897_v4  ;;  %v2401_v24 = vadd.f32 %v2400_v28, %v2399_v6  ;;  %2632 = vrcp.f32 %v1961_v19  ;;  %v1801_v21 = vadd.f32 %v3949_v25, %v1784_v10 }
 0x2bd   : > { %v1653_v15 = vmul.f32 %v3904_v58, %v4031_v51  ;;  %v1822_v41 = vmul.f32 %v3902_v16, %v4031_v51  ;;  %v1601_v40 = vadd.f32 %v2401_v24, %v3897_v4 }
 0x2bf   : > { %v1670_v34 = vadd.f32 %v3912_v50, %v1653_v15  ;;  %v1842_v11 = vadd.f32 %v3910_v8, %v1822_v41  ;;  %v1654_v14 = vmul.f32 %v3904_v58, %v1601_v40  ;;  %v1823_v57 = vmul.f32 %v3902_v16, %v1601_v40 }
 0x2c1   : > { %v1686_v37 = vmul.f32 %v1670_v34, %v4031_v51  ;;  %v1858_v35 = vmul.f32 %v1842_v11, %v4031_v51  ;;  %v1671_v53 = vadd.f32 %v3912_v50, %v1654_v14  ;;  %v1843_v2 = vadd.f32 %v3910_v8, %v1823_v57 }
 0x2c3   : > { %v1703_v27 = vadd.f32 %v3926_v47, %v1686_v37  ;;  %v1878_v30 = vadd.f32 %v3924_v56, %v1858_v35  ;;  %v1687_v49 = vmul.f32 %v1671_v53, %v1601_v40  ;;  %v1859_v62 = vmul.f32 %v1843_v2, %v1601_v40  ;;  %v2631_v3 = vpop.eup %2630 }
 0x2c4   : > { %v1992_v23 = vmul.f32 %v2631_v3, %v1800_v52 }
 0x2c5   : > { %v1894_v13 = vmul.f32 %v1878_v30, %v4031_v51  ;;  %v1704_v59 = vadd.f32 %v3926_v47, %v1687_v49  ;;  %v1879_v5 = vadd.f32 %v3924_v56, %v1859_v62  ;;  %v2633_v48 = vpop.eup %2632  ;;  %v1719_v29 = vmul.f32 %v1703_v27, %v4031_v51 }
 0x2c6   : > { %v1993_v33 = vmul.f32 %v2633_v48, %v1801_v21 }
 0x2c7   : > { %v1914_v60 = vadd.f32 %v3935_v9, %v1894_v13  ;;  %v1720_v42 = vmul.f32 %v1704_v59, %v1601_v40  ;;  %v1895_v22 = vmul.f32 %v1879_v5, %v1601_v40  ;;  %v1736_v43 = vadd.f32 %v3940_v36, %v1719_v29 }
 0x2c8   : > { %v2328_v0 = vpack.c.bf16 %v1993_v33, %v1992_v23 }
 0x2c9   : > { %v1930_v17 = vmul.f32 %v1914_v60, %v4031_v51  ;;  %v1915_v1 = vadd.f32 %v3935_v9, %v1895_v22  ;;  %v1737_v61 = vadd.f32 %v3940_v36, %v1720_v42  ;;  %v1752_v39 = vmul.f32 %v1736_v43, %v4031_v51 }
 0x2ca   : > { %2356 = vst [vmem:[%s3973_s27 + $0x10] sm:$0xff] %v2328_v0  }
 0x2cb   : > { %v1946_v12 = vand.u32 2147483647, %v1930_v17  ;;  %v1931_v20 = vmul.f32 %v1915_v1, %v1601_v40  ;;  %v1753_v38 = vmul.f32 %v1737_v61, %v1601_v40  ;;  %v1769_v19 = vadd.f32 %v3945_v63, %v1752_v39 }
 0x2cd   : > { %v1962_v31 = vadd.f32 1.0, %v1946_v12  ;;  %v1947_v55 = vand.u32 2147483647, %v1931_v20  ;;  %v2402_v32 = vpop.f32.mrb[16].mxu1  ;;  %v1770_v24 = vadd.f32 %v3945_v63, %v1753_v38  ;;  %v1785_v14 = vmul.f32 %v1769_v19, %v4031_v51 }
 0x2ce   : > { %v2403_v54 = vpop.f32.mrb[17].mxu1 }
 0x2cf   : > { %2634 = vrcp.f32 %v1962_v31  ;;  %v1963_v6 = vadd.f32 1.0, %v1947_v55  ;;  %v2405_v18 = vpop.f32.mrb[18].mxu1  ;;  %v2404_v28 = vadd.f32 %v2403_v54, %v2402_v32  ;;  %v1786_v57 = vmul.f32 %v1770_v24, %v1601_v40 }
 0x2d0   : > { %v2406_v44 = vpop.f32.mrb[19].mxu1  ;;  %v1802_v62 = vadd.f32 %v3949_v25, %v1785_v14 }
 0x2d1   : > { %2636 = vrcp.f32 %v1963_v6  ;;  %v2407_v26 = vadd.f32 %v2406_v44, %v2405_v18  ;;  %v1606_v15 = vadd.f32 %v2404_v28, %v3897_v4  ;;  %v1803_v3 = vadd.f32 %v3949_v25, %v1786_v57 }
 0x2d3   : > { %v1609_v41 = vadd.f32 %v2407_v26, %v3897_v4  ;;  %v1655_v46 = vmul.f32 %v3904_v58, %v1606_v15  ;;  %v1824_v45 = vmul.f32 %v3902_v16, %v1606_v15 }
 0x2d5   : > { %v1656_v34 = vmul.f32 %v3904_v58, %v1609_v41  ;;  %v1825_v11 = vmul.f32 %v3902_v16, %v1609_v41  ;;  %v1672_v37 = vadd.f32 %v3912_v50, %v1655_v46  ;;  %v1844_v35 = vadd.f32 %v3910_v8, %v1824_v45 }
 0x2d7   : > { %v1673_v53 = vadd.f32 %v3912_v50, %v1656_v34  ;;  %v1845_v2 = vadd.f32 %v3910_v8, %v1825_v11  ;;  %v1688_v7 = vmul.f32 %v1672_v37, %v1606_v15  ;;  %v1860_v10 = vmul.f32 %v1844_v35, %v1606_v15 }
 0x2d9   : > { %v2635_v27 = vpop.eup %2634  ;;  %v1689_v30 = vmul.f32 %v1673_v53, %v1609_v41  ;;  %v1861_v49 = vmul.f32 %v1845_v2, %v1609_v41  ;;  %v1705_v51 = vadd.f32 %v3926_v47, %v1688_v7  ;;  %v1880_v40 = vadd.f32 %v3924_v56, %v1860_v10 }
 0x2da   : > { %v1994_v21 = vmul.f32 %v2635_v27, %v1802_v62 }
 0x2db   : > { %v2637_v13 = vpop.eup %2636  ;;  %v1706_v59 = vadd.f32 %v3926_v47, %v1689_v30  ;;  %v1881_v5 = vadd.f32 %v3924_v56, %v1861_v49  ;;  %v1721_v48 = vmul.f32 %v1705_v51, %v1606_v15  ;;  %v1896_v52 = vmul.f32 %v1880_v40, %v1606_v15 }
 0x2dc   : > { %v1995_v29 = vmul.f32 %v2637_v13, %v1803_v3 }
 0x2dd   : > { %v1722_v60 = vmul.f32 %v1706_v59, %v1609_v41  ;;  %v1897_v42 = vmul.f32 %v1881_v5, %v1609_v41  ;;  %v1916_v22 = vadd.f32 %v3935_v9, %v1896_v52  ;;  %v1738_v17 = vadd.f32 %v3940_v36, %v1721_v48 }
 0x2de   : > { %v2333_v23 = vpack.c.bf16 %v1995_v29, %v1994_v21 }
 0x2df   : > { %v1917_v33 = vadd.f32 %v3935_v9, %v1897_v42  ;;  %v1932_v1 = vmul.f32 %v1916_v22, %v1606_v15  ;;  %v1739_v43 = vadd.f32 %v3940_v36, %v1722_v60  ;;  %v1754_v31 = vmul.f32 %v1738_v17, %v1606_v15 }
 0x2e0   : > { %2357 = vst [vmem:[%s3973_s27 + $0x18] sm:$0xff] %v2333_v23  }
 0x2e1   : > { %v1933_v61 = vmul.f32 %v1917_v33, %v1609_v41  ;;  %v1948_v0 = vand.u32 2147483647, %v1932_v1  ;;  %v1755_v32 = vmul.f32 %v1739_v43, %v1609_v41  ;;  %v1771_v26 = vadd.f32 %v3945_v63, %v1754_v31 }
 0x2e3   : > { %v1949_v12 = vand.u32 2147483647, %v1933_v61  ;;  %v2408_v20 = vpop.f32.mrb[20].mxu1  ;;  %v1964_v55 = vadd.f32 1.0, %v1948_v0  ;;  %v1772_v19 = vadd.f32 %v3945_v63, %v1755_v32  ;;  %v1787_v37 = vmul.f32 %v1771_v26, %v1606_v15 }
 0x2e4   : > { %v2409_v39 = vpop.f32.mrb[21].mxu1 }
 0x2e5   : > { %v1965_v38 = vadd.f32 1.0, %v1949_v12  ;;  %v2410_v54 = vadd.f32 %v2409_v39, %v2408_v20  ;;  %v2411_v6 = vpop.f32.mrb[22].mxu1  ;;  %2638 = vrcp.f32 %v1964_v55  ;;  %v1788_v35 = vmul.f32 %v1772_v19, %v1609_v41 }
 0x2e6   : > { %v2412_v18 = vpop.f32.mrb[23].mxu1  ;;  %v1804_v15 = vadd.f32 %v3949_v25, %v1787_v37 }
 0x2e7   : > { %2640 = vrcp.f32 %v1965_v38  ;;  %v4090_v28 = vadd.f32 %v2410_v54, %v3897_v4  ;;  %v2413_v44 = vadd.f32 %v2412_v18, %v2411_v6  ;;  %v1805_v41 = vadd.f32 %v3949_v25, %v1788_v35 }
 0x2e9   : > { %v1657_v24 = vmul.f32 %v3904_v58, %v4090_v28  ;;  %v1826_v46 = vmul.f32 %v3902_v16, %v4090_v28  ;;  %v4099_v45 = vadd.f32 %v2413_v44, %v3897_v4 }
 0x2eb   : > { %v1674_v34 = vadd.f32 %v3912_v50, %v1657_v24  ;;  %v1846_v11 = vadd.f32 %v3910_v8, %v1826_v46  ;;  %v1658_v14 = vmul.f32 %v3904_v58, %v4099_v45  ;;  %v1827_v57 = vmul.f32 %v3902_v16, %v4099_v45 }
 0x2ed   : > { %v1690_v53 = vmul.f32 %v1674_v34, %v4090_v28  ;;  %v1862_v2 = vmul.f32 %v1846_v11, %v4090_v28  ;;  %v1675_v7 = vadd.f32 %v3912_v50, %v1658_v14  ;;  %v1847_v10 = vadd.f32 %v3910_v8, %v1827_v57 }
 0x2ef   : > { %v1707_v27 = vadd.f32 %v3926_v47, %v1690_v53  ;;  %v1882_v30 = vadd.f32 %v3924_v56, %v1862_v2  ;;  %v1691_v49 = vmul.f32 %v1675_v7, %v4099_v45  ;;  %v1863_v62 = vmul.f32 %v1847_v10, %v4099_v45  ;;  %v2639_v3 = vpop.eup %2638 }
 0x2f0   : > { %v1996_v5 = vmul.f32 %v2639_v3, %v1804_v15 }
 0x2f1   : > { %v2641_v51 = vpop.eup %2640  ;;  %v1898_v40 = vmul.f32 %v1882_v30, %v4090_v28  ;;  %v1708_v13 = vadd.f32 %v3926_v47, %v1691_v49  ;;  %v1883_v59 = vadd.f32 %v3924_v56, %v1863_v62  ;;  %v1723_v52 = vmul.f32 %v1707_v27, %v4090_v28 }
 0x2f2   : > { %v1997_v48 = vmul.f32 %v2641_v51, %v1805_v41 }
 0x2f3   : > { %v1918_v21 = vadd.f32 %v3935_v9, %v1898_v40  ;;  %v1724_v29 = vmul.f32 %v1708_v13, %v4099_v45  ;;  %v1899_v60 = vmul.f32 %v1883_v59, %v4099_v45  ;;  %v1740_v33 = vadd.f32 %v3940_v36, %v1723_v52 }
 0x2f4   : > { %v2338_v42 = vpack.c.bf16 %v1997_v48, %v1996_v5 }
 0x2f5   : > { %v1934_v22 = vmul.f32 %v1918_v21, %v4090_v28  ;;  %v1919_v23 = vadd.f32 %v3935_v9, %v1899_v60  ;;  %v1741_v1 = vadd.f32 %v3940_v36, %v1724_v29  ;;  %v1756_v32 = vmul.f32 %v1740_v33, %v4090_v28 }
 0x2f6   : > { %2358 = vst [vmem:[%s3973_s27 + $0x20] sm:$0xff] %v2338_v42  }
 0x2f7   : > { %v1950_v17 = vand.u32 2147483647, %v1934_v22  ;;  %v1935_v43 = vmul.f32 %v1919_v23, %v4099_v45  ;;  %v1757_v39 = vmul.f32 %v1741_v1, %v4099_v45  ;;  %v1773_v24 = vadd.f32 %v3945_v63, %v1756_v32 }
 0x2f9   : > { %v2414_v61 = vpop.f32.mrb[24].mxu1  ;;  %v1966_v0 = vadd.f32 1.0, %v1950_v17  ;;  %v1951_v12 = vand.u32 2147483647, %v1935_v43  ;;  %v1774_v46 = vadd.f32 %v3945_v63, %v1757_v39  ;;  %v1789_v7 = vmul.f32 %v1773_v24, %v4090_v28 }
 0x2fa   : > { %v2415_v20 = vpop.f32.mrb[25].mxu1 }
 0x2fb   : > { %v2416_v31 = vadd.f32 %v2415_v20, %v2414_v61  ;;  %v2417_v55 = vpop.f32.mrb[26].mxu1  ;;  %v1967_v38 = vadd.f32 1.0, %v1951_v12  ;;  %2642 = vrcp.f32 %v1966_v0  ;;  %v1790_v10 = vmul.f32 %v1774_v46, %v4099_v45 }
 0x2fc   : > { %v2418_v54 = vpop.f32.mrb[27].mxu1  ;;  %v1806_v13 = vadd.f32 %v3949_v25, %v1789_v7 }
 0x2fd   : > { %v4133_v6 = vadd.f32 %v2416_v31, %v3897_v4  ;;  %v2419_v18 = vadd.f32 %v2418_v54, %v2417_v55  ;;  %2644 = vrcp.f32 %v1967_v38  ;;  %v1807_v28 = vadd.f32 %v3949_v25, %v1790_v10 }
 0x2ff   : > { %v1659_v44 = vmul.f32 %v3904_v58, %v4133_v6  ;;  %v1828_v26 = vmul.f32 %v3902_v16, %v4133_v6  ;;  %v1625_v19 = vadd.f32 %v2419_v18, %v3897_v4 }
 0x301   : > { %v1676_v34 = vadd.f32 %v3912_v50, %v1659_v44  ;;  %v1848_v11 = vadd.f32 %v3910_v8, %v1828_v26  ;;  %v1660_v14 = vmul.f32 %v3904_v58, %v1625_v19  ;;  %v1829_v57 = vmul.f32 %v3902_v16, %v1625_v19 }
 0x303   : > { %v1692_v37 = vmul.f32 %v1676_v34, %v4133_v6  ;;  %v1864_v35 = vmul.f32 %v1848_v11, %v4133_v6  ;;  %v1677_v53 = vadd.f32 %v3912_v50, %v1660_v14  ;;  %v1849_v2 = vadd.f32 %v3910_v8, %v1829_v57 }
 0x305   : > { %v1709_v27 = vadd.f32 %v3926_v47, %v1692_v37  ;;  %v1884_v30 = vadd.f32 %v3924_v56, %v1864_v35  ;;  %v1693_v49 = vmul.f32 %v1677_v53, %v1625_v19  ;;  %v1865_v62 = vmul.f32 %v1849_v2, %v1625_v19  ;;  %v2643_v3 = vpop.eup %2642 }
 0x306   : > { %v1998_v52 = vmul.f32 %v2643_v3, %v1806_v13 }
 0x307   : > { %v1900_v15 = vmul.f32 %v1884_v30, %v4133_v6  ;;  %v1710_v41 = vadd.f32 %v3926_v47, %v1693_v49  ;;  %v1885_v51 = vadd.f32 %v3924_v56, %v1865_v62  ;;  %v2645_v40 = vpop.eup %2644  ;;  %v1725_v45 = vmul.f32 %v1709_v27, %v4133_v6 }
 0x308   : > { %v1999_v21 = vmul.f32 %v2645_v40, %v1807_v28 }
 0x309   : > { %v1920_v59 = vadd.f32 %v3935_v9, %v1900_v15  ;;  %v1726_v5 = vmul.f32 %v1710_v41, %v1625_v19  ;;  %v1901_v48 = vmul.f32 %v1885_v51, %v1625_v19  ;;  %v1742_v42 = vadd.f32 %v3940_v36, %v1725_v45 }
 0x30a   : > { %v2343_v23 = vpack.c.bf16 %v1999_v21, %v1998_v52 }
 0x30b   : > { %v1936_v29 = vmul.f32 %v1920_v59, %v4133_v6  ;;  %v1921_v60 = vadd.f32 %v3935_v9, %v1901_v48  ;;  %v1743_v22 = vadd.f32 %v3940_v36, %v1726_v5  ;;  %v1758_v0 = vmul.f32 %v1742_v42, %v4133_v6 }
 0x30c   : > { %2359 = vst [vmem:[%s3973_s27 + $0x28] sm:$0xff] %v2343_v23  }
 0x30d   : > { %v1952_v33 = vand.u32 2147483647, %v1936_v29  ;;  %v1937_v17 = vmul.f32 %v1921_v60, %v1625_v19  ;;  %v1759_v12 = vmul.f32 %v1743_v22, %v1625_v19  ;;  %v1775_v54 = vadd.f32 %v3945_v63, %v1758_v0 }
 0x30e   : > { %v2420_v61 = vpop.f32.mrb[28].mxu1 }
 0x30f   : > { %v1968_v1 = vadd.f32 1.0, %v1952_v33  ;;  %v1953_v43 = vand.u32 2147483647, %v1937_v17  ;;  %v2421_v20 = vpop.f32.mrb[29].mxu1  ;;  %v1776_v18 = vadd.f32 %v3945_v63, %v1759_v12  ;;  %v1791_v14 = vmul.f32 %v1775_v54, %v4133_v6 }
 0x310   : > { %v2423_v55 = vpop.f32.mrb[30].mxu1  ;;  %v2422_v32 = vadd.f32 %v2421_v20, %v2420_v61 }
 0x311   : > { %2646 = vrcp.f32 %v1968_v1  ;;  %v1969_v31 = vadd.f32 1.0, %v1953_v43  ;;  %v2424_v39 = vpop.f32.mrb[31].mxu1  ;;  %v1792_v57 = vmul.f32 %v1776_v18, %v1625_v19 }
 0x312   : > { %v2425_v38 = vadd.f32 %v2424_v39, %v2423_v55  ;;  %v1630_v44 = vadd.f32 %v2422_v32, %v3897_v4 }
 0x313   : > { %2648 = vrcp.f32 %v1969_v31 }
 0x314   : > { %v1633_v26 = vadd.f32 %v2425_v38, %v3897_v4  ;;  %v1661_v24 = vmul.f32 %v3904_v58, %v1630_v44  ;;  %v1830_v46 = vmul.f32 %v3902_v16, %v1630_v44 }
 0x316   : > { %v1662_v34 = vmul.f32 %v3904_v58, %v1633_v26  ;;  %v1831_v11 = vmul.f32 %v3902_v16, %v1633_v26  ;;  %v1678_v37 = vadd.f32 %v3912_v50, %v1661_v24  ;;  %v1850_v35 = vadd.f32 %v3910_v8, %v1830_v46 }
 0x317   : > { %v1808_v58 = vadd.f32 %v3949_v25, %v1791_v14  ;;  %v1809_v16 = vadd.f32 %v3949_v25, %v1792_v57 }
 0x318   : > { %v1679_v53 = vadd.f32 %v3912_v50, %v1662_v34  ;;  %v1851_v2 = vadd.f32 %v3910_v8, %v1831_v11  ;;  %v1694_v4 = vmul.f32 %v1678_v37, %v1630_v44  ;;  %v1866_v7 = vmul.f32 %v1850_v35, %v1630_v44 }
 0x31a   : > { %v1695_v27 = vmul.f32 %v1679_v53, %v1633_v26  ;;  %v1867_v30 = vmul.f32 %v1851_v2, %v1633_v26  ;;  %v1711_v6 = vadd.f32 %v3926_v47, %v1694_v4  ;;  %v1886_v19 = vadd.f32 %v3924_v56, %v1866_v7 }
 0x31b   : > { %v2647_v10 = vpop.eup %2646 }
 0x31c   : > { %v1712_v62 = vadd.f32 %v3926_v47, %v1695_v27  ;;  %v1887_v50 = vadd.f32 %v3924_v56, %v1867_v30  ;;  %v1727_v8 = vmul.f32 %v1711_v6, %v1630_v44  ;;  %v1902_v3 = vmul.f32 %v1886_v19, %v1630_v44 }
 0x31d   : > { %v2649_v49 = vpop.eup %2648  ;;  %v2000_v15 = vmul.f32 %v2647_v10, %v1808_v58 }
 0x31e   : > { %v2001_v41 = vmul.f32 %v2649_v49, %v1809_v16  ;;  %v1728_v51 = vmul.f32 %v1712_v62, %v1633_v26  ;;  %v1903_v40 = vmul.f32 %v1887_v50, %v1633_v26  ;;  %v1922_v13 = vadd.f32 %v3935_v9, %v1902_v3 }
 0x31f   : > { %v1744_v59 = vadd.f32 %v3940_v36, %v1727_v8 }
 0x320   : > { %v2348_v28 = vpack.c.bf16 %v2001_v41, %v2000_v15  ;;  %v1923_v45 = vadd.f32 %v3935_v9, %v1903_v40  ;;  %v1938_v5 = vmul.f32 %v1922_v13, %v1630_v44  ;;  %v1745_v48 = vadd.f32 %v3940_v36, %v1728_v51 }
 0x321   : > { %v1760_v21 = vmul.f32 %v1744_v59, %v1630_v44 }
 0x322   : > { %2360 = vst [vmem:[%s3973_s27 + $0x30] sm:$0xff] %v2348_v28   ;;  %v1939_v47 = vmul.f32 %v1923_v45, %v1633_v26  ;;  %v1954_v56 = vand.u32 2147483647, %v1938_v5  ;;  %v1761_v60 = vmul.f32 %v1745_v48, %v1633_v26 }
 0x323   : > { %v1777_v9 = vadd.f32 %v3945_v63, %v1760_v21 }
 0x324   : > { %v1955_v52 = vand.u32 2147483647, %v1939_v47  ;;  %v1970_v29 = vadd.f32 1.0, %v1954_v56  ;;  %v1778_v22 = vadd.f32 %v3945_v63, %v1761_v60 }
 0x325   : > { %v1793_v23 = vmul.f32 %v1777_v9, %v1630_v44 }
 0x326   : > { %v1971_v42 = vadd.f32 1.0, %v1955_v52  ;;  %2650 = vrcp.f32 %v1970_v29  ;;  %v1794_v36 = vmul.f32 %v1778_v22, %v1633_v26 }
 0x327   : > { %v1810_v17 = vadd.f32 %v3949_v25, %v1793_v23 }
 0x328   : > { %2652 = vrcp.f32 %v1971_v42  ;;  %v1811_v1 = vadd.f32 %v3949_v25, %v1794_v36 }
 0x330   : > { %v2651_v33 = vpop.eup %2650 }
 0x331   : > { %v2002_v61 = vmul.f32 %v2651_v33, %v1810_v17 }
 0x332   : > { %v2653_v43 = vpop.eup %2652 }
 0x333   : > { %v2003_v0 = vmul.f32 %v2653_v43, %v1811_v1 }
 0x335   : > { %v2353_v63 = vpack.c.bf16 %v2003_v0, %v2002_v61 }
 0x337   : > { %2361 = vst [vmem:[%s3973_s27 + $0x38] sm:$0xff] %v2353_v63  }
 0x338   : > { %2766 = shalt.err (!%p2763_p12)
}
 0x339   : > { %s2767_s24 = scalar_lea.hbm %s4200_s12, 1024  ;;  %s2771_s14 = scalar_lea.hbm %s4254_s8, 4096 }
 0x33a   : > { %p2768_p11 = scmp.ne.s32.totalorder %s4200_s12, %s2767_s24  ;;  %p2772_p10 = scmp.lt.u32.totalorder %s4200_s12, %s4254_s8 }
 0x33b   : > { %p2773_p13 = scmp.lt.u32.totalorder %s2771_s14, %s2767_s24  ;;  %p2775_p3 = scmp.lt.u32.totalorder %s2767_s24, %s4200_s12 }
 0x33c   : > { %p2769_p2 = pnand %p2768_p11, %p3021_p7 }
 0x33d   : > { %p2774_p0 = por %p2773_p13, %p2772_p10 }
 0x33e   : > { %p2770_p8 = pneg %p2769_p2 }
 0x33f   : > { %p2776_p5 = por %p2775_p3, %p2774_p0 }
 0x341   : > { %p2777_p9 = pnand %p2776_p5, %p2770_p8 }
 0x343   : > { %2780 = shalt.err (!%p2777_p9)
}
 0x344   : > { %s2839_s21 = smov 64   ;;  %s2840_s18 = smov 4  }
 0x345   : > { %2440 = dma.vmem_to_hbm [thread:$0]  (%p3021_p7), %s4202_s20, 1024, %s4200_s12, %s2085_s22, %s2839_s21, %s2839_s21, %s2840_s18  }
 0x346 PF: > { %s4276_s25 = sld [smem:[#allocation15_spill]]  ;;  %s4277_s9 = sld [smem:[#allocation16_spill]] }
 0x347   : > { %p2467_p1 = scmp.ge.s32.totalorder %s2827_s30, 2 }
 0x34c   : > { %s2113_s11 = sand.u32 1, %s4276_s25   ;;  %p4278_p4 = scmp.ne.s32.totalorder %s4277_s9, 0 }
 0x34d   : > { %s2114_s13 = scalar_lea.sflag [#allocation4], %s2113_s11 }
 0x34e   : > { %p2457_p6 = pnand %p2467_p1, %p4278_p4 }
 0x350   : > { %2810 = dma.done.wait (!%p2457_p6), %s2114_s13, 1024  }
 0x351   : > { %2812 = vsyncadd (!%p2457_p6), %s2114_s13, 4294966272  ;;  %p23_p12 = scmp.ge.s32.totalorder %s3007_s15, 6   ;;  %s4279_s27 = smov %s2819_s28 }
 0x352   : > { %s4280_s28 = smov %s2823_s29  ;;  %s4281_s29 = smov %s3017_s19 }
 0x353   : > { %s4282_s30 = smov %s3007_s15  ;;  %25 = sbr.rel (!%p23_p12) target bundleno = 7 (0x7), region = 113 }
 0x35a   :  { %2119 = vsyncpa [#allocation3], 1 }
 0x35b   :  { %2121 = vsyncpa [#allocation3 + $0x1], 1 }
 0x35c   :  { %2122 = vsyncpa [#allocation8], 1 }
 0x35d   :  { %2123 = vsyncpa [#allocation4], 1 }
 0x35e   :  { %2125 = vsyncpa [#allocation4 + $0x1], 1 }
 0x35f   :  { %2126 = vsyncpa [#allocation5], 1 }
 0x360   :  { %2128 = vsyncpa [#allocation5 + $0x1], 1 }

// kernel: tpu_custom_call.1
= control target key start
LH: loop header
LB: loop body
LE: loop exit
PB: predicated region body
PF: predicated region fallthrough
CT: control target
= control target key end

     0   :  { %13 = vsyncpa [#allocation5], 0  ;;  %s4246_s0 = inlined_call_operand.hbm [shape: f32[12], index: 0, kind: input, shape index: {}]   ;;  %s4247_s1 = inlined_call_operand.hbm [shape: bf16[512,128], index: 1, kind: input, shape index: {}]   ;;  %s4248_s2 = inlined_call_operand.hbm [shape: bf16[128,256], index: 2, kind: input, shape index: {}]   ;;  %s4249_s3 = inlined_call_operand.vmem [shape: f32[1,256], index: 3, kind: input, shape index: {}]   ;;  %s4250_s4 = inlined_call_operand.vmem [shape: f32[4,256], index: 4, kind: input, shape index: {}]   ;;  %s4251_s5 = inlined_call_operand.hbm [shape: bf16[256,128], index: 5, kind: input, shape index: {}]   ;;  %s4252_s6 = inlined_call_operand.vmem [shape: f32[1,128], index: 6, kind: input, shape index: {}]   ;;  %s4253_s7 = inlined_call_operand.vmem [shape: f32[4,128], index: 7, kind: input, shape index: {}]   ;;  %s4254_s8 = inlined_call_operand.hbm [shape: bf16[512,128], index: 8, kind: output, shape index: {}]  }
   0x1   :  { %14 = vsyncpa [#allocation3], 0 }
   0x2   :  { %16 = vsyncpa [#allocation3 + $0x1], 0 }
   0x3   :  { %17 = vsyncpa [#allocation8], 0 }
   0x4   :  { %18 = vsyncpa [#allocation4], 0 }
   0x5   :  { %20 = vsyncpa [#allocation4 + $0x1], 0  ;;  %s2886_s27 = smov 0   ;;  %s2888_s28 = smov 0  }
   0x6   :  { %s2890_s29 = smov 0   ;;  %s2892_s30 = smov 0  }
   0x7 LB: > { %4260 = sst [smem:[#allocation15_spill]] %s2815_s27  ;;  %s2907_s9 = sadd.s32 4294967295, %s2827_s30   ;;  %s2827_s30 = sphi %s2892_s30, %s4282_s30   ;;  %s2823_s29 = sphi %s2890_s29, %s4281_s29   ;;  %s2819_s28 = sphi %s2888_s28, %s4280_s28   ;;  %s2815_s27 = sphi %s2886_s27, %s4279_s27  }
   0x8   : > { %s2202_s10 = sadd.s32 4294967294, %s2827_s30   ;;  %p67_p0 = scmp.ne.s32.totalorder %s2819_s28, %s2815_s27 }
   0x9   : > { %p4255_p1 = scmp.eq.s32.totalorder %s2907_s9, 0  ;;  %p223_p3 = scmp.eq.s32.totalorder %s2202_s10, 3 }
   0xa   : > { %p2203_p5 = scmp.ge.s32.totalorder %s2827_s30, 1  ;;  %p230_p7 = scmp.lt.s32.totalorder %s2827_s30, 5 }
   0xb   : > { %p2916_p4 = por %p4255_p1, %p67_p0  ;;  %p2921_p6 = por %p223_p3, %p67_p0 }
   0xc   : > { %p2926_p8 = pnand %p2203_p5, %p230_p7  ;;  %s2829_s14 = smov [#allocation7]  }
   0xd   : > { %s4261_s11 = scalar_select %p2916_p4, 1, 0 }
   0xe   : > { %s4262_s12 = scalar_select %p2921_p6, 1, 0 }
   0xf   : > { %s4264_s13 = scalar_select %p2926_p8, 1, 0 }
  0x10   : > { %4263 = sst [smem:[#allocation16_spill]] %s4262_s12  ;;  %s251_s15 = sshll.u32 %s2829_s14, 4  ;;  %s252_s15 = int_to_ptr.vmem [resolvable:$true] %s251_s15 }
  0x11   : > { %p2442_p9 = pneg %p2926_p8  ;;  %s2830_s17 = smov [#allocation9]  }
  0x12   : > { %s270_s18 = sshll.u32 %s2830_s17, 4  ;;  %s2654_s21 = scalar_lea.hbm %s4248_s2, 2048  ;;  %s2938_s18 = int_to_ptr.vmem [resolvable:$true] %s270_s18 }
  0x13   : > { %p2934_p10 = pnand %p2442_p9, %p4255_p1  ;;  %p2655_p11 = scmp.ne.s32.totalorder %s4248_s2, %s2654_s21 }
  0x14   : > { %p2661_p3 = scmp.lt.u32.totalorder %s2654_s21, %s4248_s2 }
  0x15   : > { %p2948_p12 = pneg %p2934_p10 }
  0x17   : > { %p2657_p13 = pnand %p2948_p12, %p2655_p11 }
  0x19   : > { %p2658_p0 = pneg %p2657_p13 }
  0x1b   : > { %p2663_p5 = pnand %p2661_p3, %p2658_p0 }
  0x1d   : > { %2666 = shalt.err (!%p2663_p5)
}
  0x1e   : > { %s2667_s10 = scalar_lea.vmem %s252_s15, 2048  ;;  %p2675_p2 = scmp.lt.s32.totalorder %s252_s15, %s252_s15 }
  0x1f   : > { %p2668_p7 = scmp.ne.s32.totalorder %s252_s15, %s2667_s10  ;;  %p2676_p6 = scmp.lt.s32.totalorder %s2667_s10, %s2667_s10 }
  0x21   : > { %p2670_p9 = pnand %p2668_p7, %p2948_p12  ;;  %p2677_p4 = por %p2676_p6, %p2675_p2 }
  0x23   : > { %p2671_p1 = pneg %p2670_p9 }
  0x25   : > { %p2678_p8 = pnand %p2677_p4, %p2671_p1 }
  0x27   : > { %2681 = shalt.err (!%p2678_p8)
}
  0x28   : > { %s2831_s14 = smov 128   ;;  %s2832_s17 = smov 8  }
  0x29   : > { %2448 = dma.hbm_to_vmem [thread:$0]  (!%p2934_p10), %s4248_s2, 2048, %s252_s15, [#allocation8], %s2831_s14, %s2831_s14, %s2832_s17  }
  0x2a   : > { %s2682_s23 = scalar_lea.hbm %s4246_s0, 16 }
  0x2b   : > { %p2683_p11 = scmp.ne.s32.totalorder %s4246_s0, %s2682_s23  ;;  %p2689_p4 = scmp.lt.u32.totalorder %s2682_s23, %s4246_s0 }
  0x2d   : > { %p2685_p1 = pnand %p2683_p11, %p2948_p12 }
  0x2f   : > { %p2686_p2 = pneg %p2685_p1 }
  0x31   : > { %p2691_p6 = pnand %p2689_p4, %p2686_p2 }
  0x33   : > { %2694 = shalt.err (!%p2691_p6)
}
  0x34   : > { %s2833_s27 = smov [#allocation2]   ;;  %s2695_s20 = scalar_lea.hbm %s4251_s5, 2048 }
  0x35   : > { %2445 = dma.hbm_to_smem (!%p2934_p10), %s4246_s0, 16, %s2833_s27, [#allocation5]  }
  0x36   : > { %p2696_p8 = scmp.ne.s32.totalorder %s4251_s5, %s2695_s20  ;;  %p2702_p3 = scmp.lt.u32.totalorder %s2695_s20, %s4251_s5 }
  0x38   : > { %p2698_p13 = pnand %p2696_p8, %p2948_p12 }
  0x3a   : > { %p2699_p0 = pneg %p2698_p13 }
  0x3c   : > { %p2704_p5 = pnand %p2702_p3, %p2699_p0 }
  0x3e   : > { %2707 = shalt.err (!%p2704_p5)
}
  0x3f   : > { %s2708_s27 = scalar_lea.vmem %s2938_s18, 2048  ;;  %p2716_p1 = scmp.lt.s32.totalorder %s2938_s18, %s2938_s18 }
  0x40   : > { %p2709_p7 = scmp.ne.s32.totalorder %s2938_s18, %s2708_s27  ;;  %p2717_p2 = scmp.lt.s32.totalorder %s2708_s27, %s2708_s27 }
  0x42   : > { %p2711_p9 = pnand %p2709_p7, %p2948_p12  ;;  %p2718_p4 = por %p2717_p2, %p2716_p1 }
  0x44   : > { %p2712_p11 = pneg %p2711_p9 }
  0x46   : > { %p2719_p6 = pnand %p2718_p4, %p2712_p11 }
  0x48   : > { %2722 = shalt.err (!%p2719_p6)
}
  0x49   : > { %s2834_s25 = smov 64   ;;  %s2835_s24 = smov 4  }
  0x4a   : > { %2451 = dma.hbm_to_vmem [thread:$0]  (!%p2934_p10), %s4251_s5, 2048, %s2938_s18, [#allocation8], %s2834_s25, %s2834_s25, %s2835_s24  }
  0x4b   : > { %s3007_s15 = sadd.s32 1, %s2827_s30   ;;  %s54_s17 = sadd.s32 1, %s2823_s29 }
  0x4c   : > { %s51_s14 = ssub.s32 %s2827_s30, %s3007_s15  ;;  %p61_p8 = scmp.ne.s32.totalorder %s2823_s29, %s2819_s28 }
  0x4d   : > { %p52_p12 = scmp.eq.s32.totalorder %s51_s14, 0  ;;  %p62_p13 = scmp.eq.s32.totalorder %s2827_s30, 0 }
  0x4e   : > { %p2463_p0 = scmp.lt.s32.totalorder %s2827_s30, 4  ;;  %p4267_p5 = scmp.eq.s32.totalorder %s2907_s9, 3 }
  0x4f   : > { %s3017_s19 = scalar_select %p52_p12, %s2823_s29, %s54_s17  }
  0x50   : > { %p63_p3 = por %p62_p13, %p61_p8  ;;  %p3021_p7 = por %p4267_p5, %p61_p8 }
  0x51   : > { %s290_s20 = sand.u32 1, %s2823_s29   ;;  %s2297_s21 = sshll.u32 %s2827_s30, 10 }
  0x52   : > { %s2208_s18 = sshll.u32 %s290_s20, 6  ;;  %s3030_s23 = scalar_lea.hbm %s4247_s1, %s2297_s21 }
  0x53   : > { %s294_s27 = scalar_lea.vmem [#allocation6], %s2208_s18  ;;  %p3032_p10 = pnand %p2463_p0, %p63_p3 }
  0x54   : > { %s301_s26 = sshll.u32 %s294_s27, 4  ;;  %s3038_s14 = scalar_lea.sflag [#allocation3], %s290_s20  ;;  %s3036_s26 = int_to_ptr.vmem [resolvable:$true] %s301_s26 }
  0x55   : > { %s2723_s17 = scalar_lea.hbm %s3030_s23, 1024  ;;  %p2725_p11 = pneg %p3032_p10 }
  0x56   : > { %p2724_p9 = scmp.ne.s32.totalorder %s3030_s23, %s2723_s17  ;;  %s2728_s22 = scalar_lea.hbm %s4247_s1, 4096 }
  0x57   : > { %p2729_p4 = scmp.lt.u32.totalorder %s3030_s23, %s4247_s1  ;;  %p2730_p6 = scmp.lt.u32.totalorder %s2728_s22, %s2723_s17 }
  0x58   : > { %p2726_p1 = pnand %p2725_p11, %p2724_p9  ;;  %p2732_p8 = scmp.lt.u32.totalorder %s2723_s17, %s3030_s23 }
  0x59   : > { %p2731_p12 = por %p2730_p6, %p2729_p4 }
  0x5a   : > { %p2727_p2 = pneg %p2726_p1 }
  0x5b   : > { %p2733_p13 = por %p2732_p8, %p2731_p12 }
  0x5d   : > { %p2734_p0 = pnand %p2733_p13, %p2727_p2 }
  0x5f   : > { %2737 = shalt.err (!%p2734_p0)
}
  0x60   : > { %s2738_s20 = scalar_lea.vmem %s3036_s26, 1024  ;;  %s2836_s21 = smov [#allocation6]  }
  0x61   : > { %p2739_p3 = scmp.ne.s32.totalorder %s3036_s26, %s2738_s20  ;;  %s2743_s18 = sshll.u32 %s2836_s21, 4  ;;  %s2744_s18 = int_to_ptr.vmem [resolvable:$false] %s2743_s18 }
  0x62   : > { %s2745_s12 = scalar_lea.vmem %s2744_s18, 2048  ;;  %p2746_p1 = scmp.lt.s32.totalorder %s3036_s26, %s2744_s18 }
  0x63   : > { %p2741_p5 = pnand %p2739_p3, %p2725_p11  ;;  %p2747_p4 = scmp.lt.s32.totalorder %s2745_s12, %s2738_s20 }
  0x65   : > { %p2742_p9 = pneg %p2741_p5  ;;  %p2748_p6 = por %p2747_p4, %p2746_p1 }
  0x67   : > { %p2749_p12 = pnand %p2748_p6, %p2742_p9 }
  0x69   : > { %2752 = shalt.err (!%p2749_p12)
}
  0x6a   : > { %2455 = dma.hbm_to_vmem [thread:$0]  (!%p3032_p10), %s3030_s23, 1024, %s3036_s26, %s3038_s14, %s2834_s25, %s2834_s25, %s2835_s24  }
  0x6b   : > { %p4270_p11 = scmp.ne.s32.totalorder %s4264_s13, 0 }
  0x6c   : > { %p4271_p2 = scmp.eq.s32.totalorder (!%p4270_p11), %s2907_s9, 0 }
  0x6d   : > { %313 = sbr.rel (%p4270_p11) target bundleno = 838 (0x346), region = 52 }
  0x74   : > { %2798 = dma.done.wait (%p4271_p2), [#allocation5], 16   ;;  %p4272_p8 = pmov %p4271_p2 }
  0x75   : > { %s3076_s17 = sand.u32 1, %s2819_s28   ;;  %p4273_p10 = scmp.ne.s32.totalorder %s4261_s11, 0 }
  0x76   : > { %2800 = vsyncadd (%p4272_p8), [#allocation5], 4294967280  ;;  %s2213_s10 = sshll.u32 %s3076_s17, 6  ;;  %s320_s22 = scalar_lea.sflag [#allocation3], %s3076_s17 }
  0x77   : > { %s3082_s25 = scalar_lea.vmem [#allocation6], %s2213_s10 }
  0x78   : > { %2802 = dma.done.wait (%p4273_p10), %s320_s22, 1024  }
  0x79   : > { %2804 = vsyncadd (%p4273_p10), %s320_s22, 4294966272  ;;  %p4274_p13 = pmov %p4271_p2 }
  0x7a   : > { %p4275_p0 = pmov %p4271_p2 }
  0x7b   : > { %2806 = dma.done.wait (%p4274_p13), [#allocation8], 4096  }
  0x7c   : > { %2808 = vsyncadd (%p4275_p0), [#allocation8], 4294963200 }
  0x7d   : > { %336 = sfence }
  0x7e   : > { %v2510_v0 = vld [vmem:[#allocation7 + $0x4] ss:$8 sps:$4 sm:$0xff]   ;;  %v2512_v1 = vld [vmem:[#allocation7] ss:$8 sps:$4 sm:$0xff]   ;;  %v2837_v2 = vmov 0   ;;  %v2536_v19 = vld [vmem:[%s3082_s25 + $0x10] sm:$0xff]   ;;  %v402_v41 = vlaneseq }
  0x7f   : > { %572 = vmatprep.mubr.bf16.mxu0 %v2837_v2  ;;  %540 = vmatprep.subr.bf16.mxu0 %v2510_v0  ;;  %v2513_v3 = vld [vmem:[#allocation7 + $0x14] ss:$8 sps:$4 sm:$0xff]   ;;  %v2515_v4 = vld [vmem:[#allocation7 + $0x10] ss:$8 sps:$4 sm:$0xff]   ;;  %v2516_v5 = vld [vmem:[#allocation7 + $0x24] ss:$8 sps:$4 sm:$0xff]  }
  0x80   : > { %541 = vmatpush1.bf16.msra.mxu0 %v2512_v1  ;;  %v2518_v6 = vld [vmem:[#allocation7 + $0x20] ss:$8 sps:$4 sm:$0xff]   ;;  %v2519_v7 = vld [vmem:[#allocation7 + $0x34] ss:$8 sps:$4 sm:$0xff]   ;;  %v2521_v8 = vld [vmem:[#allocation7 + $0x30] ss:$8 sps:$4 sm:$0xff]  }
  0x81   : > { %542 = vmatprep.subr.bf16.mxu0 %v2513_v3  ;;  %v2522_v9 = vld [vmem:[#allocation7 + $0x44] ss:$8 sps:$4 sm:$0xff]   ;;  %v2524_v10 = vld [vmem:[#allocation7 + $0x40] ss:$8 sps:$4 sm:$0xff]   ;;  %v2525_v11 = vld [vmem:[#allocation7 + $0x54] ss:$8 sps:$4 sm:$0xff]  }
  0x82   : > { %v2527_v12 = vld [vmem:[#allocation7 + $0x50] ss:$8 sps:$4 sm:$0xff]   ;;  %v2528_v13 = vld [vmem:[#allocation7 + $0x64] ss:$8 sps:$4 sm:$0xff]   ;;  %v2530_v14 = vld [vmem:[#allocation7 + $0x60] ss:$8 sps:$4 sm:$0xff]  }
  0x83   : > { %v2531_v15 = vld [vmem:[#allocation7 + $0x74] ss:$8 sps:$4 sm:$0xff]   ;;  %v2533_v16 = vld [vmem:[#allocation7 + $0x70] ss:$8 sps:$4 sm:$0xff]   ;;  %v2534_v17 = vld [vmem:[%s3082_s25] sm:$0xff]   ;;  %v403_v42 = vshrl.u32 %v402_v41, 7 }
  0x84   : > { %543 = vmatpush1.bf16.msra.mxu0 %v2515_v4  ;;  %v2535_v18 = vld [vmem:[%s3082_s25 + $0x8] sm:$0xff]   ;;  %v2537_v20 = vld [vmem:[%s3082_s25 + $0x18] sm:$0xff]   ;;  %v2538_v21 = vld [vmem:[%s3082_s25 + $0x20] sm:$0xff]   ;;  %s2245_s11 = sld [smem:[#allocation2 + $0x5]]  ;;  %s2244_s23 = sld [smem:[#allocation2 + $0x4]] }
  0x85   : > { %544 = vmatprep.subr.bf16.mxu0 %v2516_v5  ;;  %v2539_v22 = vld [vmem:[%s3082_s25 + $0x28] sm:$0xff]   ;;  %v2540_v23 = vld [vmem:[%s3082_s25 + $0x30] sm:$0xff]   ;;  %v2541_v24 = vld [vmem:[%s3082_s25 + $0x38] sm:$0xff]   ;;  %v3100_v43 = vsub.s32 0, %v403_v42  ;;  %v408_v45 = vsub.s32 1, %v403_v42  ;;  %s2243_s27 = sld [smem:[#allocation2 + $0x3]] }
  0x86   : > { %v2542_v25 = vld [vmem:[#allocation9 + $0x40] sm:$0xff]   ;;  %v2544_v27 = vld [vmem:[#allocation9 + $0x48] sm:$0xff]   ;;  %v2546_v29 = vld [vmem:[#allocation9 + $0x50] sm:$0xff]   ;;  %s3132_s22 = sld [smem:[#allocation2 + $0x2]]  ;;  %s3177_s25 = sld [smem:[#allocation2 + $0x1]] }
  0x87   : > { %v2543_v26 = vld [vmem:[#allocation9] sm:$0xff]   ;;  %2362 = vmatprep.subr.bf16.mxu1 %v2542_v25  ;;  %v2545_v28 = vld [vmem:[#allocation9 + $0x8] sm:$0xff]   ;;  %v2547_v30 = vld [vmem:[#allocation9 + $0x10] sm:$0xff]   ;;  %s3192_s24 = sld [smem:[#allocation2]]  ;;  %s2270_s26 = sld [smem:[#allocation2 + $0xa]] }
  0x88   : > { %545 = vmatpush1.bf16.msra.mxu0 %v2518_v6  ;;  %2363 = vmatpush3.bf16.msra.mxu1 %v2543_v26  ;;  %v2548_v31 = vld [vmem:[#allocation9 + $0x58] sm:$0xff]   ;;  %v2550_v33 = vld [vmem:[#allocation9 + $0x60] sm:$0xff]   ;;  %v2552_v35 = vld [vmem:[#allocation9 + $0x68] sm:$0xff]   ;;  %s2269_s20 = sld [smem:[#allocation2 + $0x9]]  ;;  %s2266_s14 = sld [smem:[#allocation2 + $0x6]] }
  0x89   : > { %546 = vmatprep.subr.bf16.mxu0 %v2519_v7  ;;  %2364 = vmatprep.subr.bf16.mxu1 %v2544_v27  ;;  %v2549_v32 = vld [vmem:[#allocation9 + $0x18] sm:$0xff]   ;;  %v2551_v34 = vld [vmem:[#allocation9 + $0x20] sm:$0xff]   ;;  %v2553_v36 = vld [vmem:[#allocation9 + $0x28] sm:$0xff]  }
  0x8a   : > { %v2554_v37 = vld [vmem:[#allocation9 + $0x70] sm:$0xff]   ;;  %v2556_v39 = vld [vmem:[#allocation9 + $0x78] sm:$0xff]   ;;  %v400_v44 = vld [vmem:[%s4249_s3] sm:$0x3]  ;;  %v3124_v54 = vstv %s2245_s11  ;;  %v3137_v60 = vstv %s2244_s23  ;;  %s2271_s23 = sld [smem:[#allocation2 + $0xb]] }
  0x8b   : > { %v2555_v38 = vld [vmem:[#allocation9 + $0x30] sm:$0xff]   ;;  %v2557_v40 = vld [vmem:[#allocation9 + $0x38] sm:$0xff]   ;;  %v2248_v46 = vld [vmem:[%s4250_s4 + $0x3] ss:$4 sm:$0x3]  ;;  %v3109_v47 = vrot.slane %v400_v44, %v3100_v43  ;;  %v3114_v49 = vrot.slane %v400_v44, %v408_v45  ;;  %v3156_v5 = vstv %s2243_s27  ;;  %s3973_s27 = scalar_lea.vmem [#allocation10], %s2213_s10 }
  0x8c   : > { %547 = vmatpush1.bf16.msra.mxu0 %v2521_v8  ;;  %2365 = vmatpush3.bf16.msra.mxu1 %v2545_v28  ;;  %v2247_v48 = vld [vmem:[%s4250_s4 + $0x2] ss:$4 sm:$0x3]  ;;  %v3117_v50 = vrot.slane %v2248_v46, %v3100_v43  ;;  %v3119_v52 = vrot.slane %v2248_v46, %v408_v45  ;;  %v2246_v53 = vld [vmem:[%s4250_s4 + $0x1] ss:$4 sm:$0x3]  ;;  %v3187_v26 = vstv %s3132_s22 }
  0x8d   : > { %548 = vmatprep.subr.bf16.mxu0 %v2522_v9  ;;  %2366 = vmatprep.subr.bf16.mxu1 %v2546_v29  ;;  %v3130_v56 = vrot.slane %v2247_v48, %v3100_v43  ;;  %v3139_v61 = vrot.slane %v2247_v48, %v408_v45  ;;  %v3145_v0 = vrot.slane %v2246_v53, %v3100_v43  ;;  %s2314_s10 = sshll.u32 %s2907_s9, 10  ;;  %s2085_s22 = scalar_lea.sflag [#allocation4], %s3076_s17 }
  0x8e   : > { %s4200_s12 = scalar_lea.hbm %s4254_s8, %s2314_s10  ;;  %s2838_s9 = smov [#allocation10]  }
  0x8f   : > { %s2757_s11 = sshll.u32 %s2838_s9, 4  ;;  %s2758_s11 = int_to_ptr.vmem [resolvable:$false] %s2757_s11 }
  0x90   : > { %549 = vmatpush1.bf16.msra.mxu0 %v2524_v10  ;;  %2367 = vmatpush3.bf16.msra.mxu1 %v2547_v30  ;;  %s2759_s13 = scalar_lea.vmem %s2758_s11, 2048 }
  0x91   : > { %550 = vmatprep.subr.bf16.mxu0 %v2525_v11  ;;  %2368 = vmatprep.subr.bf16.mxu1 %v2548_v31 }
  0x94   : > { %551 = vmatpush1.bf16.msra.mxu0 %v2527_v12  ;;  %2369 = vmatpush3.bf16.msra.mxu1 %v2549_v32 }
  0x95   : > { %552 = vmatprep.subr.bf16.mxu0 %v2528_v13  ;;  %2370 = vmatprep.subr.bf16.mxu1 %v2550_v33 }
  0x98   : > { %553 = vmatpush1.bf16.msra.mxu0 %v2530_v14  ;;  %2371 = vmatpush3.bf16.msra.mxu1 %v2551_v34 }
  0x99   : > { %554 = vmatprep.subr.bf16.mxu0 %v2531_v15  ;;  %2372 = vmatprep.subr.bf16.mxu1 %v2552_v35  ;;  %v3172_v15 = vrot.slane %v2246_v53, %v408_v45 }
  0x9c   : > { %555 = vmatpush1.bf16.msra.mxu0 %v2533_v16  ;;  %2373 = vmatpush3.bf16.msra.mxu1 %v2553_v36 }
  0x9d   : > { %2374 = vmatprep.subr.bf16.mxu1 %v2554_v37 }
  0x9f   : > { %573 = vmatmul.mubr.bf16.vlgmr.msra.gmra.mrb[0].mxu0 %v2534_v17 }
  0xa0   : > { %582 = vmatprep.mubr.bf16.mxu0 %v2837_v2  ;;  %2375 = vmatpush3.bf16.msra.mxu1 %v2555_v38 }
  0xa1   : > { %2376 = vmatprep.subr.bf16.mxu1 %v2556_v39 }
  0xa4   : > { %2377 = vmatpush3.bf16.msra.mxu1 %v2557_v40 }
  0xa7   : > { %583 = vmatmul.mubr.bf16.gmra.mrb[4].mxu0 %v2535_v18 }
  0xa8   : > { %592 = vmatprep.mubr.bf16.mxu0 %v2837_v2 }
  0xaf   : > { %593 = vmatmul.mubr.bf16.gmra.mrb[8].mxu0 %v2536_v19 }
  0xb0   : > { %602 = vmatprep.mubr.bf16.mxu0 %v2837_v2 }
  0xb7   : > { %603 = vmatmul.mubr.bf16.gmra.mrb[12].mxu0 %v2537_v20  ;;  %v659_v20 = vld [vmem:[%s4250_s4] ss:$4 sm:$0x3] }
  0xb8   : > { %612 = vmatprep.mubr.bf16.mxu0 %v2837_v2  ;;  %v3199_v37 = vrot.slane %v659_v20, %v408_v45 }
  0xbf   : > { %613 = vmatmul.mubr.bf16.gmra.mrb[16].mxu0 %v2538_v21 }
  0xc0   : > { %622 = vmatprep.mubr.bf16.mxu0 %v2837_v2 }
  0xc7   : > { %623 = vmatmul.mubr.bf16.gmra.mrb[20].mxu0 %v2539_v22 }
  0xc8   : > { %632 = vmatprep.mubr.bf16.mxu0 %v2837_v2 }
  0xcf   : > { %633 = vmatmul.mubr.bf16.gmra.mrb[24].mxu0 %v2540_v23 }
  0xd0   : > { %642 = vmatprep.mubr.bf16.mxu0 %v2837_v2 }
  0xd7   : > { %643 = vmatmul.mubr.bf16.gmra.mrb[28].mxu0 %v2541_v24 }
 0x172   : > { %v574_v51 = vpop.f32.mrb[0].mxu0 }
 0x173   : > { %v3127_v55 = vadd.f32 %v574_v51, %v3109_v47  ;;  %v576_v57 = vpop.f32.mrb[1].mxu0 }
 0x174   : > { %v3135_v58 = vadd.f32 %v576_v57, %v3114_v49  ;;  %v578_v59 = vpop.f32.mrb[2].mxu0 }
 0x175   : > { %v3142_v62 = vadd.f32 %v578_v59, %v3109_v47  ;;  %v580_v63 = vpop.f32.mrb[3].mxu0  ;;  %v667_v1 = vmul.f32 %v3124_v54, %v3127_v55  ;;  %v1003_v2 = vmul.f32 %v3117_v50, %v3127_v55 }
 0x176   : > { %v3152_v3 = vadd.f32 %v580_v63, %v3114_v49  ;;  %v668_v4 = vmul.f32 %v3124_v54, %v3135_v58  ;;  %v1004_v6 = vmul.f32 %v3119_v52, %v3135_v58 }
 0x177   : > { %v669_v7 = vmul.f32 %v3124_v54, %v3142_v62  ;;  %v700_v8 = vadd.f32 %v3137_v60, %v667_v1  ;;  %v1005_v9 = vmul.f32 %v3117_v50, %v3142_v62  ;;  %v1046_v10 = vadd.f32 %v3130_v56, %v1003_v2 }
 0x178   : > { %v670_v11 = vmul.f32 %v3124_v54, %v3152_v3  ;;  %v701_v12 = vadd.f32 %v3137_v60, %v668_v4  ;;  %v1006_v13 = vmul.f32 %v3119_v52, %v3152_v3  ;;  %v1047_v14 = vadd.f32 %v3139_v61, %v1004_v6 }
 0x179   : > { %v702_v16 = vadd.f32 %v3137_v60, %v669_v7  ;;  %v732_v17 = vmul.f32 %v700_v8, %v3127_v55  ;;  %v1048_v18 = vadd.f32 %v3130_v56, %v1005_v9  ;;  %v1078_v29 = vmul.f32 %v1046_v10, %v3127_v55 }
 0x17a   : > { %v584_v19 = vpop.f32.mrb[4].mxu0  ;;  %v703_v21 = vadd.f32 %v3137_v60, %v670_v11  ;;  %v733_v22 = vmul.f32 %v701_v12, %v3135_v58  ;;  %v1049_v23 = vadd.f32 %v3139_v61, %v1006_v13  ;;  %v1079_v24 = vmul.f32 %v1047_v14, %v3135_v58 }
 0x17b   : > { %v586_v25 = vpop.f32.mrb[5].mxu0  ;;  %v734_v27 = vmul.f32 %v702_v16, %v3142_v62  ;;  %v765_v28 = vadd.f32 %v3156_v5, %v732_v17  ;;  %v1080_v34 = vmul.f32 %v1048_v18, %v3142_v62  ;;  %v1121_v45 = vadd.f32 %v3145_v0, %v1078_v29 }
 0x17c   : > { %v588_v30 = vpop.f32.mrb[6].mxu0  ;;  %v735_v31 = vmul.f32 %v703_v21, %v3152_v3  ;;  %v766_v32 = vadd.f32 %v3156_v5, %v733_v22  ;;  %v1081_v33 = vmul.f32 %v1049_v23, %v3152_v3  ;;  %v1122_v36 = vadd.f32 %v3172_v15, %v1079_v24 }
 0x17d   : > { %v590_v35 = vpop.f32.mrb[7].mxu0  ;;  %v767_v38 = vadd.f32 %v3156_v5, %v734_v27  ;;  %v797_v39 = vmul.f32 %v765_v28, %v3127_v55  ;;  %v1123_v59 = vadd.f32 %v3145_v0, %v1080_v34  ;;  %v3217_v4 = vstv %s3177_s25  ;;  %s2268_s25 = sld [smem:[#allocation2 + $0x8]] }
 0x17e   : > { %v768_v40 = vadd.f32 %v3156_v5, %v735_v31  ;;  %v798_v41 = vmul.f32 %v766_v32, %v3135_v58  ;;  %v1124_v42 = vadd.f32 %v3172_v15, %v1081_v33  ;;  %v1154_v44 = vmul.f32 %v1122_v36, %v3135_v58 }
 0x17f   : > { %v799_v46 = vmul.f32 %v767_v38, %v3142_v62  ;;  %v830_v48 = vadd.f32 %v3187_v26, %v797_v39  ;;  %v3220_v6 = vrot.slane %v659_v20, %v3100_v43  ;;  %v1153_v12 = vmul.f32 %v1121_v45, %v3127_v55 }
 0x180   : > { %v800_v51 = vmul.f32 %v768_v40, %v3152_v3  ;;  %v831_v53 = vadd.f32 %v3187_v26, %v798_v41  ;;  %v1156_v57 = vmul.f32 %v1124_v42, %v3152_v3  ;;  %v1197_v63 = vadd.f32 %v3199_v37, %v1154_v44 }
 0x181   : > { %v832_v10 = vadd.f32 %v3187_v26, %v799_v46  ;;  %v862_v11 = vmul.f32 %v830_v48, %v3127_v55  ;;  %v3229_v16 = vstv %s3192_s24  ;;  %v1155_v43 = vmul.f32 %v1123_v59, %v3142_v62 }
 0x182   : > { %v594_v1 = vpop.f32.mrb[8].mxu0  ;;  %v833_v2 = vadd.f32 %v3187_v26, %v800_v51  ;;  %v1199_v7 = vadd.f32 %v3199_v37, %v1156_v57  ;;  %v1229_v9 = vmul.f32 %v1197_v63, %v3135_v58  ;;  %v863_v14 = vmul.f32 %v831_v53, %v3135_v58 }
 0x183   : > { %v596_v8 = vpop.f32.mrb[9].mxu0  ;;  %v3234_v18 = vadd.f32 %v584_v19, %v3109_v47  ;;  %v3237_v20 = vadd.f32 %v586_v25, %v3114_v49  ;;  %v3240_v21 = vadd.f32 %v588_v30, %v3109_v47  ;;  %v3245_v24 = vadd.f32 %v590_v35, %v3114_v49 }
 0x184   : > { %v598_v13 = vpop.f32.mrb[10].mxu0  ;;  %v1231_v17 = vmul.f32 %v1199_v7, %v3152_v3  ;;  %v1261_v23 = vand.u32 2147483647, %v1229_v9  ;;  %v3248_v27 = vadd.f32 %v594_v1, %v3109_v47  ;;  %v865_v28 = vmul.f32 %v833_v2, %v3152_v3 }
 0x185   : > { %v3242_v22 = vpop.f32.mrb[11].mxu0  ;;  %v864_v31 = vmul.f32 %v832_v10, %v3142_v62  ;;  %v895_v25 = vadd.f32 %v3217_v4, %v862_v11  ;;  %v1196_v30 = vadd.f32 %v3220_v6, %v1153_v12  ;;  %v3255_v32 = vadd.f32 %v596_v8, %v3114_v49 }
 0x186   : > { %v1263_v29 = vand.u32 2147483647, %v1231_v17  ;;  %v1293_v19 = vadd.f32 1.0, %v1261_v23  ;;  %v896_v33 = vadd.f32 %v3217_v4, %v863_v14  ;;  %v1198_v35 = vadd.f32 %v3220_v6, %v1155_v43 }
 0x187   : > { %v3260_v36 = vadd.f32 %v598_v13, %v3109_v47  ;;  %v1228_v38 = vmul.f32 %v1196_v30, %v3127_v55  ;;  %v672_v39 = vmul.f32 %v3124_v54, %v3237_v20  ;;  %v898_v41 = vadd.f32 %v3217_v4, %v865_v28 }
 0x188   : > { %v1295_v34 = vadd.f32 1.0, %v1263_v29  ;;  %2558 = vrcp.f32 %v1293_v19  ;;  %v1230_v42 = vmul.f32 %v1198_v35, %v3142_v62  ;;  %v674_v44 = vmul.f32 %v3124_v54, %v3245_v24 }
 0x189   : > { %v897_v48 = vadd.f32 %v3217_v4, %v864_v31  ;;  %v1260_v45 = vand.u32 2147483647, %v1228_v38  ;;  %v705_v51 = vadd.f32 %v3137_v60, %v672_v39  ;;  %v1008_v53 = vmul.f32 %v3119_v52, %v3237_v20 }
 0x18a   : > { %v3265_v40 = vpop.f32.mrb[12].mxu0  ;;  %2560 = vrcp.f32 %v1295_v34  ;;  %v927_v59 = vmul.f32 %v895_v25, %v3127_v55  ;;  %v1262_v63 = vand.u32 2147483647, %v1230_v42  ;;  %v707_v1 = vadd.f32 %v3137_v60, %v674_v44 }
 0x18b   : > { %v606_v46 = vpop.f32.mrb[13].mxu0  ;;  %v1010_v2 = vmul.f32 %v3119_v52, %v3245_v24  ;;  %v928_v8 = vmul.f32 %v896_v33, %v3135_v58  ;;  %v1292_v9 = vadd.f32 1.0, %v1260_v45  ;;  %v737_v10 = vmul.f32 %v705_v51, %v3237_v20 }
 0x18c   : > { %v608_v57 = vpop.f32.mrb[14].mxu0  ;;  %v1051_v11 = vadd.f32 %v3139_v61, %v1008_v53  ;;  %v930_v12 = vmul.f32 %v898_v41, %v3152_v3  ;;  %v1294_v13 = vadd.f32 1.0, %v1262_v63  ;;  %v739_v14 = vmul.f32 %v707_v1, %v3245_v24 }
 0x18d   : > { %v610_v7 = vpop.f32.mrb[15].mxu0  ;;  %v1053_v55 = vadd.f32 %v3139_v61, %v1010_v2  ;;  %2562 = vrcp.f32 %v1292_v9  ;;  %v770_v17 = vadd.f32 %v3156_v5, %v737_v10  ;;  %v671_v58 = vmul.f32 %v3124_v54, %v3234_v18 }
 0x18e   : > { %v1083_v43 = vmul.f32 %v1051_v11, %v3237_v20  ;;  %2564 = vrcp.f32 %v1294_v13  ;;  %v772_v23 = vadd.f32 %v3156_v5, %v739_v14  ;;  %v673_v3 = vmul.f32 %v3124_v54, %v3240_v21 }
 0x18f   : > { %v1085_v28 = vmul.f32 %v1053_v55, %v3245_v24  ;;  %v929_v29 = vmul.f32 %v897_v48, %v3142_v62  ;;  %v802_v19 = vmul.f32 %v770_v17, %v3237_v20  ;;  %v704_v25 = vadd.f32 %v3137_v60, %v671_v58 }
 0x190   : > { %v1126_v31 = vadd.f32 %v3172_v15, %v1083_v43  ;;  %v961_v33 = vadd.f32 %v3229_v16, %v928_v8  ;;  %v804_v34 = vmul.f32 %v772_v23, %v3245_v24  ;;  %v706_v38 = vadd.f32 %v3137_v60, %v673_v3 }
 0x191   : > { %v1128_v35 = vadd.f32 %v3172_v15, %v1085_v28  ;;  %v963_v42 = vadd.f32 %v3229_v16, %v930_v12  ;;  %v835_v62 = vadd.f32 %v3187_v26, %v802_v19  ;;  %v736_v48 = vmul.f32 %v704_v25, %v3234_v18 }
 0x192   : > { %v614_v30 = vpop.f32.mrb[16].mxu0  ;;  %v2559_v39 = vpop.eup %2558  ;;  %v1158_v44 = vmul.f32 %v1126_v31, %v3237_v20  ;;  %v3307_v51 = vadd.f32 %v3242_v22, %v3114_v49  ;;  %v960_v63 = vadd.f32 %v3229_v16, %v927_v59  ;;  %v837_v1 = vadd.f32 %v3187_v26, %v804_v34 }
 0x193   : > { %v616_v41 = vpop.f32.mrb[17].mxu0  ;;  %v1160_v2 = vmul.f32 %v1128_v35, %v3245_v24  ;;  %v1357_v9 = vmul.f32 %v2559_v39, %v961_v33  ;;  %v867_v11 = vmul.f32 %v835_v62, %v3237_v20  ;;  %v962_v13 = vadd.f32 %v3229_v16, %v929_v29 }
 0x194   : > { %v2561_v45 = vpop.eup %2560  ;;  %v618_v53 = vpop.f32.mrb[18].mxu0  ;;  %v1201_v12 = vadd.f32 %v3199_v37, %v1158_v44  ;;  %v738_v22 = vmul.f32 %v706_v38, %v3240_v21  ;;  %v1007_v59 = vmul.f32 %v3117_v50, %v3234_v18  ;;  %v769_v43 = vadd.f32 %v3156_v5, %v736_v48 }
 0x195   : > { %v620_v8 = vpop.f32.mrb[19].mxu0  ;;  %v1359_v10 = vmul.f32 %v2561_v45, %v963_v42  ;;  %v1203_v14 = vadd.f32 %v3199_v37, %v1160_v2  ;;  %v1009_v58 = vmul.f32 %v3117_v50, %v3240_v21  ;;  %v3325_v23 = vadd.f32 %v3265_v40, %v3109_v47 }
 0x196   : > { %v1233_v17 = vmul.f32 %v1201_v12, %v3237_v20  ;;  %v3328_v28 = vadd.f32 %v606_v46, %v3114_v49  ;;  %v869_v3 = vmul.f32 %v837_v1, %v3245_v24  ;;  %v3333_v31 = vadd.f32 %v608_v57, %v3109_v47 }
 0x197   : > { %v1389_v55 = vpack.c.bf16 %v1359_v10, %v1357_v9  ;;  %v1235_v29 = vmul.f32 %v1203_v14, %v3245_v24  ;;  %v2563_v19 = vpop.eup %2562  ;;  %v3336_v25 = vadd.f32 %v610_v7, %v3114_v49  ;;  %v900_v33 = vadd.f32 %v3217_v4, %v867_v11 }
 0x198   : > { %v1265_v34 = vand.u32 2147483647, %v1233_v17  ;;  %v2565_v40 = vpop.eup %2564  ;;  %v771_v46 = vadd.f32 %v3156_v5, %v738_v22  ;;  %v801_v39 = vmul.f32 %v769_v43, %v3234_v18  ;;  %v1050_v42 = vadd.f32 %v3130_v56, %v1007_v59 }
 0x199   : > { %1571 = vmatprep.mubr.bf16.mxu1 %v1389_v55  ;;  %v1267_v38 = vand.u32 2147483647, %v1235_v29  ;;  %v1356_v62 = vmul.f32 %v2563_v19, %v960_v63  ;;  %v1358_v44 = vmul.f32 %v2565_v40, %v962_v13  ;;  %v1052_v7 = vadd.f32 %v3130_v56, %v1009_v58 }
 0x19a   : > { %v624_v35 = vpop.f32.mrb[20].mxu0  ;;  %v1297_v48 = vadd.f32 1.0, %v1265_v34  ;;  %v3344_v45 = vadd.f32 %v614_v30, %v3109_v47  ;;  %v3347_v1 = vadd.f32 %v616_v41, %v3114_v49  ;;  %v902_v9 = vadd.f32 %v3217_v4, %v869_v3 }
 0x19b   : > { %v626_v57 = vpop.f32.mrb[21].mxu0  ;;  %v1299_v10 = vadd.f32 1.0, %v1267_v38  ;;  %v3351_v11 = vadd.f32 %v618_v53, %v3109_v47  ;;  %v3354_v63 = vadd.f32 %v620_v8, %v3114_v49  ;;  %v1388_v12 = vpack.c.bf16 %v1358_v44, %v1356_v62 }
 0x19c   : > { %v628_v2 = vpop.f32.mrb[22].mxu0  ;;  %2566 = vrcp.f32 %v1297_v48  ;;  %v932_v14 = vmul.f32 %v900_v33, %v3237_v20  ;;  %v803_v30 = vmul.f32 %v771_v46, %v3240_v21  ;;  %v1082_v41 = vmul.f32 %v1050_v42, %v3234_v18 }
 0x19d   : > { %v630_v13 = vpop.f32.mrb[23].mxu0  ;;  %2568 = vrcp.f32 %v1299_v10  ;;  %1572 = vmatmul.mubr.bf16.vlgmr.msra.gmra.mrb[0].mxu1 %v1388_v12  ;;  %v834_v22 = vadd.f32 %v3187_v26, %v801_v39  ;;  %v1084_v59 = vmul.f32 %v1052_v7, %v3240_v21  ;;  %v676_v53 = vmul.f32 %v3124_v54, %v3255_v32 }
 0x19e   : > { %v678_v8 = vmul.f32 %v3124_v54, %v3307_v51  ;;  %v934_v55 = vmul.f32 %v902_v9, %v3245_v24  ;;  %v1125_v20 = vadd.f32 %v3145_v0, %v1082_v41  ;;  %v1012_v17 = vmul.f32 %v3119_v52, %v3255_v32 }
 0x19f   : > { %v1014_v43 = vmul.f32 %v3119_v52, %v3307_v51  ;;  %v3372_v58 = vadd.f32 %v624_v35, %v3109_v47  ;;  %v1127_v3 = vadd.f32 %v3145_v0, %v1084_v59  ;;  %v709_v29 = vadd.f32 %v3137_v60, %v676_v53 }
 0x1a0   : > { %v711_v19 = vadd.f32 %v3137_v60, %v678_v8  ;;  %v965_v33 = vadd.f32 %v3229_v16, %v932_v14  ;;  %v836_v34 = vadd.f32 %v3187_v26, %v803_v30  ;;  %v1157_v40 = vmul.f32 %v1125_v20, %v3234_v18 }
 0x1a1   : > { %v1055_v38 = vadd.f32 %v3139_v61, %v1012_v17  ;;  %v866_v46 = vmul.f32 %v834_v22, %v3234_v18  ;;  %v1159_v35 = vmul.f32 %v1127_v3, %v3240_v21  ;;  %v741_v42 = vmul.f32 %v709_v29, %v3255_v32 }
 0x1a2   : > { %v634_v24 = vpop.f32.mrb[24].mxu0  ;;  %v1057_v62 = vadd.f32 %v3139_v61, %v1014_v43  ;;  %v3388_v44 = vadd.f32 %v626_v57, %v3114_v49  ;;  %v967_v48 = vadd.f32 %v3229_v16, %v934_v55  ;;  %v1200_v7 = vadd.f32 %v3220_v6, %v1157_v40 }
 0x1a3   : > { %v3383_v39 = vpop.f32.mrb[25].mxu0  ;;  %v743_v10 = vmul.f32 %v711_v19, %v3307_v51  ;;  %v3396_v12 = vadd.f32 %v628_v2, %v3109_v47  ;;  %v3399_v14 = vadd.f32 %v630_v13, %v3114_v49  ;;  %v1202_v30 = vadd.f32 %v3220_v6, %v1159_v35 }
 0x1a4   : > { %v3392_v9 = vpop.f32.mrb[26].mxu0  ;;  %v774_v57 = vadd.f32 %v3156_v5, %v741_v42  ;;  %v868_v22 = vmul.f32 %v836_v34, %v3240_v21  ;;  %v1232_v59 = vmul.f32 %v1200_v7, %v3234_v18  ;;  %v1087_v8 = vmul.f32 %v1055_v38, %v3255_v32 }
 0x1a5   : > { %v3402_v41 = vpop.f32.mrb[27].mxu0  ;;  %v776_v53 = vadd.f32 %v3156_v5, %v743_v10  ;;  %v899_v2 = vadd.f32 %v3217_v4, %v866_v46  ;;  %v1234_v13 = vmul.f32 %v1202_v30, %v3240_v21  ;;  %v1089_v17 = vmul.f32 %v1057_v62, %v3307_v51 }
 0x1a6   : > { %v2567_v55 = vpop.eup %2566  ;;  %v806_v20 = vmul.f32 %v774_v57, %v3255_v32  ;;  %v1264_v29 = vand.u32 2147483647, %v1232_v59  ;;  %v1130_v19 = vadd.f32 %v3172_v15, %v1087_v8  ;;  %v675_v34 = vmul.f32 %v3124_v54, %v3248_v27 }
 0x1a7   : > { %v2569_v43 = vpop.eup %2568  ;;  %v1361_v3 = vmul.f32 %v2567_v55, %v965_v33  ;;  %v1266_v35 = vand.u32 2147483647, %v1234_v13  ;;  %v808_v38 = vmul.f32 %v776_v53, %v3307_v51  ;;  %v1132_v46 = vadd.f32 %v3172_v15, %v1089_v17 }
 0x1a8   : > { %v1363_v40 = vmul.f32 %v2569_v43, %v967_v48  ;;  %v901_v42 = vadd.f32 %v3217_v4, %v868_v22  ;;  %v1296_v7 = vadd.f32 1.0, %v1264_v29  ;;  %v1162_v10 = vmul.f32 %v1130_v19, %v3255_v32 }
 0x1a9   : > { %v677_v33 = vmul.f32 %v3124_v54, %v3260_v36  ;;  %v1298_v57 = vadd.f32 1.0, %v1266_v35  ;;  %v839_v59 = vadd.f32 %v3187_v26, %v806_v20  ;;  %v1164_v48 = vmul.f32 %v1132_v46, %v3307_v51 }
 0x1aa   : > { %v3420_v62 = vpop.f32.mrb[28].mxu0  ;;  %v1391_v30 = vpack.c.bf16 %v1363_v40, %v1361_v3  ;;  %v3429_v53 = vadd.f32 %v634_v24, %v3109_v47  ;;  %v931_v22 = vmul.f32 %v899_v2, %v3234_v18  ;;  %2570 = vrcp.f32 %v1296_v7 }
 0x1ab   : > { %v3426_v8 = vpop.f32.mrb[29].mxu0  ;;  %v1205_v55 = vadd.f32 %v3199_v37, %v1162_v10  ;;  %2572 = vrcp.f32 %v1298_v57  ;;  %v841_v17 = vadd.f32 %v3187_v26, %v808_v38  ;;  %v1207_v20 = vadd.f32 %v3199_v37, %v1164_v48 }
 0x1ac   : > { %v3433_v13 = vpop.f32.mrb[30].mxu0  ;;  %1579 = vmatprep.mubr.bf16.mxu1 %v1391_v30  ;;  %v708_v43 = vadd.f32 %v3137_v60, %v675_v34  ;;  %v933_v24 = vmul.f32 %v901_v42, %v3240_v21  ;;  %v710_v18 = vadd.f32 %v3137_v60, %v677_v33  ;;  %v1011_v2 = vmul.f32 %v3117_v50, %v3248_v27 }
 0x1ad   : > { %v3438_v3 = vpop.f32.mrb[31].mxu0  ;;  %v1237_v29 = vmul.f32 %v1205_v55, %v3255_v32  ;;  %v871_v19 = vmul.f32 %v839_v59, %v3255_v32  ;;  %v1239_v40 = vmul.f32 %v1207_v20, %v3307_v51  ;;  %v1013_v34 = vmul.f32 %v3117_v50, %v3260_v36 }
 0x1ae   : > { %v740_v35 = vmul.f32 %v708_v43, %v3248_v27  ;;  %v964_v38 = vadd.f32 %v3229_v16, %v931_v22  ;;  %v742_v21 = vmul.f32 %v710_v18, %v3260_v36  ;;  %v1054_v42 = vadd.f32 %v3130_v56, %v1011_v2 }
 0x1af   : > { %v1269_v46 = vand.u32 2147483647, %v1237_v29  ;;  %v873_v7 = vmul.f32 %v841_v17, %v3307_v51  ;;  %v1271_v10 = vand.u32 2147483647, %v1239_v40  ;;  %v1056_v30 = vadd.f32 %v3130_v56, %v1013_v34 }
 0x1b0   : > { %v773_v33 = vadd.f32 %v3156_v5, %v740_v35  ;;  %v3458_v57 = vadd.f32 %v3383_v39, %v3114_v49  ;;  %v775_v48 = vadd.f32 %v3156_v5, %v742_v21  ;;  %v1086_v22 = vmul.f32 %v1054_v42, %v3248_v27 }
 0x1b1   : > { %v1301_v59 = vadd.f32 1.0, %v1269_v46  ;;  %v904_v55 = vadd.f32 %v3217_v4, %v871_v19  ;;  %v1303_v20 = vadd.f32 1.0, %v1271_v10  ;;  %v1088_v17 = vmul.f32 %v1056_v30, %v3260_v36 }
 0x1b2   : > { %v805_v43 = vmul.f32 %v773_v33, %v3248_v27  ;;  %v966_v29 = vadd.f32 %v3229_v16, %v933_v24  ;;  %v807_v18 = vmul.f32 %v775_v48, %v3260_v36  ;;  %v1129_v39 = vadd.f32 %v3145_v0, %v1086_v22 }
 0x1b3   : > { %2574 = vrcp.f32 %v1301_v59  ;;  %v3470_v2 = vadd.f32 %v3392_v9, %v3109_v47  ;;  %v906_v40 = vadd.f32 %v3217_v4, %v873_v7  ;;  %v1131_v19 = vadd.f32 %v3145_v0, %v1088_v17 }
 0x1b4   : > { %2576 = vrcp.f32 %v1303_v20  ;;  %v2571_v35 = vpop.eup %2570  ;;  %v838_v34 = vadd.f32 %v3187_v26, %v805_v43  ;;  %v1161_v46 = vmul.f32 %v1129_v39, %v3248_v27  ;;  %v680_v24 = vmul.f32 %v3124_v54, %v3328_v28 }
 0x1b5   : > { %v682_v21 = vmul.f32 %v3124_v54, %v3336_v25  ;;  %v2573_v42 = vpop.eup %2572  ;;  %v936_v9 = vmul.f32 %v904_v55, %v3255_v32  ;;  %v840_v10 = vadd.f32 %v3187_v26, %v807_v18  ;;  %v1163_v7 = vmul.f32 %v1131_v19, %v3260_v36 }
 0x1b6   : > { %v1016_v33 = vmul.f32 %v3119_v52, %v3328_v28  ;;  %v1360_v30 = vmul.f32 %v2571_v35, %v964_v38  ;;  %v1362_v59 = vmul.f32 %v2573_v42, %v966_v29  ;;  %v1204_v48 = vadd.f32 %v3220_v6, %v1161_v46 }
 0x1b7   : > { %v713_v22 = vadd.f32 %v3137_v60, %v680_v24  ;;  %v938_v20 = vmul.f32 %v906_v40, %v3307_v51  ;;  %v1206_v43 = vadd.f32 %v3220_v6, %v1163_v7  ;;  %v715_v17 = vadd.f32 %v3137_v60, %v682_v21 }
 0x1b8   : > { %v1018_v32 = vmul.f32 %v3119_v52, %v3336_v25  ;;  %v1390_v55 = vpack.c.bf16 %v1362_v59, %v1360_v30  ;;  %v870_v18 = vmul.f32 %v838_v34, %v3248_v27  ;;  %v1236_v39 = vmul.f32 %v1204_v48, %v3248_v27 }
 0x1b9   : > { %v745_v38 = vmul.f32 %v713_v22, %v3328_v28  ;;  %v872_v29 = vmul.f32 %v840_v10, %v3260_v36  ;;  %v1238_v19 = vmul.f32 %v1206_v43, %v3260_v36  ;;  %v747_v51 = vmul.f32 %v715_v17, %v3336_v25 }
 0x1ba   : > { %v1059_v40 = vadd.f32 %v3139_v61, %v1016_v33  ;;  %1580 = vmatmul.mubr.bf16.gmra.mrb[4].mxu1 %v1390_v55  ;;  %v969_v35 = vadd.f32 %v3229_v16, %v936_v9  ;;  %v1268_v46 = vand.u32 2147483647, %v1236_v39  ;;  %v1061_v34 = vadd.f32 %v3139_v61, %v1018_v32 }
 0x1bb   : > { %v778_v24 = vadd.f32 %v3156_v5, %v745_v38  ;;  %v971_v21 = vadd.f32 %v3229_v16, %v938_v20  ;;  %v1270_v42 = vand.u32 2147483647, %v1238_v19  ;;  %v780_v7 = vadd.f32 %v3156_v5, %v747_v51 }
 0x1bc   : > { %v1091_v10 = vmul.f32 %v1059_v40, %v3328_v28  ;;  %v903_v59 = vadd.f32 %v3217_v4, %v870_v18  ;;  %v1300_v48 = vadd.f32 1.0, %v1268_v46  ;;  %v1093_v9 = vmul.f32 %v1061_v34, %v3336_v25 }
 0x1bd   : > { %v2575_v30 = vpop.eup %2574  ;;  %v810_v33 = vmul.f32 %v778_v24, %v3328_v28  ;;  %v905_v43 = vadd.f32 %v3217_v4, %v872_v29  ;;  %v1302_v17 = vadd.f32 1.0, %v1270_v42  ;;  %v812_v32 = vmul.f32 %v780_v7, %v3336_v25 }
 0x1be   : > { %v2577_v22 = vpop.eup %2576  ;;  %v1134_v20 = vadd.f32 %v3172_v15, %v1091_v10  ;;  %v1365_v55 = vmul.f32 %v2575_v30, %v969_v35  ;;  %2578 = vrcp.f32 %v1300_v48  ;;  %v1136_v38 = vadd.f32 %v3172_v15, %v1093_v9 }
 0x1bf   : > { %v1367_v39 = vmul.f32 %v2577_v22, %v971_v21  ;;  %2580 = vrcp.f32 %v1302_v17  ;;  %v843_v18 = vadd.f32 %v3187_v26, %v810_v33  ;;  %v679_v51 = vmul.f32 %v3124_v54, %v3325_v23 }
 0x1c0   : > { %v1166_v19 = vmul.f32 %v1134_v20, %v3328_v28  ;;  %v935_v29 = vmul.f32 %v903_v59, %v3248_v27  ;;  %v1168_v46 = vmul.f32 %v1136_v38, %v3336_v25  ;;  %v681_v35 = vmul.f32 %v3124_v54, %v3333_v31 }
 0x1c1   : > { %v1393_v40 = vpack.c.bf16 %v1367_v39, %v1365_v55  ;;  %v845_v24 = vadd.f32 %v3187_v26, %v812_v32  ;;  %v712_v21 = vadd.f32 %v3137_v60, %v679_v51  ;;  %v1015_v42 = vmul.f32 %v3117_v50, %v3325_v23 }
 0x1c2   : > { %v1209_v34 = vadd.f32 %v3199_v37, %v1166_v19  ;;  %v937_v7 = vmul.f32 %v905_v43, %v3260_v36  ;;  %v1211_v10 = vadd.f32 %v3199_v37, %v1168_v46  ;;  %v714_v27 = vadd.f32 %v3137_v60, %v681_v35 }
 0x1c3   : > { %1587 = vmatprep.mubr.bf16.mxu1 %v1393_v40  ;;  %v1017_v30 = vmul.f32 %v3117_v50, %v3333_v31  ;;  %v875_v59 = vmul.f32 %v843_v18, %v3328_v28  ;;  %v744_v33 = vmul.f32 %v712_v21, %v3325_v23  ;;  %v1058_v9 = vadd.f32 %v3130_v56, %v1015_v42 }
 0x1c4   : > { %v1241_v48 = vmul.f32 %v1209_v34, %v3328_v28  ;;  %v968_v22 = vadd.f32 %v3229_v16, %v935_v29  ;;  %v1243_v17 = vmul.f32 %v1211_v10, %v3336_v25  ;;  %v746_v36 = vmul.f32 %v714_v27, %v3333_v31 }
 0x1c5   : > { %v1060_v43 = vadd.f32 %v3130_v56, %v1017_v30  ;;  %v877_v32 = vmul.f32 %v845_v24, %v3336_v25  ;;  %v777_v55 = vadd.f32 %v3156_v5, %v744_v33  ;;  %v1090_v39 = vmul.f32 %v1058_v9, %v3325_v23 }
 0x1c6   : > { %v1273_v20 = vand.u32 2147483647, %v1241_v48  ;;  %v970_v38 = vadd.f32 %v3229_v16, %v937_v7  ;;  %v1275_v18 = vand.u32 2147483647, %v1243_v17  ;;  %v779_v19 = vadd.f32 %v3156_v5, %v746_v36 }
 0x1c7   : > { %v1092_v51 = vmul.f32 %v1060_v43, %v3333_v31  ;;  %v908_v40 = vadd.f32 %v3217_v4, %v875_v59  ;;  %v809_v46 = vmul.f32 %v777_v55, %v3325_v23  ;;  %v1133_v35 = vadd.f32 %v3145_v0, %v1090_v39 }
 0x1c8   : > { %v1305_v29 = vadd.f32 1.0, %v1273_v20  ;;  %v2579_v24 = vpop.eup %2578  ;;  %v1307_v34 = vadd.f32 1.0, %v1275_v18  ;;  %v811_v21 = vmul.f32 %v779_v19, %v3333_v31  ;;  %v684_v7 = vmul.f32 %v3124_v54, %v3347_v1 }
 0x1c9   : > { %v1135_v42 = vadd.f32 %v3145_v0, %v1092_v51  ;;  %v2581_v10 = vpop.eup %2580  ;;  %v1364_v27 = vmul.f32 %v2579_v24, %v968_v22  ;;  %v910_v30 = vadd.f32 %v3217_v4, %v877_v32  ;;  %v1165_v59 = vmul.f32 %v1133_v35, %v3325_v23 }
 0x1ca   : > { %2582 = vrcp.f32 %v1305_v29  ;;  %v1366_v48 = vmul.f32 %v2581_v10, %v970_v38  ;;  %v842_v33 = vadd.f32 %v3187_v26, %v809_v46  ;;  %v940_v17 = vmul.f32 %v908_v40, %v3328_v28 }
 0x1cb   : > { %2584 = vrcp.f32 %v1307_v34  ;;  %v1167_v9 = vmul.f32 %v1135_v42, %v3333_v31  ;;  %v1208_v36 = vadd.f32 %v3220_v6, %v1165_v59  ;;  %v686_v43 = vmul.f32 %v3124_v54, %v3354_v63 }
 0x1cc   : > { %v717_v22 = vadd.f32 %v3137_v60, %v684_v7  ;;  %v1392_v20 = vpack.c.bf16 %v1366_v48, %v1364_v27  ;;  %v844_v32 = vadd.f32 %v3187_v26, %v811_v21  ;;  %v1020_v39 = vmul.f32 %v3119_v52, %v3347_v1 }
 0x1cd   : > { %v1210_v55 = vadd.f32 %v3220_v6, %v1167_v9  ;;  %v942_v38 = vmul.f32 %v910_v30, %v3336_v25  ;;  %v1240_v18 = vmul.f32 %v1208_v36, %v3325_v23  ;;  %v719_v28 = vadd.f32 %v3137_v60, %v686_v43 }
 0x1ce   : > { %v749_v19 = vmul.f32 %v717_v22, %v3347_v1  ;;  %1588 = vmatmul.mubr.bf16.gmra.mrb[8].mxu1 %v1392_v20  ;;  %v874_v51 = vmul.f32 %v842_v33, %v3325_v23  ;;  %v1022_v29 = vmul.f32 %v3119_v52, %v3354_v63  ;;  %v1063_v46 = vadd.f32 %v3139_v61, %v1020_v39 }
 0x1cf   : > { %v1242_v40 = vmul.f32 %v1210_v55, %v3333_v31  ;;  %v973_v35 = vadd.f32 %v3229_v16, %v940_v17  ;;  %v1272_v24 = vand.u32 2147483647, %v1240_v18  ;;  %v751_v25 = vmul.f32 %v719_v28, %v3354_v63 }
 0x1d0   : > { %v782_v34 = vadd.f32 %v3156_v5, %v749_v19  ;;  %v876_v21 = vmul.f32 %v844_v32, %v3333_v31  ;;  %v1065_v7 = vadd.f32 %v3139_v61, %v1022_v29  ;;  %v1095_v10 = vmul.f32 %v1063_v46, %v3347_v1 }
 0x1d1   : > { %v1274_v42 = vand.u32 2147483647, %v1242_v40  ;;  %v975_v27 = vadd.f32 %v3229_v16, %v942_v38  ;;  %v1304_v30 = vadd.f32 1.0, %v1272_v24  ;;  %v784_v59 = vadd.f32 %v3156_v5, %v751_v25 }
 0x1d2   : > { %v814_v48 = vmul.f32 %v782_v34, %v3347_v1  ;;  %v907_v33 = vadd.f32 %v3217_v4, %v874_v51  ;;  %v1097_v17 = vmul.f32 %v1065_v7, %v3354_v63  ;;  %v1138_v36 = vadd.f32 %v3172_v15, %v1095_v10 }
 0x1d3   : > { %v1306_v9 = vadd.f32 1.0, %v1274_v42  ;;  %2586 = vrcp.f32 %v1304_v30  ;;  %v816_v22 = vmul.f32 %v784_v59, %v3354_v63  ;;  %v683_v32 = vmul.f32 %v3124_v54, %v3344_v45 }
 0x1d4   : > { %v2583_v43 = vpop.eup %2582  ;;  %v847_v20 = vadd.f32 %v3187_v26, %v814_v48  ;;  %v909_v39 = vadd.f32 %v3217_v4, %v876_v21  ;;  %v1140_v38 = vadd.f32 %v3172_v15, %v1097_v17  ;;  %v1170_v18 = vmul.f32 %v1138_v36, %v3347_v1 }
 0x1d5   : > { %v2585_v55 = vpop.eup %2584  ;;  %2588 = vrcp.f32 %v1306_v9  ;;  %v1369_v28 = vmul.f32 %v2583_v43, %v973_v35  ;;  %v849_v51 = vadd.f32 %v3187_v26, %v816_v22  ;;  %v685_v40 = vmul.f32 %v3124_v54, %v3351_v11 }
 0x1d6   : > { %v1371_v19 = vmul.f32 %v2585_v55, %v975_v27  ;;  %v1172_v29 = vmul.f32 %v1140_v38, %v3354_v63  ;;  %v1213_v46 = vadd.f32 %v3199_v37, %v1170_v18  ;;  %v716_v24 = vadd.f32 %v3137_v60, %v683_v32 }
 0x1d7   : > { %v1019_v25 = vmul.f32 %v3117_v50, %v3344_v45  ;;  %v939_v21 = vmul.f32 %v907_v33, %v3325_v23  ;;  %v879_v35 = vmul.f32 %v847_v20, %v3347_v1  ;;  %v718_v42 = vadd.f32 %v3137_v60, %v685_v40 }
 0x1d8   : > { %v1395_v34 = vpack.c.bf16 %v1371_v19, %v1369_v28  ;;  %v1215_v7 = vadd.f32 %v3199_v37, %v1172_v29  ;;  %v1245_v10 = vmul.f32 %v1213_v46, %v3347_v1  ;;  %v748_v27 = vmul.f32 %v716_v24, %v3344_v45 }
 0x1d9   : > { %v1021_v30 = vmul.f32 %v3117_v50, %v3351_v11  ;;  %v941_v59 = vmul.f32 %v909_v39, %v3333_v31  ;;  %v881_v48 = vmul.f32 %v849_v51, %v3354_v63  ;;  %v750_v23 = vmul.f32 %v718_v42, %v3351_v11 }
 0x1da   : > { %1595 = vmatprep.mubr.bf16.mxu1 %v1395_v34  ;;  %v1062_v33 = vadd.f32 %v3130_v56, %v1019_v25  ;;  %v1247_v9 = vmul.f32 %v1215_v7, %v3354_v63  ;;  %v1277_v17 = vand.u32 2147483647, %v1245_v10  ;;  %v781_v36 = vadd.f32 %v3156_v5, %v748_v27 }
 0x1db   : > { %v1064_v43 = vadd.f32 %v3130_v56, %v1021_v30  ;;  %v3617_v22 = vadd.f32 %v3402_v41, %v3114_v49  ;;  %v972_v20 = vadd.f32 %v3229_v16, %v939_v21  ;;  %v783_v31 = vadd.f32 %v3156_v5, %v750_v23 }
 0x1dc   : > { %v1094_v32 = vmul.f32 %v1062_v33, %v3344_v45  ;;  %v912_v55 = vadd.f32 %v3217_v4, %v879_v35  ;;  %v1279_v39 = vand.u32 2147483647, %v1247_v9  ;;  %v1309_v38 = vadd.f32 1.0, %v1277_v17 }
 0x1dd   : > { %v1096_v18 = vmul.f32 %v1064_v43, %v3351_v11  ;;  %v2587_v28 = vpop.eup %2586  ;;  %v974_v19 = vadd.f32 %v3229_v16, %v941_v59  ;;  %v813_v51 = vmul.f32 %v781_v36, %v3344_v45  ;;  %v688_v40 = vmul.f32 %v3124_v54, %v3388_v44 }
 0x1de   : > { %v1137_v41 = vadd.f32 %v3145_v0, %v1094_v32  ;;  %v914_v46 = vadd.f32 %v3217_v4, %v881_v48  ;;  %v1311_v24 = vadd.f32 1.0, %v1279_v39  ;;  %2590 = vrcp.f32 %v1309_v38 }
 0x1df   : > { %v2589_v29 = vpop.eup %2588  ;;  %v815_v25 = vmul.f32 %v783_v31, %v3351_v11  ;;  %v1368_v34 = vmul.f32 %v2587_v28, %v972_v20  ;;  %v1139_v35 = vadd.f32 %v3145_v0, %v1096_v18  ;;  %v944_v7 = vmul.f32 %v912_v55, %v3347_v1 }
 0x1e0   : > { %v1370_v21 = vmul.f32 %v2589_v29, %v974_v19  ;;  %v1169_v42 = vmul.f32 %v1137_v41, %v3344_v45  ;;  %2592 = vrcp.f32 %v1311_v24  ;;  %v690_v10 = vmul.f32 %v3124_v54, %v3399_v14 }
 0x1e1   : > { %v721_v27 = vadd.f32 %v3137_v60, %v688_v40  ;;  %v846_v59 = vadd.f32 %v3187_v26, %v813_v51  ;;  %v1171_v48 = vmul.f32 %v1139_v35, %v3351_v11  ;;  %v848_v33 = vadd.f32 %v3187_v26, %v815_v25 }
 0x1e2   : > { %v1394_v30 = vpack.c.bf16 %v1370_v21, %v1368_v34  ;;  %v1212_v23 = vadd.f32 %v3220_v6, %v1169_v42  ;;  %v723_v9 = vadd.f32 %v3137_v60, %v690_v10  ;;  %v1024_v1 = vmul.f32 %v3119_v52, %v3388_v44 }
 0x1e3   : > { %v753_v17 = vmul.f32 %v721_v27, %v3388_v44  ;;  %v946_v36 = vmul.f32 %v914_v46, %v3354_v63  ;;  %v1214_v43 = vadd.f32 %v3220_v6, %v1171_v48  ;;  %v1026_v31 = vmul.f32 %v3119_v52, %v3399_v14 }
 0x1e4   : > { %1596 = vmatmul.mubr.bf16.gmra.mrb[12].mxu1 %v1394_v30  ;;  %v1244_v20 = vmul.f32 %v1212_v23, %v3344_v45  ;;  %v977_v32 = vadd.f32 %v3229_v16, %v944_v7  ;;  %v755_v55 = vmul.f32 %v723_v9, %v3399_v14  ;;  %v1067_v38 = vadd.f32 %v3139_v61, %v1024_v1 }
 0x1e5   : > { %v786_v39 = vadd.f32 %v3156_v5, %v753_v17  ;;  %v878_v18 = vmul.f32 %v846_v59, %v3344_v45  ;;  %v1246_v28 = vmul.f32 %v1214_v43, %v3351_v11  ;;  %v1069_v19 = vadd.f32 %v3139_v61, %v1026_v31 }
 0x1e6   : > { %v1276_v63 = vand.u32 2147483647, %v1244_v20  ;;  %v880_v51 = vmul.f32 %v848_v33, %v3351_v11  ;;  %v788_v41 = vadd.f32 %v3156_v5, %v755_v55  ;;  %v1099_v29 = vmul.f32 %v1067_v38, %v3388_v44 }
 0x1e7   : > { %v818_v40 = vmul.f32 %v786_v39, %v3388_v44  ;;  %v979_v46 = vadd.f32 %v3229_v16, %v946_v36  ;;  %v1278_v24 = vand.u32 2147483647, %v1246_v28  ;;  %v1101_v34 = vmul.f32 %v1069_v19, %v3399_v14 }
 0x1e8   : > { %v1308_v25 = vadd.f32 1.0, %v1276_v63  ;;  %v2591_v21 = vpop.eup %2590  ;;  %v820_v35 = vmul.f32 %v788_v41, %v3399_v14  ;;  %v1142_v7 = vadd.f32 %v3172_v15, %v1099_v29  ;;  %v687_v10 = vmul.f32 %v3124_v54, %v3372_v58 }
 0x1e9   : > { %v851_v42 = vadd.f32 %v3187_v26, %v818_v40  ;;  %v911_v27 = vadd.f32 %v3217_v4, %v878_v18  ;;  %v1310_v30 = vadd.f32 1.0, %v1278_v24  ;;  %v1144_v59 = vadd.f32 %v3172_v15, %v1101_v34 }
 0x1ea   : > { %2594 = vrcp.f32 %v1308_v25  ;;  %v2593_v48 = vpop.eup %2592  ;;  %v1373_v23 = vmul.f32 %v2591_v21, %v977_v32  ;;  %v913_v33 = vadd.f32 %v3217_v4, %v880_v51  ;;  %v1174_v9 = vmul.f32 %v1142_v7, %v3388_v44 }
 0x1eb   : > { %v689_v17 = vmul.f32 %v3124_v54, %v3396_v12  ;;  %v1375_v1 = vmul.f32 %v2593_v48, %v979_v46  ;;  %2596 = vrcp.f32 %v1310_v30  ;;  %v1176_v36 = vmul.f32 %v1144_v59, %v3399_v14 }
 0x1ec   : > { %v720_v43 = vadd.f32 %v3137_v60, %v687_v10  ;;  %v853_v20 = vadd.f32 %v3187_v26, %v820_v35  ;;  %v883_v31 = vmul.f32 %v851_v42, %v3388_v44  ;;  %v1217_v55 = vadd.f32 %v3199_v37, %v1174_v9 }
 0x1ed   : > { %v722_v32 = vadd.f32 %v3137_v60, %v689_v17  ;;  %v1397_v39 = vpack.c.bf16 %v1375_v1, %v1373_v23  ;;  %v1219_v38 = vadd.f32 %v3199_v37, %v1176_v36  ;;  %v1023_v28 = vmul.f32 %v3117_v50, %v3372_v58 }
 0x1ee   : > { %v752_v18 = vmul.f32 %v720_v43, %v3372_v58  ;;  %v943_v63 = vmul.f32 %v911_v27, %v3344_v45  ;;  %v945_v19 = vmul.f32 %v913_v33, %v3351_v11  ;;  %v1249_v51 = vmul.f32 %v1217_v55, %v3388_v44 }
 0x1ef   : > { %v754_v41 = vmul.f32 %v722_v32, %v3396_v12  ;;  %1603 = vmatprep.mubr.bf16.mxu1 %v1397_v39  ;;  %v1251_v40 = vmul.f32 %v1219_v38, %v3399_v14  ;;  %v1025_v46 = vmul.f32 %v3117_v50, %v3396_v12  ;;  %v1066_v24 = vadd.f32 %v3130_v56, %v1023_v28 }
 0x1f0   : > { %v785_v29 = vadd.f32 %v3156_v5, %v752_v18  ;;  %v885_v25 = vmul.f32 %v853_v20, %v3399_v14  ;;  %v916_v45 = vadd.f32 %v3217_v4, %v883_v31  ;;  %v1281_v34 = vand.u32 2147483647, %v1249_v51 }
 0x1f1   : > { %v787_v11 = vadd.f32 %v3156_v5, %v754_v41  ;;  %v1283_v21 = vand.u32 2147483647, %v1251_v40  ;;  %v1068_v42 = vadd.f32 %v3130_v56, %v1025_v46  ;;  %v1098_v7 = vmul.f32 %v1066_v24, %v3372_v58 }
 0x1f2   : > { %v817_v35 = vmul.f32 %v785_v29, %v3372_v58  ;;  %v976_v10 = vadd.f32 %v3229_v16, %v943_v63  ;;  %v978_v27 = vadd.f32 %v3229_v16, %v945_v19  ;;  %v1313_v30 = vadd.f32 1.0, %v1281_v34 }
 0x1f3   : > { %v692_v59 = vmul.f32 %v3124_v54, %v3458_v57  ;;  %v1315_v23 = vadd.f32 1.0, %v1283_v21  ;;  %v819_v33 = vmul.f32 %v787_v11, %v3396_v12  ;;  %v1100_v9 = vmul.f32 %v1068_v42, %v3396_v12 }
 0x1f4   : > { %v2595_v48 = vpop.eup %2594  ;;  %v1141_v17 = vadd.f32 %v3145_v0, %v1098_v7  ;;  %v918_v1 = vadd.f32 %v3217_v4, %v885_v25  ;;  %v948_v36 = vmul.f32 %v916_v45, %v3388_v44  ;;  %2598 = vrcp.f32 %v1313_v30 }
 0x1f5   : > { %v694_v43 = vmul.f32 %v3124_v54, %v3617_v22  ;;  %v2597_v20 = vpop.eup %2596  ;;  %2600 = vrcp.f32 %v1315_v23  ;;  %v850_v31 = vadd.f32 %v3187_v26, %v817_v35  ;;  %v1143_v55 = vadd.f32 %v3145_v0, %v1100_v9 }
 0x1f6   : > { %v1173_v32 = vmul.f32 %v1141_v17, %v3372_v58  ;;  %v1372_v39 = vmul.f32 %v2595_v48, %v976_v10  ;;  %v1374_v38 = vmul.f32 %v2597_v20, %v978_v27  ;;  %v725_v18 = vadd.f32 %v3137_v60, %v692_v59 }
 0x1f7   : > { %v727_v28 = vadd.f32 %v3137_v60, %v694_v43  ;;  %v852_v44 = vadd.f32 %v3187_v26, %v819_v33  ;;  %v1175_v63 = vmul.f32 %v1143_v55, %v3396_v12  ;;  %v1028_v51 = vmul.f32 %v3119_v52, %v3458_v57 }
 0x1f8   : > { %v1216_v19 = vadd.f32 %v3220_v6, %v1173_v32  ;;  %v1396_v41 = vpack.c.bf16 %v1374_v38, %v1372_v39  ;;  %v950_v40 = vmul.f32 %v918_v1, %v3399_v14  ;;  %v757_v29 = vmul.f32 %v725_v18, %v3458_v57 }
 0x1f9   : > { %v759_v46 = vmul.f32 %v727_v28, %v3617_v22  ;;  %v3725_v24 = vadd.f32 %v3426_v8, %v3114_v49  ;;  %v1218_v25 = vadd.f32 %v3220_v6, %v1175_v63  ;;  %v1030_v34 = vmul.f32 %v3119_v52, %v3617_v22 }
 0x1fa   : > { %v1248_v45 = vmul.f32 %v1216_v19, %v3372_v58  ;;  %1604 = vmatmul.mubr.bf16.gmra.mrb[16].mxu1 %v1396_v41  ;;  %v882_v11 = vmul.f32 %v850_v31, %v3372_v58  ;;  %v790_v14 = vadd.f32 %v3156_v5, %v757_v29  ;;  %v1071_v35 = vadd.f32 %v3139_v61, %v1028_v51 }
 0x1fb   : > { %v792_v21 = vadd.f32 %v3156_v5, %v759_v46  ;;  %v884_v42 = vmul.f32 %v852_v44, %v3396_v12  ;;  %v1250_v8 = vmul.f32 %v1218_v25, %v3396_v12  ;;  %v1073_v10 = vadd.f32 %v3139_v61, %v1030_v34 }
 0x1fc   : > { %v1280_v7 = vand.u32 2147483647, %v1248_v45  ;;  %v981_v27 = vadd.f32 %v3229_v16, %v948_v36  ;;  %v983_v30 = vadd.f32 %v3229_v16, %v950_v40  ;;  %v822_v59 = vmul.f32 %v790_v14, %v3458_v57 }
 0x1fd   : > { %v1103_v48 = vmul.f32 %v1071_v35, %v3458_v57  ;;  %v1282_v23 = vand.u32 2147483647, %v1250_v8  ;;  %v1105_v9 = vmul.f32 %v1073_v10, %v3617_v22  ;;  %v691_v17 = vmul.f32 %v3124_v54, %v3429_v53 }
 0x1fe   : > { %v1312_v33 = vadd.f32 1.0, %v1280_v7  ;;  %v2599_v1 = vpop.eup %2598  ;;  %v915_v43 = vadd.f32 %v3217_v4, %v882_v11  ;;  %v824_v20 = vmul.f32 %v792_v21, %v3617_v22  ;;  %v693_v31 = vmul.f32 %v3124_v54, %v3470_v2 }
 0x1ff   : > { %v1146_v36 = vadd.f32 %v3172_v15, %v1103_v48  ;;  %v2601_v55 = vpop.eup %2600  ;;  %v917_v32 = vadd.f32 %v3217_v4, %v884_v42  ;;  %v1314_v39 = vadd.f32 1.0, %v1282_v23  ;;  %v1148_v38 = vadd.f32 %v3172_v15, %v1105_v9 }
 0x200   : > { %2602 = vrcp.f32 %v1312_v33  ;;  %v1377_v18 = vmul.f32 %v2599_v1, %v981_v27  ;;  %v1379_v28 = vmul.f32 %v2601_v55, %v983_v30  ;;  %v855_v44 = vadd.f32 %v3187_v26, %v822_v59 }
 0x201   : > { %v1178_v63 = vmul.f32 %v1146_v36, %v3458_v57  ;;  %2604 = vrcp.f32 %v1314_v39  ;;  %v1180_v19 = vmul.f32 %v1148_v38, %v3617_v22  ;;  %v724_v51 = vadd.f32 %v3137_v60, %v691_v17 }
 0x202   : > { %v726_v41 = vadd.f32 %v3137_v60, %v693_v31  ;;  %v1399_v40 = vpack.c.bf16 %v1379_v28, %v1377_v18  ;;  %v947_v29 = vmul.f32 %v915_v43, %v3372_v58  ;;  %v857_v46 = vadd.f32 %v3187_v26, %v824_v20 }
 0x203   : > { %v1221_v25 = vadd.f32 %v3199_v37, %v1178_v63  ;;  %v1223_v45 = vadd.f32 %v3199_v37, %v1180_v19  ;;  %v756_v34 = vmul.f32 %v724_v51, %v3429_v53  ;;  %v1027_v14 = vmul.f32 %v3117_v50, %v3429_v53 }
 0x204   : > { %v758_v11 = vmul.f32 %v726_v41, %v3470_v2  ;;  %v3767_v21 = vadd.f32 %v3438_v3, %v3114_v49  ;;  %1611 = vmatprep.mubr.bf16.mxu1 %v1399_v40  ;;  %v887_v58 = vmul.f32 %v855_v44, %v3458_v57  ;;  %v1029_v42 = vmul.f32 %v3117_v50, %v3470_v2 }
 0x205   : > { %v1253_v35 = vmul.f32 %v1221_v25, %v3458_v57  ;;  %v1255_v8 = vmul.f32 %v1223_v45, %v3617_v22  ;;  %v789_v7 = vadd.f32 %v3156_v5, %v756_v34  ;;  %v1070_v27 = vadd.f32 %v3130_v56, %v1027_v14 }
 0x206   : > { %v791_v10 = vadd.f32 %v3156_v5, %v758_v11  ;;  %v949_v30 = vmul.f32 %v917_v32, %v3396_v12  ;;  %v980_v49 = vadd.f32 %v3229_v16, %v947_v29  ;;  %v1072_v59 = vadd.f32 %v3130_v56, %v1029_v42 }
 0x207   : > { %v1285_v3 = vand.u32 2147483647, %v1253_v35  ;;  %v889_v48 = vmul.f32 %v857_v46, %v3617_v22  ;;  %v1287_v23 = vand.u32 2147483647, %v1255_v8  ;;  %v821_v33 = vmul.f32 %v789_v7, %v3429_v53 }
 0x208   : > { %v1102_v9 = vmul.f32 %v1070_v27, %v3429_v53  ;;  %v1104_v1 = vmul.f32 %v1072_v59, %v3470_v2  ;;  %v696_v43 = vmul.f32 %v3124_v54, %v3725_v24  ;;  %v698_v12 = vmul.f32 %v3124_v54, %v3767_v21 }
 0x209   : > { %v1317_v17 = vadd.f32 1.0, %v1285_v3  ;;  %v920_v36 = vadd.f32 %v3217_v4, %v887_v58  ;;  %v1319_v31 = vadd.f32 1.0, %v1287_v23  ;;  %v823_v55 = vmul.f32 %v791_v10, %v3470_v2 }
 0x20a   : > { %v2603_v20 = vpop.eup %2602  ;;  %v1145_v32 = vadd.f32 %v3145_v0, %v1102_v9  ;;  %v982_v39 = vadd.f32 %v3229_v16, %v949_v30  ;;  %v1147_v38 = vadd.f32 %v3145_v0, %v1104_v1  ;;  %v729_v18 = vadd.f32 %v3137_v60, %v696_v43 }
 0x20b   : > { %2606 = vrcp.f32 %v1317_v17  ;;  %v2605_v28 = vpop.eup %2604  ;;  %v922_v44 = vadd.f32 %v3217_v4, %v889_v48  ;;  %v854_v63 = vadd.f32 %v3187_v26, %v821_v33  ;;  %v1376_v51 = vmul.f32 %v2603_v20, %v980_v49 }
 0x20c   : > { %2608 = vrcp.f32 %v1319_v31  ;;  %v1177_v19 = vmul.f32 %v1145_v32, %v3429_v53  ;;  %v1378_v41 = vmul.f32 %v2605_v28, %v982_v39  ;;  %v1179_v40 = vmul.f32 %v1147_v38, %v3470_v2 }
 0x20d   : > { %v731_v29 = vadd.f32 %v3137_v60, %v698_v12  ;;  %v952_v46 = vmul.f32 %v920_v36, %v3458_v57  ;;  %v856_v25 = vadd.f32 %v3187_v26, %v823_v55  ;;  %v1032_v34 = vmul.f32 %v3119_v52, %v3725_v24 }
 0x20e   : > { %v1220_v45 = vadd.f32 %v3220_v6, %v1177_v19  ;;  %v1398_v11 = vpack.c.bf16 %v1378_v41, %v1376_v51  ;;  %v1222_v14 = vadd.f32 %v3220_v6, %v1179_v40  ;;  %v761_v58 = vmul.f32 %v729_v18, %v3725_v24 }
 0x20f   : > { %v763_v35 = vmul.f32 %v731_v29, %v3767_v21  ;;  %v3809_v42 = vadd.f32 %v3420_v62, %v3109_v47  ;;  %v3813_v57 = vadd.f32 %v3433_v13, %v3109_v47  ;;  %v1034_v7 = vmul.f32 %v3119_v52, %v3767_v21 }
 0x210   : > { %v1252_v8 = vmul.f32 %v1220_v45, %v3429_v53  ;;  %1612 = vmatmul.mubr.bf16.gmra.mrb[20].mxu1 %v1398_v11  ;;  %v954_v10 = vmul.f32 %v922_v44, %v3617_v22  ;;  %v886_v27 = vmul.f32 %v854_v63, %v3429_v53  ;;  %v1254_v30 = vmul.f32 %v1222_v14, %v3470_v2 }
 0x211   : > { %v1075_v49 = vadd.f32 %v3139_v61, %v1032_v34  ;;  %v985_v62 = vadd.f32 %v3229_v16, %v952_v46  ;;  %v888_v3 = vmul.f32 %v856_v25, %v3470_v2  ;;  %v1077_v13 = vadd.f32 %v3139_v61, %v1034_v7 }
 0x212   : > { %v1284_v47 = vand.u32 2147483647, %v1252_v8  ;;  %v1286_v59 = vand.u32 2147483647, %v1254_v30  ;;  %v794_v48 = vadd.f32 %v3156_v5, %v761_v58  ;;  %v796_v52 = vadd.f32 %v3156_v5, %v763_v35 }
 0x213   : > { %v1107_v22 = vmul.f32 %v1075_v49, %v3725_v24  ;;  %v1109_v33 = vmul.f32 %v1077_v13, %v3767_v21  ;;  %v695_v9 = vmul.f32 %v3124_v54, %v3809_v42  ;;  %v697_v17 = vmul.f32 %v3124_v54, %v3813_v57 }
 0x214   : > { %v1316_v23 = vadd.f32 1.0, %v1284_v47  ;;  %v987_v43 = vadd.f32 %v3229_v16, %v954_v10  ;;  %v919_v61 = vadd.f32 %v3217_v4, %v886_v27  ;;  %v1318_v12 = vadd.f32 1.0, %v1286_v59 }
 0x215   : > { %v2607_v1 = vpop.eup %2606  ;;  %v1150_v20 = vadd.f32 %v3172_v15, %v1107_v22  ;;  %v921_v31 = vadd.f32 %v3217_v4, %v888_v3  ;;  %v1152_v55 = vadd.f32 %v3172_v15, %v1109_v33  ;;  %v728_v32 = vadd.f32 %v3137_v60, %v695_v9 }
 0x216   : > { %v2609_v36 = vpop.eup %2608  ;;  %2610 = vrcp.f32 %v1316_v23  ;;  %v1381_v39 = vmul.f32 %v2607_v1, %v985_v62  ;;  %v826_v54 = vmul.f32 %v794_v48, %v3725_v24  ;;  %v828_v18 = vmul.f32 %v796_v52, %v3767_v21 }
 0x217   : > { %v1383_v38 = vmul.f32 %v2609_v36, %v987_v43  ;;  %2612 = vrcp.f32 %v1318_v12  ;;  %v1182_v28 = vmul.f32 %v1150_v20, %v3725_v24  ;;  %v1184_v44 = vmul.f32 %v1152_v55, %v3767_v21 }
 0x218   : > { %v730_v63 = vadd.f32 %v3137_v60, %v697_v17  ;;  %v760_v51 = vmul.f32 %v728_v32, %v3809_v42  ;;  %v1031_v15 = vmul.f32 %v3117_v50, %v3809_v42  ;;  %v951_v46 = vmul.f32 %v919_v61, %v3429_v53 }
 0x219   : > { %v1401_v19 = vpack.c.bf16 %v1383_v38, %v1381_v39  ;;  %v1225_v41 = vadd.f32 %v3199_v37, %v1182_v28  ;;  %v1227_v40 = vadd.f32 %v3199_v37, %v1184_v44  ;;  %v953_v25 = vmul.f32 %v921_v31, %v3470_v2 }
 0x21a   : > { %v762_v29 = vmul.f32 %v730_v63, %v3813_v57  ;;  %v1033_v60 = vmul.f32 %v3117_v50, %v3813_v57  ;;  %v1074_v45 = vadd.f32 %v3130_v56, %v1031_v15  ;;  %v859_v34 = vadd.f32 %v3187_v26, %v826_v54 }
 0x21b   : > { %1619 = vmatprep.mubr.bf16.mxu1 %v1401_v19  ;;  %v861_v11 = vadd.f32 %v3187_v26, %v828_v18  ;;  %v1257_v14 = vmul.f32 %v1225_v41, %v3725_v24  ;;  %v1259_v37 = vmul.f32 %v1227_v40, %v3767_v21  ;;  %v793_v58 = vadd.f32 %v3156_v5, %v760_v51 }
 0x21c   : > { %v1076_v35 = vadd.f32 %v3130_v56, %v1033_v60  ;;  %v1106_v53 = vmul.f32 %v1074_v45, %v3809_v42  ;;  %v795_v50 = vadd.f32 %v3156_v5, %v762_v29  ;;  %v984_v7 = vadd.f32 %v3229_v16, %v951_v46 }
 0x21d   : > { %v1289_v2 = vand.u32 2147483647, %v1257_v14  ;;  %v1291_v8 = vand.u32 2147483647, %v1259_v37  ;;  %v986_v10 = vadd.f32 %v3229_v16, %v953_v25  ;;  %v891_v62 = vmul.f32 %v859_v34, %v3725_v24 }
 0x21e   : > { %v1108_v27 = vmul.f32 %v1076_v35, %v3813_v57  ;;  %v1149_v30 = vadd.f32 %v3145_v0, %v1106_v53  ;;  %v893_v3 = vmul.f32 %v861_v11, %v3767_v21  ;;  %v825_v59 = vmul.f32 %v793_v58, %v3809_v42 }
 0x21f   : > { %v1321_v56 = vadd.f32 1.0, %v1289_v2  ;;  %v1323_v47 = vadd.f32 1.0, %v1291_v8  ;;  %v827_v23 = vmul.f32 %v795_v50, %v3813_v57  ;;  %v924_v1 = vadd.f32 %v3217_v4, %v891_v62  ;;  %v3910_v8 = vld [vmem:[%s4253_s7 + $0x2] ss:$0 sm:$0xff] }
 0x220   : > { %v2611_v49 = vpop.eup %2610  ;;  %v1151_v5 = vadd.f32 %v3145_v0, %v1108_v27  ;;  %v1181_v48 = vmul.f32 %v1149_v30, %v3809_v42  ;;  %v926_v43 = vadd.f32 %v3217_v4, %v893_v3  ;;  %v858_v12 = vadd.f32 %v3187_v26, %v825_v59 }
 0x221   : > { %v2613_v13 = vpop.eup %2612  ;;  %v1380_v52 = vmul.f32 %v2611_v49, %v984_v7  ;;  %2614 = vrcp.f32 %v1321_v56  ;;  %v860_v20 = vadd.f32 %v3187_v26, %v827_v23  ;;  %v956_v55 = vmul.f32 %v924_v1, %v3725_v24  ;;  %v3924_v56 = vld [vmem:[%s4253_s7 + $0x1] ss:$0 sm:$0xff] }
 0x222   : > { %v1382_v22 = vmul.f32 %v2613_v13, %v986_v10  ;;  %2616 = vrcp.f32 %v1323_v47  ;;  %v1183_v33 = vmul.f32 %v1151_v5, %v3813_v57  ;;  %v1224_v9 = vadd.f32 %v3220_v6, %v1181_v48 }
 0x223   : > { %v958_v32 = vmul.f32 %v926_v43, %v3767_v21  ;;  %v890_v54 = vmul.f32 %v858_v12, %v3809_v42  ;;  %v989_v44 = vadd.f32 %v3229_v16, %v956_v55  ;;  %v3904_v58 = vstv %s2271_s23 }
 0x224   : > { %v1400_v17 = vpack.c.bf16 %v1382_v22, %v1380_v52  ;;  %v1226_v61 = vadd.f32 %v3220_v6, %v1183_v33  ;;  %v1256_v0 = vmul.f32 %v1224_v9, %v3809_v42  ;;  %v892_v6 = vmul.f32 %v860_v20, %v3813_v57  ;;  %v3935_v9 = vld [vmem:[%s4253_s7] ss:$0 sm:$0xff] }
 0x225   : > { %v991_v26 = vadd.f32 %v3229_v16, %v958_v32  ;;  %v923_v24 = vadd.f32 %v3217_v4, %v890_v54  ;;  %v3912_v50 = vstv %s2270_s26  ;;  %v3926_v47 = vstv %s2269_s20  ;;  %s2267_s26 = sld [smem:[#allocation2 + $0x7]]  ;;  %s2098_s20 = sshll.u32 %s3973_s27, 4  ;;  %s4202_s20 = int_to_ptr.vmem [resolvable:$true] %s2098_s20 }
 0x226   : > { %1620 = vmatmul.mubr.bf16.gmra.mrb[24].mxu1 %v1400_v17  ;;  %v1258_v36 = vmul.f32 %v1226_v61, %v3813_v57  ;;  %v1288_v31 = vand.u32 2147483647, %v1256_v0  ;;  %v925_v21 = vadd.f32 %v3217_v4, %v892_v6  ;;  %v3897_v4 = vld [vmem:[%s4252_s6] ss:$0 sm:$0xff]  ;;  %p2760_p1 = scmp.lt.s32.totalorder %s4202_s20, %s2758_s11 }
 0x227   : > { %v955_v41 = vmul.f32 %v923_v24, %v3809_v42 }
 0x228   : > { %v1290_v39 = vand.u32 2147483647, %v1258_v36  ;;  %v1320_v38 = vadd.f32 1.0, %v1288_v31  ;;  %v957_v40 = vmul.f32 %v925_v21, %v3813_v57  ;;  %v3940_v36 = vstv %s2268_s25  ;;  %s2753_s25 = scalar_lea.vmem %s4202_s20, 1024 }
 0x229   : > { %v988_v46 = vadd.f32 %v3229_v16, %v955_v41  ;;  %p2754_p3 = scmp.ne.s32.totalorder %s4202_s20, %s2753_s25  ;;  %p2761_p4 = scmp.lt.s32.totalorder %s2759_s13, %s2753_s25 }
 0x22a   : > { %v1322_v18 = vadd.f32 1.0, %v1290_v39  ;;  %2618 = vrcp.f32 %v1320_v38  ;;  %v990_v25 = vadd.f32 %v3229_v16, %v957_v40  ;;  %v3902_v16 = vld [vmem:[%s4253_s7 + $0x3] ss:$0 sm:$0xff] }
 0x22b   : > { %v2615_v28 = vpop.eup %2614  ;;  %p2755_p5 = pnand %p2754_p3, %p3021_p7  ;;  %p2762_p6 = por %p2761_p4, %p2760_p1 }
 0x22c   : > { %v2617_v63 = vpop.eup %2616  ;;  %2620 = vrcp.f32 %v1322_v18  ;;  %v1385_v19 = vmul.f32 %v2615_v28, %v989_v44 }
 0x22d   : > { %v1387_v51 = vmul.f32 %v2617_v63, %v991_v26  ;;  %v3945_v63 = vstv %s2267_s26  ;;  %p2756_p9 = pneg %p2755_p5 }
 0x22f   : > { %v1403_v15 = vpack.c.bf16 %v1387_v51, %v1385_v19  ;;  %p2763_p12 = pnand %p2762_p6, %p2756_p9 }
 0x231   : > { %1627 = vmatprep.mubr.bf16.mxu1 %v1403_v15 }
 0x234   : > { %v2619_v29 = vpop.eup %2618 }
 0x235   : > { %v1384_v45 = vmul.f32 %v2619_v29, %v988_v46 }
 0x236   : > { %v2621_v60 = vpop.eup %2620 }
 0x237   : > { %v1386_v34 = vmul.f32 %v2621_v60, %v990_v25  ;;  %v3949_v25 = vstv %s2266_s14 }
 0x239   : > { %v1402_v11 = vpack.c.bf16 %v1386_v34, %v1384_v45 }
 0x23b   : > { %1628 = vmatmul.mubr.bf16.gmra.mrb[28].mxu1 %v1402_v11 }
 0x270   : > { %v2378_v14 = vpop.f32.mrb[0].mxu1 }
 0x271   : > { %v2379_v42 = vpop.f32.mrb[1].mxu1 }
 0x272   : > { %v2380_v57 = vadd.f32 %v2379_v42, %v2378_v14  ;;  %v2381_v37 = vpop.f32.mrb[2].mxu1 }
 0x273   : > { %v2382_v35 = vpop.f32.mrb[3].mxu1 }
 0x274   : > { %v1574_v53 = vadd.f32 %v2380_v57, %v3897_v4  ;;  %v2383_v2 = vadd.f32 %v2382_v35, %v2381_v37 }
 0x276   : > { %v1647_v7 = vmul.f32 %v3904_v58, %v1574_v53  ;;  %v1816_v10 = vmul.f32 %v3902_v16, %v1574_v53  ;;  %v1577_v27 = vadd.f32 %v2383_v2, %v3897_v4 }
 0x278   : > { %v1664_v30 = vadd.f32 %v3912_v50, %v1647_v7  ;;  %v1836_v49 = vadd.f32 %v3910_v8, %v1816_v10  ;;  %v1648_v62 = vmul.f32 %v3904_v58, %v1577_v27  ;;  %v1817_v3 = vmul.f32 %v3902_v16, %v1577_v27 }
 0x27a   : > { %v1680_v13 = vmul.f32 %v1664_v30, %v1574_v53  ;;  %v1852_v59 = vmul.f32 %v1836_v49, %v1574_v53  ;;  %v1665_v5 = vadd.f32 %v3912_v50, %v1648_v62  ;;  %v1837_v48 = vadd.f32 %v3910_v8, %v1817_v3 }
 0x27c   : > { %v1697_v52 = vadd.f32 %v3926_v47, %v1680_v13  ;;  %v1872_v22 = vadd.f32 %v3924_v56, %v1852_v59  ;;  %v1681_v23 = vmul.f32 %v1665_v5, %v1577_v27  ;;  %v1853_v33 = vmul.f32 %v1837_v48, %v1577_v27 }
 0x27e   : > { %v1888_v17 = vmul.f32 %v1872_v22, %v1574_v53  ;;  %v1698_v1 = vadd.f32 %v3926_v47, %v1681_v23  ;;  %v1873_v43 = vadd.f32 %v3924_v56, %v1853_v33  ;;  %v1713_v61 = vmul.f32 %v1697_v52, %v1574_v53 }
 0x280   : > { %v1908_v0 = vadd.f32 %v3935_v9, %v1888_v17  ;;  %v1714_v12 = vmul.f32 %v1698_v1, %v1577_v27  ;;  %v1889_v20 = vmul.f32 %v1873_v43, %v1577_v27  ;;  %v1730_v32 = vadd.f32 %v3940_v36, %v1713_v61 }
 0x282   : > { %v1924_v31 = vmul.f32 %v1908_v0, %v1574_v53  ;;  %v1909_v55 = vadd.f32 %v3935_v9, %v1889_v20  ;;  %v1731_v38 = vadd.f32 %v3940_v36, %v1714_v12  ;;  %v1746_v28 = vmul.f32 %v1730_v32, %v1574_v53 }
 0x284   : > { %v1940_v39 = vand.u32 2147483647, %v1924_v31  ;;  %v1925_v54 = vmul.f32 %v1909_v55, %v1577_v27  ;;  %v1747_v44 = vmul.f32 %v1731_v38, %v1577_v27  ;;  %v1763_v19 = vadd.f32 %v3945_v63, %v1746_v28 }
 0x286   : > { %v1956_v6 = vadd.f32 1.0, %v1940_v39  ;;  %v1941_v18 = vand.u32 2147483647, %v1925_v54  ;;  %v1764_v51 = vadd.f32 %v3945_v63, %v1747_v44  ;;  %v1779_v40 = vmul.f32 %v1763_v19, %v1574_v53 }
 0x288   : > { %v1957_v26 = vadd.f32 1.0, %v1941_v18  ;;  %2622 = vrcp.f32 %v1956_v6  ;;  %v1780_v29 = vmul.f32 %v1764_v51, %v1577_v27  ;;  %v1796_v37 = vadd.f32 %v3949_v25, %v1779_v40 }
 0x28a   : > { %2624 = vrcp.f32 %v1957_v26  ;;  %v1797_v35 = vadd.f32 %v3949_v25, %v1780_v29 }
 0x28d   : > { %v2384_v24 = vpop.f32.mrb[4].mxu1 }
 0x28e   : > { %v2385_v21 = vpop.f32.mrb[5].mxu1 }
 0x28f   : > { %v2386_v15 = vadd.f32 %v2385_v21, %v2384_v24  ;;  %v2387_v41 = vpop.f32.mrb[6].mxu1 }
 0x290   : > { %v2388_v46 = vpop.f32.mrb[7].mxu1 }
 0x291   : > { %v3952_v60 = vadd.f32 %v2386_v15, %v3897_v4  ;;  %v2389_v45 = vadd.f32 %v2388_v46, %v2387_v41 }
 0x292   : > { %v2623_v34 = vpop.eup %2622 }
 0x293   : > { %v1649_v11 = vmul.f32 %v3904_v58, %v3952_v60  ;;  %v1818_v14 = vmul.f32 %v3902_v16, %v3952_v60  ;;  %v1585_v42 = vadd.f32 %v2389_v45, %v3897_v4  ;;  %v1988_v27 = vmul.f32 %v2623_v34, %v1796_v37 }
 0x294   : > { %v2625_v57 = vpop.eup %2624 }
 0x295   : > { %v1666_v53 = vadd.f32 %v3912_v50, %v1649_v11  ;;  %v1838_v2 = vadd.f32 %v3910_v8, %v1818_v14  ;;  %v1650_v7 = vmul.f32 %v3904_v58, %v1585_v42  ;;  %v1819_v10 = vmul.f32 %v3902_v16, %v1585_v42 }
 0x296   : > { %v1989_v30 = vmul.f32 %v2625_v57, %v1797_v35 }
 0x297   : > { %v1682_v49 = vmul.f32 %v1666_v53, %v3952_v60  ;;  %v1854_v62 = vmul.f32 %v1838_v2, %v3952_v60  ;;  %v1667_v3 = vadd.f32 %v3912_v50, %v1650_v7  ;;  %v1839_v13 = vadd.f32 %v3910_v8, %v1819_v10 }
 0x298   : > { %v2318_v59 = vpack.c.bf16 %v1989_v30, %v1988_v27 }
 0x299   : > { %v1699_v5 = vadd.f32 %v3926_v47, %v1682_v49  ;;  %v1874_v48 = vadd.f32 %v3924_v56, %v1854_v62  ;;  %v1683_v52 = vmul.f32 %v1667_v3, %v1585_v42  ;;  %v1855_v22 = vmul.f32 %v1839_v13, %v1585_v42 }
 0x29a   : > { %2319 = vst [vmem:[%s3973_s27] sm:$0xff] %v2318_v59  }
 0x29b   : > { %v1890_v23 = vmul.f32 %v1874_v48, %v3952_v60  ;;  %v1700_v33 = vadd.f32 %v3926_v47, %v1683_v52  ;;  %v1875_v17 = vadd.f32 %v3924_v56, %v1855_v22  ;;  %v1715_v1 = vmul.f32 %v1699_v5, %v3952_v60 }
 0x29d   : > { %v1910_v43 = vadd.f32 %v3935_v9, %v1890_v23  ;;  %v1716_v61 = vmul.f32 %v1700_v33, %v1585_v42  ;;  %v1891_v0 = vmul.f32 %v1875_v17, %v1585_v42  ;;  %v1732_v31 = vadd.f32 %v3940_v36, %v1715_v1 }
 0x29f   : > { %v1926_v12 = vmul.f32 %v1910_v43, %v3952_v60  ;;  %v1911_v20 = vadd.f32 %v3935_v9, %v1891_v0  ;;  %v1733_v32 = vadd.f32 %v3940_v36, %v1716_v61  ;;  %v1748_v19 = vmul.f32 %v1732_v31, %v3952_v60 }
 0x2a1   : > { %v1942_v55 = vand.u32 2147483647, %v1926_v12  ;;  %v1927_v39 = vmul.f32 %v1911_v20, %v1585_v42  ;;  %v2390_v38 = vpop.f32.mrb[8].mxu1  ;;  %v1749_v51 = vmul.f32 %v1733_v32, %v1585_v42  ;;  %v1765_v46 = vadd.f32 %v3945_v63, %v1748_v19 }
 0x2a2   : > { %v2391_v54 = vpop.f32.mrb[9].mxu1 }
 0x2a3   : > { %v1958_v6 = vadd.f32 1.0, %v1942_v55  ;;  %v1943_v18 = vand.u32 2147483647, %v1927_v39  ;;  %v2393_v28 = vpop.f32.mrb[10].mxu1  ;;  %v2392_v44 = vadd.f32 %v2391_v54, %v2390_v38  ;;  %v1766_v45 = vadd.f32 %v3945_v63, %v1749_v51 }
 0x2a4   : > { %v2394_v26 = vpop.f32.mrb[11].mxu1  ;;  %v1781_v7 = vmul.f32 %v1765_v46, %v3952_v60 }
 0x2a5   : > { %v1959_v24 = vadd.f32 1.0, %v1943_v18  ;;  %2626 = vrcp.f32 %v1958_v6  ;;  %v3987_v21 = vadd.f32 %v2392_v44, %v3897_v4  ;;  %v2395_v15 = vadd.f32 %v2394_v26, %v2393_v28 }
 0x2a6   : > { %v1782_v10 = vmul.f32 %v1766_v45, %v1585_v42  ;;  %v1798_v52 = vadd.f32 %v3949_v25, %v1781_v7 }
 0x2a7   : > { %2628 = vrcp.f32 %v1959_v24  ;;  %v1651_v41 = vmul.f32 %v3904_v58, %v3987_v21  ;;  %v1820_v40 = vmul.f32 %v3902_v16, %v3987_v21  ;;  %v3994_v29 = vadd.f32 %v2395_v15, %v3897_v4 }
 0x2a8   : > { %v1799_v60 = vadd.f32 %v3949_v25, %v1782_v10 }
 0x2a9   : > { %v1668_v34 = vadd.f32 %v3912_v50, %v1651_v41  ;;  %v1840_v11 = vadd.f32 %v3910_v8, %v1820_v40  ;;  %v1652_v14 = vmul.f32 %v3904_v58, %v3994_v29  ;;  %v1821_v57 = vmul.f32 %v3902_v16, %v3994_v29 }
 0x2ab   : > { %v1684_v37 = vmul.f32 %v1668_v34, %v3987_v21  ;;  %v1856_v35 = vmul.f32 %v1840_v11, %v3987_v21  ;;  %v1669_v53 = vadd.f32 %v3912_v50, %v1652_v14  ;;  %v1841_v2 = vadd.f32 %v3910_v8, %v1821_v57 }
 0x2ad   : > { %v1701_v27 = vadd.f32 %v3926_v47, %v1684_v37  ;;  %v1876_v30 = vadd.f32 %v3924_v56, %v1856_v35  ;;  %v1685_v49 = vmul.f32 %v1669_v53, %v3994_v29  ;;  %v1857_v62 = vmul.f32 %v1841_v2, %v3994_v29 }
 0x2af   : > { %v2627_v3 = vpop.eup %2626  ;;  %v1892_v13 = vmul.f32 %v1876_v30, %v3987_v21  ;;  %v1702_v59 = vadd.f32 %v3926_v47, %v1685_v49  ;;  %v1877_v5 = vadd.f32 %v3924_v56, %v1857_v62  ;;  %v1717_v42 = vmul.f32 %v1701_v27, %v3987_v21 }
 0x2b0   : > { %v1990_v17 = vmul.f32 %v2627_v3, %v1798_v52 }
 0x2b1   : > { %v2629_v48 = vpop.eup %2628  ;;  %v1912_v22 = vadd.f32 %v3935_v9, %v1892_v13  ;;  %v1718_v23 = vmul.f32 %v1702_v59, %v3994_v29  ;;  %v1893_v33 = vmul.f32 %v1877_v5, %v3994_v29  ;;  %v1734_v12 = vadd.f32 %v3940_v36, %v1717_v42 }
 0x2b2   : > { %v1991_v1 = vmul.f32 %v2629_v48, %v1799_v60 }
 0x2b3   : > { %v1928_v43 = vmul.f32 %v1912_v22, %v3987_v21  ;;  %v1913_v61 = vadd.f32 %v3935_v9, %v1893_v33  ;;  %v1735_v31 = vadd.f32 %v3940_v36, %v1718_v23  ;;  %v1750_v44 = vmul.f32 %v1734_v12, %v3987_v21 }
 0x2b4   : > { %v2323_v0 = vpack.c.bf16 %v1991_v1, %v1990_v17 }
 0x2b5   : > { %v1944_v20 = vand.u32 2147483647, %v1928_v43  ;;  %v1929_v55 = vmul.f32 %v1913_v61, %v3994_v29  ;;  %v1751_v26 = vmul.f32 %v1735_v31, %v3994_v29  ;;  %v1767_v46 = vadd.f32 %v3945_v63, %v1750_v44 }
 0x2b6   : > { %2355 = vst [vmem:[%s3973_s27 + $0x8] sm:$0xff] %v2323_v0  }
 0x2b7   : > { %v2396_v32 = vpop.f32.mrb[12].mxu1  ;;  %v1960_v38 = vadd.f32 1.0, %v1944_v20  ;;  %v1945_v54 = vand.u32 2147483647, %v1929_v55  ;;  %v1768_v45 = vadd.f32 %v3945_v63, %v1751_v26  ;;  %v1783_v7 = vmul.f32 %v1767_v46, %v3987_v21 }
 0x2b8   : > { %v2397_v39 = vpop.f32.mrb[13].mxu1 }
 0x2b9   : > { %v2399_v6 = vpop.f32.mrb[14].mxu1  ;;  %v2398_v18 = vadd.f32 %v2397_v39, %v2396_v32  ;;  %v1961_v19 = vadd.f32 1.0, %v1945_v54  ;;  %2630 = vrcp.f32 %v1960_v38  ;;  %v1784_v10 = vmul.f32 %v1768_v45, %v3994_v29 }
 0x2ba   : > { %v2400_v28 = vpop.f32.mrb[15].mxu1  ;;  %v1800_v52 = vadd.f32 %v3949_v25, %v1783_v7 }
 0x2bb   : > { %v4031_v51 = vadd.f32 %v2398_v18, %v3897_v4  ;;  %v2401_v24 = vadd.f32 %v2400_v28, %v2399_v6  ;;  %2632 = vrcp.f32 %v1961_v19  ;;  %v1801_v21 = vadd.f32 %v3949_v25, %v1784_v10 }
 0x2bd   : > { %v1653_v15 = vmul.f32 %v3904_v58, %v4031_v51  ;;  %v1822_v41 = vmul.f32 %v3902_v16, %v4031_v51  ;;  %v1601_v40 = vadd.f32 %v2401_v24, %v3897_v4 }
 0x2bf   : > { %v1670_v34 = vadd.f32 %v3912_v50, %v1653_v15  ;;  %v1842_v11 = vadd.f32 %v3910_v8, %v1822_v41  ;;  %v1654_v14 = vmul.f32 %v3904_v58, %v1601_v40  ;;  %v1823_v57 = vmul.f32 %v3902_v16, %v1601_v40 }
 0x2c1   : > { %v1686_v37 = vmul.f32 %v1670_v34, %v4031_v51  ;;  %v1858_v35 = vmul.f32 %v1842_v11, %v4031_v51  ;;  %v1671_v53 = vadd.f32 %v3912_v50, %v1654_v14  ;;  %v1843_v2 = vadd.f32 %v3910_v8, %v1823_v57 }
 0x2c3   : > { %v1703_v27 = vadd.f32 %v3926_v47, %v1686_v37  ;;  %v1878_v30 = vadd.f32 %v3924_v56, %v1858_v35  ;;  %v1687_v49 = vmul.f32 %v1671_v53, %v1601_v40  ;;  %v1859_v62 = vmul.f32 %v1843_v2, %v1601_v40  ;;  %v2631_v3 = vpop.eup %2630 }
 0x2c4   : > { %v1992_v23 = vmul.f32 %v2631_v3, %v1800_v52 }
 0x2c5   : > { %v1894_v13 = vmul.f32 %v1878_v30, %v4031_v51  ;;  %v1704_v59 = vadd.f32 %v3926_v47, %v1687_v49  ;;  %v1879_v5 = vadd.f32 %v3924_v56, %v1859_v62  ;;  %v2633_v48 = vpop.eup %2632  ;;  %v1719_v29 = vmul.f32 %v1703_v27, %v4031_v51 }
 0x2c6   : > { %v1993_v33 = vmul.f32 %v2633_v48, %v1801_v21 }
 0x2c7   : > { %v1914_v60 = vadd.f32 %v3935_v9, %v1894_v13  ;;  %v1720_v42 = vmul.f32 %v1704_v59, %v1601_v40  ;;  %v1895_v22 = vmul.f32 %v1879_v5, %v1601_v40  ;;  %v1736_v43 = vadd.f32 %v3940_v36, %v1719_v29 }
 0x2c8   : > { %v2328_v0 = vpack.c.bf16 %v1993_v33, %v1992_v23 }
 0x2c9   : > { %v1930_v17 = vmul.f32 %v1914_v60, %v4031_v51  ;;  %v1915_v1 = vadd.f32 %v3935_v9, %v1895_v22  ;;  %v1737_v61 = vadd.f32 %v3940_v36, %v1720_v42  ;;  %v1752_v39 = vmul.f32 %v1736_v43, %v4031_v51 }
 0x2ca   : > { %2356 = vst [vmem:[%s3973_s27 + $0x10] sm:$0xff] %v2328_v0  }
 0x2cb   : > { %v1946_v12 = vand.u32 2147483647, %v1930_v17  ;;  %v1931_v20 = vmul.f32 %v1915_v1, %v1601_v40  ;;  %v1753_v38 = vmul.f32 %v1737_v61, %v1601_v40  ;;  %v1769_v19 = vadd.f32 %v3945_v63, %v1752_v39 }
 0x2cd   : > { %v1962_v31 = vadd.f32 1.0, %v1946_v12  ;;  %v1947_v55 = vand.u32 2147483647, %v1931_v20  ;;  %v2402_v32 = vpop.f32.mrb[16].mxu1  ;;  %v1770_v24 = vadd.f32 %v3945_v63, %v1753_v38  ;;  %v1785_v14 = vmul.f32 %v1769_v19, %v4031_v51 }
 0x2ce   : > { %v2403_v54 = vpop.f32.mrb[17].mxu1 }
 0x2cf   : > { %2634 = vrcp.f32 %v1962_v31  ;;  %v1963_v6 = vadd.f32 1.0, %v1947_v55  ;;  %v2405_v18 = vpop.f32.mrb[18].mxu1  ;;  %v2404_v28 = vadd.f32 %v2403_v54, %v2402_v32  ;;  %v1786_v57 = vmul.f32 %v1770_v24, %v1601_v40 }
 0x2d0   : > { %v2406_v44 = vpop.f32.mrb[19].mxu1  ;;  %v1802_v62 = vadd.f32 %v3949_v25, %v1785_v14 }
 0x2d1   : > { %2636 = vrcp.f32 %v1963_v6  ;;  %v2407_v26 = vadd.f32 %v2406_v44, %v2405_v18  ;;  %v1606_v15 = vadd.f32 %v2404_v28, %v3897_v4  ;;  %v1803_v3 = vadd.f32 %v3949_v25, %v1786_v57 }
 0x2d3   : > { %v1609_v41 = vadd.f32 %v2407_v26, %v3897_v4  ;;  %v1655_v46 = vmul.f32 %v3904_v58, %v1606_v15  ;;  %v1824_v45 = vmul.f32 %v3902_v16, %v1606_v15 }
 0x2d5   : > { %v1656_v34 = vmul.f32 %v3904_v58, %v1609_v41  ;;  %v1825_v11 = vmul.f32 %v3902_v16, %v1609_v41  ;;  %v1672_v37 = vadd.f32 %v3912_v50, %v1655_v46  ;;  %v1844_v35 = vadd.f32 %v3910_v8, %v1824_v45 }
 0x2d7   : > { %v1673_v53 = vadd.f32 %v3912_v50, %v1656_v34  ;;  %v1845_v2 = vadd.f32 %v3910_v8, %v1825_v11  ;;  %v1688_v7 = vmul.f32 %v1672_v37, %v1606_v15  ;;  %v1860_v10 = vmul.f32 %v1844_v35, %v1606_v15 }
 0x2d9   : > { %v2635_v27 = vpop.eup %2634  ;;  %v1689_v30 = vmul.f32 %v1673_v53, %v1609_v41  ;;  %v1861_v49 = vmul.f32 %v1845_v2, %v1609_v41  ;;  %v1705_v51 = vadd.f32 %v3926_v47, %v1688_v7  ;;  %v1880_v40 = vadd.f32 %v3924_v56, %v1860_v10 }
 0x2da   : > { %v1994_v21 = vmul.f32 %v2635_v27, %v1802_v62 }
 0x2db   : > { %v2637_v13 = vpop.eup %2636  ;;  %v1706_v59 = vadd.f32 %v3926_v47, %v1689_v30  ;;  %v1881_v5 = vadd.f32 %v3924_v56, %v1861_v49  ;;  %v1721_v48 = vmul.f32 %v1705_v51, %v1606_v15  ;;  %v1896_v52 = vmul.f32 %v1880_v40, %v1606_v15 }
 0x2dc   : > { %v1995_v29 = vmul.f32 %v2637_v13, %v1803_v3 }
 0x2dd   : > { %v1722_v60 = vmul.f32 %v1706_v59, %v1609_v41  ;;  %v1897_v42 = vmul.f32 %v1881_v5, %v1609_v41  ;;  %v1916_v22 = vadd.f32 %v3935_v9, %v1896_v52  ;;  %v1738_v17 = vadd.f32 %v3940_v36, %v1721_v48 }
 0x2de   : > { %v2333_v23 = vpack.c.bf16 %v1995_v29, %v1994_v21 }
 0x2df   : > { %v1917_v33 = vadd.f32 %v3935_v9, %v1897_v42  ;;  %v1932_v1 = vmul.f32 %v1916_v22, %v1606_v15  ;;  %v1739_v43 = vadd.f32 %v3940_v36, %v1722_v60  ;;  %v1754_v31 = vmul.f32 %v1738_v17, %v1606_v15 }
 0x2e0   : > { %2357 = vst [vmem:[%s3973_s27 + $0x18] sm:$0xff] %v2333_v23  }
 0x2e1   : > { %v1933_v61 = vmul.f32 %v1917_v33, %v1609_v41  ;;  %v1948_v0 = vand.u32 2147483647, %v1932_v1  ;;  %v1755_v32 = vmul.f32 %v1739_v43, %v1609_v41  ;;  %v1771_v26 = vadd.f32 %v3945_v63, %v1754_v31 }
 0x2e3   : > { %v1949_v12 = vand.u32 2147483647, %v1933_v61  ;;  %v2408_v20 = vpop.f32.mrb[20].mxu1  ;;  %v1964_v55 = vadd.f32 1.0, %v1948_v0  ;;  %v1772_v19 = vadd.f32 %v3945_v63, %v1755_v32  ;;  %v1787_v37 = vmul.f32 %v1771_v26, %v1606_v15 }
 0x2e4   : > { %v2409_v39 = vpop.f32.mrb[21].mxu1 }
 0x2e5   : > { %v1965_v38 = vadd.f32 1.0, %v1949_v12  ;;  %v2410_v54 = vadd.f32 %v2409_v39, %v2408_v20  ;;  %v2411_v6 = vpop.f32.mrb[22].mxu1  ;;  %2638 = vrcp.f32 %v1964_v55  ;;  %v1788_v35 = vmul.f32 %v1772_v19, %v1609_v41 }
 0x2e6   : > { %v2412_v18 = vpop.f32.mrb[23].mxu1  ;;  %v1804_v15 = vadd.f32 %v3949_v25, %v1787_v37 }
 0x2e7   : > { %2640 = vrcp.f32 %v1965_v38  ;;  %v4090_v28 = vadd.f32 %v2410_v54, %v3897_v4  ;;  %v2413_v44 = vadd.f32 %v2412_v18, %v2411_v6  ;;  %v1805_v41 = vadd.f32 %v3949_v25, %v1788_v35 }
 0x2e9   : > { %v1657_v24 = vmul.f32 %v3904_v58, %v4090_v28  ;;  %v1826_v46 = vmul.f32 %v3902_v16, %v4090_v28  ;;  %v4099_v45 = vadd.f32 %v2413_v44, %v3897_v4 }
 0x2eb   : > { %v1674_v34 = vadd.f32 %v3912_v50, %v1657_v24  ;;  %v1846_v11 = vadd.f32 %v3910_v8, %v1826_v46  ;;  %v1658_v14 = vmul.f32 %v3904_v58, %v4099_v45  ;;  %v1827_v57 = vmul.f32 %v3902_v16, %v4099_v45 }
 0x2ed   : > { %v1690_v53 = vmul.f32 %v1674_v34, %v4090_v28  ;;  %v1862_v2 = vmul.f32 %v1846_v11, %v4090_v28  ;;  %v1675_v7 = vadd.f32 %v3912_v50, %v1658_v14  ;;  %v1847_v10 = vadd.f32 %v3910_v8, %v1827_v57 }
 0x2ef   : > { %v1707_v27 = vadd.f32 %v3926_v47, %v1690_v53  ;;  %v1882_v30 = vadd.f32 %v3924_v56, %v1862_v2  ;;  %v1691_v49 = vmul.f32 %v1675_v7, %v4099_v45  ;;  %v1863_v62 = vmul.f32 %v1847_v10, %v4099_v45  ;;  %v2639_v3 = vpop.eup %2638 }
 0x2f0   : > { %v1996_v5 = vmul.f32 %v2639_v3, %v1804_v15 }
 0x2f1   : > { %v2641_v51 = vpop.eup %2640  ;;  %v1898_v40 = vmul.f32 %v1882_v30, %v4090_v28  ;;  %v1708_v13 = vadd.f32 %v3926_v47, %v1691_v49  ;;  %v1883_v59 = vadd.f32 %v3924_v56, %v1863_v62  ;;  %v1723_v52 = vmul.f32 %v1707_v27, %v4090_v28 }
 0x2f2   : > { %v1997_v48 = vmul.f32 %v2641_v51, %v1805_v41 }
 0x2f3   : > { %v1918_v21 = vadd.f32 %v3935_v9, %v1898_v40  ;;  %v1724_v29 = vmul.f32 %v1708_v13, %v4099_v45  ;;  %v1899_v60 = vmul.f32 %v1883_v59, %v4099_v45  ;;  %v1740_v33 = vadd.f32 %v3940_v36, %v1723_v52 }
 0x2f4   : > { %v2338_v42 = vpack.c.bf16 %v1997_v48, %v1996_v5 }
 0x2f5   : > { %v1934_v22 = vmul.f32 %v1918_v21, %v4090_v28  ;;  %v1919_v23 = vadd.f32 %v3935_v9, %v1899_v60  ;;  %v1741_v1 = vadd.f32 %v3940_v36, %v1724_v29  ;;  %v1756_v32 = vmul.f32 %v1740_v33, %v4090_v28 }
 0x2f6   : > { %2358 = vst [vmem:[%s3973_s27 + $0x20] sm:$0xff] %v2338_v42  }
 0x2f7   : > { %v1950_v17 = vand.u32 2147483647, %v1934_v22  ;;  %v1935_v43 = vmul.f32 %v1919_v23, %v4099_v45  ;;  %v1757_v39 = vmul.f32 %v1741_v1, %v4099_v45  ;;  %v1773_v24 = vadd.f32 %v3945_v63, %v1756_v32 }
 0x2f9   : > { %v2414_v61 = vpop.f32.mrb[24].mxu1  ;;  %v1966_v0 = vadd.f32 1.0, %v1950_v17  ;;  %v1951_v12 = vand.u32 2147483647, %v1935_v43  ;;  %v1774_v46 = vadd.f32 %v3945_v63, %v1757_v39  ;;  %v1789_v7 = vmul.f32 %v1773_v24, %v4090_v28 }
 0x2fa   : > { %v2415_v20 = vpop.f32.mrb[25].mxu1 }
 0x2fb   : > { %v2416_v31 = vadd.f32 %v2415_v20, %v2414_v61  ;;  %v2417_v55 = vpop.f32.mrb[26].mxu1  ;;  %v1967_v38 = vadd.f32 1.0, %v1951_v12  ;;  %2642 = vrcp.f32 %v1966_v0  ;;  %v1790_v10 = vmul.f32 %v1774_v46, %v4099_v45 }
 0x2fc   : > { %v2418_v54 = vpop.f32.mrb[27].mxu1  ;;  %v1806_v13 = vadd.f32 %v3949_v25, %v1789_v7 }
 0x2fd   : > { %v4133_v6 = vadd.f32 %v2416_v31, %v3897_v4  ;;  %v2419_v18 = vadd.f32 %v2418_v54, %v2417_v55  ;;  %2644 = vrcp.f32 %v1967_v38  ;;  %v1807_v28 = vadd.f32 %v3949_v25, %v1790_v10 }
 0x2ff   : > { %v1659_v44 = vmul.f32 %v3904_v58, %v4133_v6  ;;  %v1828_v26 = vmul.f32 %v3902_v16, %v4133_v6  ;;  %v1625_v19 = vadd.f32 %v2419_v18, %v3897_v4 }
 0x301   : > { %v1676_v34 = vadd.f32 %v3912_v50, %v1659_v44  ;;  %v1848_v11 = vadd.f32 %v3910_v8, %v1828_v26  ;;  %v1660_v14 = vmul.f32 %v3904_v58, %v1625_v19  ;;  %v1829_v57 = vmul.f32 %v3902_v16, %v1625_v19 }
 0x303   : > { %v1692_v37 = vmul.f32 %v1676_v34, %v4133_v6  ;;  %v1864_v35 = vmul.f32 %v1848_v11, %v4133_v6  ;;  %v1677_v53 = vadd.f32 %v3912_v50, %v1660_v14  ;;  %v1849_v2 = vadd.f32 %v3910_v8, %v1829_v57 }
 0x305   : > { %v1709_v27 = vadd.f32 %v3926_v47, %v1692_v37  ;;  %v1884_v30 = vadd.f32 %v3924_v56, %v1864_v35  ;;  %v1693_v49 = vmul.f32 %v1677_v53, %v1625_v19  ;;  %v1865_v62 = vmul.f32 %v1849_v2, %v1625_v19  ;;  %v2643_v3 = vpop.eup %2642 }
 0x306   : > { %v1998_v52 = vmul.f32 %v2643_v3, %v1806_v13 }
 0x307   : > { %v1900_v15 = vmul.f32 %v1884_v30, %v4133_v6  ;;  %v1710_v41 = vadd.f32 %v3926_v47, %v1693_v49  ;;  %v1885_v51 = vadd.f32 %v3924_v56, %v1865_v62  ;;  %v2645_v40 = vpop.eup %2644  ;;  %v1725_v45 = vmul.f32 %v1709_v27, %v4133_v6 }
 0x308   : > { %v1999_v21 = vmul.f32 %v2645_v40, %v1807_v28 }
 0x309   : > { %v1920_v59 = vadd.f32 %v3935_v9, %v1900_v15  ;;  %v1726_v5 = vmul.f32 %v1710_v41, %v1625_v19  ;;  %v1901_v48 = vmul.f32 %v1885_v51, %v1625_v19  ;;  %v1742_v42 = vadd.f32 %v3940_v36, %v1725_v45 }
 0x30a   : > { %v2343_v23 = vpack.c.bf16 %v1999_v21, %v1998_v52 }
 0x30b   : > { %v1936_v29 = vmul.f32 %v1920_v59, %v4133_v6  ;;  %v1921_v60 = vadd.f32 %v3935_v9, %v1901_v48  ;;  %v1743_v22 = vadd.f32 %v3940_v36, %v1726_v5  ;;  %v1758_v0 = vmul.f32 %v1742_v42, %v4133_v6 }
 0x30c   : > { %2359 = vst [vmem:[%s3973_s27 + $0x28] sm:$0xff] %v2343_v23  }
 0x30d   : > { %v1952_v33 = vand.u32 2147483647, %v1936_v29  ;;  %v1937_v17 = vmul.f32 %v1921_v60, %v1625_v19  ;;  %v1759_v12 = vmul.f32 %v1743_v22, %v1625_v19  ;;  %v1775_v54 = vadd.f32 %v3945_v63, %v1758_v0 }
 0x30e   : > { %v2420_v61 = vpop.f32.mrb[28].mxu1 }
 0x30f   : > { %v1968_v1 = vadd.f32 1.0, %v1952_v33  ;;  %v1953_v43 = vand.u32 2147483647, %v1937_v17  ;;  %v2421_v20 = vpop.f32.mrb[29].mxu1  ;;  %v1776_v18 = vadd.f32 %v3945_v63, %v1759_v12  ;;  %v1791_v14 = vmul.f32 %v1775_v54, %v4133_v6 }
 0x310   : > { %v2423_v55 = vpop.f32.mrb[30].mxu1  ;;  %v2422_v32 = vadd.f32 %v2421_v20, %v2420_v61 }
 0x311   : > { %2646 = vrcp.f32 %v1968_v1  ;;  %v1969_v31 = vadd.f32 1.0, %v1953_v43  ;;  %v2424_v39 = vpop.f32.mrb[31].mxu1  ;;  %v1792_v57 = vmul.f32 %v1776_v18, %v1625_v19 }
 0x312   : > { %v2425_v38 = vadd.f32 %v2424_v39, %v2423_v55  ;;  %v1630_v44 = vadd.f32 %v2422_v32, %v3897_v4 }
 0x313   : > { %2648 = vrcp.f32 %v1969_v31 }
 0x314   : > { %v1633_v26 = vadd.f32 %v2425_v38, %v3897_v4  ;;  %v1661_v24 = vmul.f32 %v3904_v58, %v1630_v44  ;;  %v1830_v46 = vmul.f32 %v3902_v16, %v1630_v44 }
 0x316   : > { %v1662_v34 = vmul.f32 %v3904_v58, %v1633_v26  ;;  %v1831_v11 = vmul.f32 %v3902_v16, %v1633_v26  ;;  %v1678_v37 = vadd.f32 %v3912_v50, %v1661_v24  ;;  %v1850_v35 = vadd.f32 %v3910_v8, %v1830_v46 }
 0x317   : > { %v1808_v58 = vadd.f32 %v3949_v25, %v1791_v14  ;;  %v1809_v16 = vadd.f32 %v3949_v25, %v1792_v57 }
 0x318   : > { %v1679_v53 = vadd.f32 %v3912_v50, %v1662_v34  ;;  %v1851_v2 = vadd.f32 %v3910_v8, %v1831_v11  ;;  %v1694_v4 = vmul.f32 %v1678_v37, %v1630_v44  ;;  %v1866_v7 = vmul.f32 %v1850_v35, %v1630_v44 }
 0x31a   : > { %v1695_v27 = vmul.f32 %v1679_v53, %v1633_v26  ;;  %v1867_v30 = vmul.f32 %v1851_v2, %v1633_v26  ;;  %v1711_v6 = vadd.f32 %v3926_v47, %v1694_v4  ;;  %v1886_v19 = vadd.f32 %v3924_v56, %v1866_v7 }
 0x31b   : > { %v2647_v10 = vpop.eup %2646 }
 0x31c   : > { %v1712_v62 = vadd.f32 %v3926_v47, %v1695_v27  ;;  %v1887_v50 = vadd.f32 %v3924_v56, %v1867_v30  ;;  %v1727_v8 = vmul.f32 %v1711_v6, %v1630_v44  ;;  %v1902_v3 = vmul.f32 %v1886_v19, %v1630_v44 }
 0x31d   : > { %v2649_v49 = vpop.eup %2648  ;;  %v2000_v15 = vmul.f32 %v2647_v10, %v1808_v58 }
 0x31e   : > { %v2001_v41 = vmul.f32 %v2649_v49, %v1809_v16  ;;  %v1728_v51 = vmul.f32 %v1712_v62, %v1633_v26  ;;  %v1903_v40 = vmul.f32 %v1887_v50, %v1633_v26  ;;  %v1922_v13 = vadd.f32 %v3935_v9, %v1902_v3 }
 0x31f   : > { %v1744_v59 = vadd.f32 %v3940_v36, %v1727_v8 }
 0x320   : > { %v2348_v28 = vpack.c.bf16 %v2001_v41, %v2000_v15  ;;  %v1923_v45 = vadd.f32 %v3935_v9, %v1903_v40  ;;  %v1938_v5 = vmul.f32 %v1922_v13, %v1630_v44  ;;  %v1745_v48 = vadd.f32 %v3940_v36, %v1728_v51 }
 0x321   : > { %v1760_v21 = vmul.f32 %v1744_v59, %v1630_v44 }
 0x322   : > { %2360 = vst [vmem:[%s3973_s27 + $0x30] sm:$0xff] %v2348_v28   ;;  %v1939_v47 = vmul.f32 %v1923_v45, %v1633_v26  ;;  %v1954_v56 = vand.u32 2147483647, %v1938_v5  ;;  %v1761_v60 = vmul.f32 %v1745_v48, %v1633_v26 }
 0x323   : > { %v1777_v9 = vadd.f32 %v3945_v63, %v1760_v21 }
 0x324   : > { %v1955_v52 = vand.u32 2147483647, %v1939_v47  ;;  %v1970_v29 = vadd.f32 1.0, %v1954_v56  ;;  %v1778_v22 = vadd.f32 %v3945_v63, %v1761_v60 }
 0x325   : > { %v1793_v23 = vmul.f32 %v1777_v9, %v1630_v44 }
 0x326   : > { %v1971_v42 = vadd.f32 1.0, %v1955_v52  ;;  %2650 = vrcp.f32 %v1970_v29  ;;  %v1794_v36 = vmul.f32 %v1778_v22, %v1633_v26 }
 0x327   : > { %v1810_v17 = vadd.f32 %v3949_v25, %v1793_v23 }
 0x328   : > { %2652 = vrcp.f32 %v1971_v42  ;;  %v1811_v1 = vadd.f32 %v3949_v25, %v1794_v36 }
 0x330   : > { %v2651_v33 = vpop.eup %2650 }
 0x331   : > { %v2002_v61 = vmul.f32 %v2651_v33, %v1810_v17 }
 0x332   : > { %v2653_v43 = vpop.eup %2652 }
 0x333   : > { %v2003_v0 = vmul.f32 %v2653_v43, %v1811_v1 }
 0x335   : > { %v2353_v63 = vpack.c.bf16 %v2003_v0, %v2002_v61 }
 0x337   : > { %2361 = vst [vmem:[%s3973_s27 + $0x38] sm:$0xff] %v2353_v63  }
 0x338   : > { %2766 = shalt.err (!%p2763_p12)
}
 0x339   : > { %s2767_s24 = scalar_lea.hbm %s4200_s12, 1024  ;;  %s2771_s14 = scalar_lea.hbm %s4254_s8, 4096 }
 0x33a   : > { %p2768_p11 = scmp.ne.s32.totalorder %s4200_s12, %s2767_s24  ;;  %p2772_p10 = scmp.lt.u32.totalorder %s4200_s12, %s4254_s8 }
 0x33b   : > { %p2773_p13 = scmp.lt.u32.totalorder %s2771_s14, %s2767_s24  ;;  %p2775_p3 = scmp.lt.u32.totalorder %s2767_s24, %s4200_s12 }
 0x33c   : > { %p2769_p2 = pnand %p2768_p11, %p3021_p7 }
 0x33d   : > { %p2774_p0 = por %p2773_p13, %p2772_p10 }
 0x33e   : > { %p2770_p8 = pneg %p2769_p2 }
 0x33f   : > { %p2776_p5 = por %p2775_p3, %p2774_p0 }
 0x341   : > { %p2777_p9 = pnand %p2776_p5, %p2770_p8 }
 0x343   : > { %2780 = shalt.err (!%p2777_p9)
}
 0x344   : > { %s2839_s21 = smov 64   ;;  %s2840_s18 = smov 4  }
 0x345   : > { %2440 = dma.vmem_to_hbm [thread:$0]  (%p3021_p7), %s4202_s20, 1024, %s4200_s12, %s2085_s22, %s2839_s21, %s2839_s21, %s2840_s18  }
 0x346 PF: > { %s4276_s25 = sld [smem:[#allocation15_spill]]  ;;  %s4277_s9 = sld [smem:[#allocation16_spill]] }
 0x347   : > { %p2467_p1 = scmp.ge.s32.totalorder %s2827_s30, 2 }
 0x34c   : > { %s2113_s11 = sand.u32 1, %s4276_s25   ;;  %p4278_p4 = scmp.ne.s32.totalorder %s4277_s9, 0 }
 0x34d   : > { %s2114_s13 = scalar_lea.sflag [#allocation4], %s2113_s11 }
 0x34e   : > { %p2457_p6 = pnand %p2467_p1, %p4278_p4 }
 0x350   : > { %2810 = dma.done.wait (!%p2457_p6), %s2114_s13, 1024  }
 0x351   : > { %2812 = vsyncadd (!%p2457_p6), %s2114_s13, 4294966272  ;;  %p23_p12 = scmp.ge.s32.totalorder %s3007_s15, 6   ;;  %s4279_s27 = smov %s2819_s28 }
 0x352   : > { %s4280_s28 = smov %s2823_s29  ;;  %s4281_s29 = smov %s3017_s19 }
 0x353   : > { %s4282_s30 = smov %s3007_s15  ;;  %25 = sbr.rel (!%p23_p12) target bundleno = 7 (0x7), region = 113 }
 0x35a   :  { %2119 = vsyncpa [#allocation3], 1 }
 0x35b   :  { %2121 = vsyncpa [#allocation3 + $0x1], 1 }
 0x35c   :  { %2122 = vsyncpa [#allocation8], 1 }
 0x35d   :  { %2123 = vsyncpa [#allocation4], 1 }
 0x35e   :  { %2125 = vsyncpa [#allocation4 + $0x1], 1 }
 0x35f   :  { %2126 = vsyncpa [#allocation5], 1 }
 0x360   :  { %2128 = vsyncpa [#allocation5 + $0x1], 1 }

</bundles_post_ra>
